<compile_context>
chip_gen: v6e
topology: v6e:2x2x1
jax: 0.10.0
libtpu: 0.0.40
codegen_flags: <defaults>
</compile_context>

<pallas_src>
import functools
import math

import jax
import jax.numpy as jnp
from jax import lax
from jax.experimental import pallas as pl
from jax.experimental.pallas import tpu as pltpu

LEAK = 0.2  # torchelie ConvBlock.leaky() default negative slope


def _leaky(x):
    return jnp.where(x >= 0, x, LEAK * x)


def _round_up(v, m):
    return ((v + m - 1) // m) * m


def _autogan_block_kernel(*refs, ks, H, W, in_ch, out_ch, cpad1, cpad2,
                          has_shortcut, has_skips, pad_off, spad):
    """One batch element per grid step, everything in (C, H*W) lane-dense layout.

    refs (in order):
      xu       (1, Cin, S)  bf16   nearest-upsampled x, flattened spatial
      [sk      (1, Cs,  S)  bf16]  upsampled + channel-concat skips (if any)
      w1f      (ks, Cout, ks*cpad1)  conv1 taps, chunked along dy
      b1       (Cout, 1) f32
      [wsk     (Cout, Cs) bf16, bsk (Cout, 1) f32]
      [wsc     (Cout, Cin) bf16]   1x1 shortcut (bias folded into b2)
      w2f      (ks, Cout, ks*cpad2)  conv2 taps, chunked along dy
      b2c      (Cout, 1) f32       b2 (+ b_sc)
      out      (1, Cout, S) bf16
      mid      (1, Cout, S) bf16
      xpad1    (cpad1, spad) bf16  lane-padded flat buffer for conv1 input
      xpad2    (cpad2, spad) bf16  lane-padded flat buffer for conv2 input
      im       (ks*ks*max(cpad), S) bf16  im2col scratch shared by both convs
    """
    S = H * W
    p = ks // 2
    bf16 = jnp.bfloat16

    it = iter(refs)
    xu_ref = next(it)
    sk_ref = next(it) if has_skips else None
    w1_ref = next(it)
    b1_ref = next(it)
    if has_skips:
        wsk_ref = next(it)
        bsk_ref = next(it)
    wsc_ref = next(it) if has_shortcut else None
    w2_ref = next(it)
    b2_ref = next(it)
    out_ref = next(it)
    mid_ref = next(it)
    xpad1 = next(it)
    xpad2 = next(it)
    im_ref = next(it)

    # Hoisted column-edge masks (one per horizontal tap offset), reused by both
    # convs; vertical out-of-range taps read the zero pad bands instead.
    col = lax.broadcasted_iota(jnp.int32, (1, S), 1) % W
    col_masks = {}
    for ox in range(-p, p + 1):
        if ox < 0:
            col_masks[ox] = col >= -ox
        elif ox > 0:
            col_masks[ox] = col < W - ox

    def fill_pad(pad_ref, data_bf, c):
        rows = pad_ref.shape[0]
        # Only the two zero halo bands + interior are written (no full re-zero);
        # padded channel rows are zeroed so im2col stores carry clean zeros.
        pad_ref[:, 0:pad_off] = jnp.zeros((rows, pad_off), bf16)
        pad_ref[:, pad_off + S:spad] = jnp.zeros((rows, pad_off), bf16)
        pad_ref[0:c, pad_off:pad_off + S] = data_bf
        if c < rows:
            pad_ref[c:rows, pad_off:pad_off + S] = jnp.zeros((rows - c, S), bf16)

    def conv_same(pad_ref, w_ref, cpad):
        # K-chunked im2col: build the ks taps of one dy row-group (aligned
        # 16-row groups), then immediately do an accumulating MXU dot on that
        # chunk, so the next chunk's tap stores overlap the current matmul.
        acc = None
        kc = ks * cpad
        for dy in range(ks):
            for dx in range(ks):
                g = dy * ks + dx
                sh = (dy - p) * W + (dx - p)
                t = pad_ref[:, pad_off + sh:pad_off + sh + S]      # (cpad, S)
                m = col_masks.get(dx - p)
                if m is not None:
                    t = jnp.where(m, t, 0)
                im_ref[g * cpad:(g + 1) * cpad, :] = t
            part = jnp.dot(w_ref[dy], im_ref[dy * kc:(dy + 1) * kc, :],
                           preferred_element_type=jnp.float32)
            acc = part if acc is None else acc + part
        return acc

    # pre-activation LeakyReLU in bf16 (bf16 VALU on v6e/v7x; still lowers on v5e)
    xp_bf = _leaky(xu_ref[0])                                      # (Cin, S) bf16

    # ---- conv1 ----
    fill_pad(xpad1, xp_bf, in_ch)
    x_mid = conv_same(xpad1, w1_ref, cpad1) + b1_ref[...]          # f32 (Cout, S)
    mid_ref[0] = x_mid.astype(mid_ref.dtype)                       # bf16 store

    # ---- summed 1x1 skip convs: one (Cout, Cs) @ (Cs, S) matmul ----
    if has_skips:
        x_w = x_mid + jnp.dot(wsk_ref[...], sk_ref[0],
                              preferred_element_type=jnp.float32) + bsk_ref[...]
    else:
        x_w = x_mid

    # ---- conv2 (pre-act leaky) + shortcut ----
    a2 = _leaky(x_w.astype(bf16))
    fill_pad(xpad2, a2, out_ch)
    out = conv_same(xpad2, w2_ref, cpad2) + b2_ref[...]
    if has_shortcut:
        out = out + jnp.dot(wsc_ref[...], xp_bf,
                            preferred_element_type=jnp.float32)
    else:
        out = out + xu_ref[0].astype(jnp.float32)                  # identity skip
    out_ref[0] = out.astype(out_ref.dtype)                         # bf16 store


def _nearest_up_nchw(x_nchw, out_h, out_w):
    # Integer-factor nearest resize; matches F.interpolate(mode='nearest') when
    # the target size is an integer multiple of the input size.
    h, w = x_nchw.shape[2], x_nchw.shape[3]
    assert out_h % h == 0 and out_w % w == 0, "integer-factor nearest only"
    return jnp.repeat(jnp.repeat(x_nchw, out_h // h, axis=2), out_w // w, axis=3)


def autogan_gen_block(x_nchw, skips_nchw, params, *, ks=3):
    """Pallas TPU AutoGANGenBlock.forward (mode='nearest').

    Returns (out, x_mid) in NCHW, bf16 (f32 accumulation inside the kernel).
    """
    N, in_ch, Hin, Win = x_nchw.shape
    out_ch = params["b1"].shape[-1]
    has_shortcut = in_ch != out_ch
    has_skips = len(skips_nchw) > 0
    H, W = 2 * Hin, 2 * Win
    S = H * W
    p = ks // 2
    cdt = jnp.bfloat16  # MXU / HBM activation dtype

    step_bytes = 0

    def add_bytes(shape, dtype):
        nonlocal step_bytes
        step_bytes += math.prod(shape) * jnp.dtype(dtype).itemsize

    # nearest 2x upsample in bf16 (cast BEFORE repeat: halves that op's traffic)
    xu = _nearest_up_nchw(x_nchw.astype(cdt), H, W).reshape(N, in_ch, S)

    inputs = [xu]
    in_specs = [pl.BlockSpec((1, in_ch, S), lambda n: (n, 0, 0))]
    add_bytes((1, in_ch, S), cdt)

    if has_skips:
        sk = jnp.concatenate(
            [_nearest_up_nchw(s.astype(cdt), H, W) for s in skips_nchw], axis=1)
        Cs = sk.shape[1]
        sk = sk.reshape(N, Cs, S)
        inputs.append(sk)
        in_specs.append(pl.BlockSpec((1, Cs, S), lambda n: (n, 0, 0)))
        add_bytes((1, Cs, S), cdt)

    # sublane-aligned tap row groups (bf16 tile = 16 sublanes); the padded
    # input-channel rows are zero both in im2col scratch and in the weights.
    cpad1 = _round_up(in_ch, 16)
    cpad2 = _round_up(out_ch, 16)

    # conv1 taps as (ks, Cout, ks*cpad1), chunked along dy; col = dx*cpad1 + cin
    w1p = jnp.pad(params["w1_hwio"], ((0, 0), (0, 0), (0, cpad1 - in_ch), (0, 0)))
    w1f = jnp.transpose(w1p, (0, 3, 1, 2)).reshape(ks, out_ch, ks * cpad1).astype(cdt)
    b1 = params["b1"].reshape(1, out_ch).T.astype(jnp.float32)
    inputs += [w1f, b1]
    in_specs += [pl.BlockSpec((ks, out_ch, ks * cpad1), lambda n: (0, 0, 0)),
                 pl.BlockSpec((out_ch, 1), lambda n: (0, 0))]
    add_bytes(w1f.shape, cdt)
    add_bytes((out_ch, 1), jnp.float32)

    if has_skips:
        wsk = jnp.concatenate(
            [w for _, w in zip(skips_nchw, params["w_skips"])], axis=0).T.astype(cdt)
        bsk = sum(b for _, b in zip(skips_nchw, params["b_skips"]))
        bsk = bsk.reshape(1, out_ch).T.astype(jnp.float32)
        inputs += [wsk, bsk]
        in_specs += [pl.BlockSpec((out_ch, wsk.shape[1]), lambda n: (0, 0)),
                     pl.BlockSpec((out_ch, 1), lambda n: (0, 0))]
        add_bytes(wsk.shape, cdt)
        add_bytes((out_ch, 1), jnp.float32)

    b2 = params["b2"]
    if has_shortcut:
        wsc = params["w_sc"].T.astype(cdt)          # (Cout, Cin) 1x1 shortcut
        b2 = b2 + params["b_sc"]                    # fold shortcut bias into b2
        inputs.append(wsc)
        in_specs.append(pl.BlockSpec((out_ch, in_ch), lambda n: (0, 0)))
        add_bytes(wsc.shape, cdt)

    w2p = jnp.pad(params["w2_hwio"], ((0, 0), (0, 0), (0, cpad2 - out_ch), (0, 0)))
    w2f = jnp.transpose(w2p, (0, 3, 1, 2)).reshape(ks, out_ch, ks * cpad2).astype(cdt)
    b2c = b2.reshape(1, out_ch).T.astype(jnp.float32)
    inputs += [w2f, b2c]
    in_specs += [pl.BlockSpec((ks, out_ch, ks * cpad2), lambda n: (0, 0, 0)),
                 pl.BlockSpec((out_ch, 1), lambda n: (0, 0))]
    add_bytes(w2f.shape, cdt)
    add_bytes((out_ch, 1), jnp.float32)

    # lane-padded flat buffer geometry (pad bands hold the vertical zero halo);
    # no runtime VMEM bounds checks exist, so assert the bands cover every shift.
    pad_off = max(128, _round_up(p * (W + 1), 128))
    assert pad_off >= p * (W + 1) and pad_off % 128 == 0
    spad = S + 2 * pad_off
    im_rows = ks * ks * max(cpad1, cpad2)

    out_bytes = 2 * out_ch * S * jnp.dtype(cdt).itemsize
    scratch_bytes = (cpad1 * spad + cpad2 * spad + im_rows * S) * jnp.dtype(cdt).itemsize
    vmem_limit = int(min(48 * 2**20,
                         max(4 * 2**20,
                             2 * step_bytes + 2 * out_bytes + scratch_bytes + (2 << 20))))

    kernel = functools.partial(
        _autogan_block_kernel, ks=ks, H=H, W=W, in_ch=in_ch, out_ch=out_ch,
        cpad1=cpad1, cpad2=cpad2, has_shortcut=has_shortcut,
        has_skips=has_skips, pad_off=pad_off, spad=spad)

    out, mid = pl.pallas_call(
        kernel,
        out_shape=(jax.ShapeDtypeStruct((N, out_ch, S), cdt),
                   jax.ShapeDtypeStruct((N, out_ch, S), cdt)),
        grid_spec=pltpu.PrefetchScalarGridSpec(
            num_scalar_prefetch=0,
            grid=(N,),
            in_specs=in_specs,
            out_specs=[pl.BlockSpec((1, out_ch, S), lambda n: (n, 0, 0)),
                       pl.BlockSpec((1, out_ch, S), lambda n: (n, 0, 0))],
            scratch_shapes=[pltpu.VMEM((cpad1, spad), cdt),
                            pltpu.VMEM((cpad2, spad), cdt),
                            pltpu.VMEM((im_rows, S), cdt)]),
        compiler_params=pltpu.CompilerParams(
            dimension_semantics=("parallel",),
            vmem_limit_bytes=vmem_limit),
    )(*inputs)

    # (N, Cout, H*W) -> NCHW is a free reshape
    return out.reshape(N, out_ch, H, W), mid.reshape(N, out_ch, H, W)


def init_params(key, in_ch, out_ch, skips_ch, ks=3):
    """Deterministic synthetic parameters (kaiming-like), shapes per __init__."""
    keys = jax.random.split(key, 6 + 2 * max(1, len(skips_ch)))

    def kaiming(k, shape, fan_in):
        return jax.random.normal(k, shape, jnp.float32) * jnp.sqrt(2.0 / fan_in)

    p = {}
    p["w1_hwio"] = kaiming(keys[0], (ks, ks, in_ch, out_ch), in_ch * ks * ks)
    p["w2_hwio"] = kaiming(keys[1], (ks, ks, out_ch, out_ch), out_ch * ks * ks)
    p["b1"] = 0.1 * jax.random.normal(keys[2], (1, out_ch), jnp.float32)
    p["b2"] = 0.1 * jax.random.normal(keys[3], (1, out_ch), jnp.float32)
    if in_ch != out_ch:
        p["w_sc"] = kaiming(keys[4], (in_ch, out_ch), in_ch)          # 1x1, IO
        p["b_sc"] = 0.1 * jax.random.normal(keys[5], (1, out_ch), jnp.float32)
    p["w_skips"], p["b_skips"] = [], []
    for i, ch in enumerate(skips_ch):
        p["w_skips"].append(kaiming(keys[6 + 2 * i], (ch, out_ch), ch))  # 1x1, IO
        p["b_skips"].append(
            0.1 * jax.random.normal(keys[7 + 2 * i], (1, out_ch), jnp.float32))
    return p


def ref_forward(x_nchw, skips_nchw, p, *, ks=3):
    """Pure-JAX reference matching the PyTorch forward semantics.

    Activations/weights are round-tripped through bf16 at the points the kernel
    quantizes them, so the tolerance checks kernel math rather than precision.
    """
    def q(a):
        return a.astype(jnp.bfloat16).astype(jnp.float32)

    in_ch = x_nchw.shape[1]
    out_ch = p["b1"].shape[-1]
    has_shortcut = in_ch != out_ch
    H, W = 2 * x_nchw.shape[2], 2 * x_nchw.shape[3]

    xu = q(_nearest_up_nchw(x_nchw.astype(jnp.float32), H, W))
    xu = jnp.transpose(xu, (0, 2, 3, 1))                            # NHWC

    def conv_same(v, w_hwio, b):
        y = lax.conv_general_dilated(v, q(w_hwio), (1, 1), "SAME",
                                     dimension_numbers=("NHWC", "HWIO", "NHWC"))
        return y + b.reshape(1, 1, 1, -1)

    def conv1x1(v, w, b):
        return jnp.einsum("nhwc,cd->nhwd", v, q(w)) + b.reshape(1, 1, 1, -1)

    if has_shortcut:
        xp = q(_leaky(xu))
        x_skip = conv1x1(xp, p["w_sc"], p["b_sc"])
        c1_in = xp
    else:
        x_skip = xu
        c1_in = q(_leaky(xu))
    x_mid = conv_same(c1_in, p["w1_hwio"], p["b1"])
    x_w = x_mid
    for s, w, b in zip(skips_nchw, p["w_skips"], p["b_skips"]):
        su = q(_nearest_up_nchw(s.astype(jnp.float32), H, W))
        x_w = x_w + conv1x1(jnp.transpose(su, (0, 2, 3, 1)), w, b)
    out = conv_same(q(_leaky(x_w)), p["w2_hwio"], p["b2"]) + x_skip
    return (jnp.transpose(out, (0, 3, 1, 2)),
            jnp.transpose(x_mid, (0, 3, 1, 2)))


if __name__ == "__main__":
    key = jax.random.PRNGKey(0)
    k_x, k_s0, k_s1, k_p = jax.random.split(key, 4)

    in_ch, out_ch = 4, 8          # in_ch != out_ch -> shortcut + moved preact ReLU
    skips_ch = [4, 6]
    N = 2

    x = jax.random.normal(k_x, (N, in_ch, 16, 16), jnp.float32)     # NCHW
    skips = [jax.random.normal(k_s0, (N, skips_ch[0], 16, 16), jnp.float32),
             jax.random.normal(k_s1, (N, skips_ch[1], 8, 8), jnp.float32)]

    params = init_params(k_p, in_ch, out_ch, skips_ch, ks=3)

    out, mid = autogan_gen_block(x, skips, params, ks=3)
    out, mid = jax.block_until_ready((out, mid))

    ref_out, ref_mid = ref_forward(x, skips, params, ks=3)
    assert out.shape == (N, out_ch, 32, 32) and mid.shape == (N, out_ch, 32, 32)
    out32 = out.astype(jnp.float32)
    mid32 = mid.astype(jnp.float32)
    err_out = float(jnp.max(jnp.abs(out32 - ref_out)))
    err_mid = float(jnp.max(jnp.abs(mid32 - ref_mid)))
    assert jnp.allclose(out32, ref_out, rtol=2e-2, atol=2e-2), err_out
    assert jnp.allclose(mid32, ref_mid, rtol=2e-2, atol=2e-2), err_mid

    print("KERNEL_OK")
</pallas_src>

<mosaic_0001>
module attributes {stable_mosaic.version = 11 : i64} {
  func.func @_autogan_block_kernel(%arg0: i32, %arg1: memref<1x4x1024xbf16, #tpu.memory_space<vmem>>, %arg2: memref<1x10x1024xbf16, #tpu.memory_space<vmem>>, %arg3: memref<3x8x48xbf16, #tpu.memory_space<vmem>>, %arg4: memref<8x1xf32, #tpu.memory_space<vmem>>, %arg5: memref<8x10xbf16, #tpu.memory_space<vmem>>, %arg6: memref<8x1xf32, #tpu.memory_space<vmem>>, %arg7: memref<8x4xbf16, #tpu.memory_space<vmem>>, %arg8: memref<3x8x48xbf16, #tpu.memory_space<vmem>>, %arg9: memref<8x1xf32, #tpu.memory_space<vmem>>, %arg10: memref<1x8x1024xbf16, #tpu.memory_space<vmem>>, %arg11: memref<1x8x1024xbf16, #tpu.memory_space<vmem>>, %arg12: memref<16x1280xbf16, #tpu.memory_space<vmem>>, %arg13: memref<16x1280xbf16, #tpu.memory_space<vmem>>, %arg14: memref<144x1024xbf16, #tpu.memory_space<vmem>>) attributes {dimension_semantics = [#tpu.dimension_semantics<parallel>], iteration_bounds = array<i64: 2>, scalar_prefetch = 0 : i64, scratch_operands = 3 : i64, tpu.core_type = #tpu.core_type<tc>, window_params = [{transform_indices = @transform_0, window_bounds = array<i64: 1, 4, 1024>}, {transform_indices = @transform_1, window_bounds = array<i64: 1, 10, 1024>}, {pipeline_mode = #tpu.pipeline_mode<synchronous>, transform_indices = @transform_2, window_bounds = array<i64: 3, 8, 48>}, {pipeline_mode = #tpu.pipeline_mode<synchronous>, transform_indices = @transform_3, window_bounds = array<i64: 8, 1>}, {pipeline_mode = #tpu.pipeline_mode<synchronous>, transform_indices = @transform_4, window_bounds = array<i64: 8, 10>}, {pipeline_mode = #tpu.pipeline_mode<synchronous>, transform_indices = @transform_5, window_bounds = array<i64: 8, 1>}, {pipeline_mode = #tpu.pipeline_mode<synchronous>, transform_indices = @transform_6, window_bounds = array<i64: 8, 4>}, {pipeline_mode = #tpu.pipeline_mode<synchronous>, transform_indices = @transform_7, window_bounds = array<i64: 3, 8, 48>}, {pipeline_mode = #tpu.pipeline_mode<synchronous>, transform_indices = @transform_8, window_bounds = array<i64: 8, 1>}, {transform_indices = @transform_9, window_bounds = array<i64: 1, 8, 1024>}, {transform_indices = @transform_10, window_bounds = array<i64: 1, 8, 1024>}]} {
    %0 = tpu.iota {dimensions = array<i32: 1>} : vector<1x1024xi32>
    %c32_i32 = arith.constant 32 : i32
    %c0_i32 = arith.constant 0 : i32
    %1 = arith.cmpi eq, %c32_i32, %c0_i32 : i32
    %c1_i32 = arith.constant 1 : i32
    %2 = arith.select %1, %c1_i32, %c32_i32 : i32
    %3 = vector.broadcast %2 : i32 to vector<1x1024xi32>
    %4 = arith.remsi %0, %3 : vector<1x1024xi32>
    %c0_i32_0 = arith.constant 0 : i32
    %5 = vector.broadcast %c0_i32_0 : i32 to vector<1x1024xi32>
    %6 = arith.cmpi ne, %4, %5 : vector<1x1024xi32>
    %c0_i32_1 = arith.constant 0 : i32
    %7 = vector.broadcast %c0_i32_1 : i32 to vector<1x1024xi32>
    %8 = arith.cmpi slt, %4, %7 : vector<1x1024xi32>
    %c0_i32_2 = arith.constant 0 : i32
    %9 = arith.cmpi slt, %2, %c0_i32_2 : i32
    %10 = vector.broadcast %9 : i1 to vector<1x1024xi1>
    %11 = vector.broadcast %10 : vector<1x1024xi1> to vector<1x1024xi1>
    %12 = arith.xori %8, %11 : vector<1x1024xi1>
    %13 = arith.andi %12, %6 : vector<1x1024xi1>
    %14 = vector.broadcast %2 : i32 to vector<1x1024xi32>
    %15 = arith.addi %4, %14 : vector<1x1024xi32>
    %16 = arith.select %13, %15, %4 : vector<1x1024xi1>, vector<1x1024xi32>
    %c1_i32_3 = arith.constant 1 : i32
    %17 = vector.broadcast %c1_i32_3 : i32 to vector<1x1024xi32>
    %18 = arith.cmpi sge, %16, %17 : vector<1x1024xi32>
    %c31_i32 = arith.constant 31 : i32
    %19 = vector.broadcast %c31_i32 : i32 to vector<1x1024xi32>
    %20 = arith.cmpi slt, %16, %19 : vector<1x1024xi32>
    %c0 = arith.constant 0 : index
    %c0_4 = arith.constant 0 : index
    %c0_5 = arith.constant 0 : index
    %21 = vector.load %arg1[%c0, %c0_4, %c0_5] : memref<1x4x1024xbf16, #tpu.memory_space<vmem>>, vector<1x4x1024xbf16>
    %22 = vector.shape_cast %21 : vector<1x4x1024xbf16> to vector<4x1024xbf16>
    %cst = arith.constant 0.000000e+00 : bf16
    %23 = vector.broadcast %cst : bf16 to vector<4x1024xbf16>
    %24 = arith.cmpf oge, %22, %23 : vector<4x1024xbf16>
    %cst_6 = arith.constant 2.001950e-01 : bf16
    %25 = vector.broadcast %cst_6 : bf16 to vector<4x1024xbf16>
    %26 = arith.mulf %25, %22 : vector<4x1024xbf16>
    %27 = arith.select %24, %22, %26 : vector<4x1024xi1>, vector<4x1024xbf16>
    %cst_7 = arith.constant 0.000000e+00 : bf16
    %28 = vector.broadcast %cst_7 : bf16 to vector<16x128xbf16>
    %c0_8 = arith.constant 0 : index
    %c0_9 = arith.constant 0 : index
    %29 = vector.load %arg12[%c0_8, %c0_9] : memref<16x1280xbf16, #tpu.memory_space<vmem>>, vector<16x128xbf16>
    tpu.vector_store %arg12[%c0_8, %c0_9], %28 {strides = array<i32>} : memref<16x1280xbf16, #tpu.memory_space<vmem>>, vector<16x128xbf16>,
    %cst_10 = arith.constant 0.000000e+00 : bf16
    %30 = vector.broadcast %cst_10 : bf16 to vector<16x128xbf16>
    %c0_11 = arith.constant 0 : index
    %c1152 = arith.constant 1152 : index
    %31 = vector.load %arg12[%c0_11, %c1152] : memref<16x1280xbf16, #tpu.memory_space<vmem>>, vector<16x128xbf16>
    tpu.vector_store %arg12[%c0_11, %c1152], %30 {strides = array<i32>} : memref<16x1280xbf16, #tpu.memory_space<vmem>>, vector<16x128xbf16>,
    %c0_12 = arith.constant 0 : index
    %c128 = arith.constant 128 : index
    %32 = vector.load %arg12[%c0_12, %c128] : memref<16x1280xbf16, #tpu.memory_space<vmem>>, vector<4x1024xbf16>
    tpu.vector_store %arg12[%c0_12, %c128], %27 {strides = array<i32>} : memref<16x1280xbf16, #tpu.memory_space<vmem>>, vector<4x1024xbf16>,
    %cst_13 = arith.constant 0.000000e+00 : bf16
    %33 = vector.broadcast %cst_13 : bf16 to vector<12x1024xbf16>
    %c4 = arith.constant 4 : index
    %c128_14 = arith.constant 128 : index
    %34 = vector.load %arg12[%c4, %c128_14] : memref<16x1280xbf16, #tpu.memory_space<vmem>>, vector<12x1024xbf16>
    tpu.vector_store %arg12[%c4, %c128_14], %33 {strides = array<i32>} : memref<16x1280xbf16, #tpu.memory_space<vmem>>, vector<12x1024xbf16>,
    %c0_15 = arith.constant 0 : index
    %c95 = arith.constant 95 : index
    %35 = vector.load %arg12[%c0_15, %c95] : memref<16x1280xbf16, #tpu.memory_space<vmem>>, vector<16x1024xbf16>
    %c0_i32_16 = arith.constant 0 : i32
    %36 = arith.sitofp %c0_i32_16 : i32 to bf16
    %37 = vector.shape_cast %18 : vector<1x1024xi1> to vector<1x1024xi1>
    %38 = vector.broadcast %37 : vector<1x1024xi1> to vector<16x1024xi1>
    %39 = vector.broadcast %36 : bf16 to vector<16x1024xbf16>
    %40 = arith.select %38, %35, %39 : vector<16x1024xi1>, vector<16x1024xbf16>
    %c0_17 = arith.constant 0 : index
    %c0_18 = arith.constant 0 : index
    %41 = vector.load %arg14[%c0_17, %c0_18] : memref<144x1024xbf16, #tpu.memory_space<vmem>>, vector<16x1024xbf16>
    tpu.vector_store %arg14[%c0_17, %c0_18], %40 {strides = array<i32>} : memref<144x1024xbf16, #tpu.memory_space<vmem>>, vector<16x1024xbf16>,
    %c0_19 = arith.constant 0 : index
    %c96 = arith.constant 96 : index
    %42 = vector.load %arg12[%c0_19, %c96] : memref<16x1280xbf16, #tpu.memory_space<vmem>>, vector<16x1024xbf16>
    %c16 = arith.constant 16 : index
    %c0_20 = arith.constant 0 : index
    %43 = vector.load %arg14[%c16, %c0_20] : memref<144x1024xbf16, #tpu.memory_space<vmem>>, vector<16x1024xbf16>
    tpu.vector_store %arg14[%c16, %c0_20], %42 {strides = array<i32>} : memref<144x1024xbf16, #tpu.memory_space<vmem>>, vector<16x1024xbf16>,
    %c0_21 = arith.constant 0 : index
    %c97 = arith.constant 97 : index
    %44 = vector.load %arg12[%c0_21, %c97] : memref<16x1280xbf16, #tpu.memory_space<vmem>>, vector<16x1024xbf16>
    %c0_i32_22 = arith.constant 0 : i32
    %45 = arith.sitofp %c0_i32_22 : i32 to bf16
    %46 = vector.shape_cast %20 : vector<1x1024xi1> to vector<1x1024xi1>
    %47 = vector.broadcast %46 : vector<1x1024xi1> to vector<16x1024xi1>
    %48 = vector.broadcast %45 : bf16 to vector<16x1024xbf16>
    %49 = arith.select %47, %44, %48 : vector<16x1024xi1>, vector<16x1024xbf16>
    %c32 = arith.constant 32 : index
    %c0_23 = arith.constant 0 : index
    %50 = vector.load %arg14[%c32, %c0_23] : memref<144x1024xbf16, #tpu.memory_space<vmem>>, vector<16x1024xbf16>
    tpu.vector_store %arg14[%c32, %c0_23], %49 {strides = array<i32>} : memref<144x1024xbf16, #tpu.memory_space<vmem>>, vector<16x1024xbf16>,
    %c0_24 = arith.constant 0 : index
    %c0_25 = arith.constant 0 : index
    %c0_26 = arith.constant 0 : index
    %51 = vector.load %arg3[%c0_24, %c0_25, %c0_26] : memref<3x8x48xbf16, #tpu.memory_space<vmem>>, vector<1x8x48xbf16>
    %52 = vector.shape_cast %51 : vector<1x8x48xbf16> to vector<8x48xbf16>
    %c0_27 = arith.constant 0 : index
    %c0_28 = arith.constant 0 : index
    %53 = vector.load %arg14[%c0_27, %c0_28] : memref<144x1024xbf16, #tpu.memory_space<vmem>>, vector<48x1024xbf16>
    %cst_29 = arith.constant dense<0.000000e+00> : vector<8x1024xf32>
    %54 = tpu.matmul %52, %53, %cst_29 {dimension_numbers = #tpu.dot_dimension_numbers<[1], [0], [0], [1], [0, 0, 1, 1], [], []>} : vector<8x48xbf16>, vector<48x1024xbf16>, vector<8x1024xf32> -> vector<8x1024xf32>
    %c0_30 = arith.constant 0 : index
    %c127 = arith.constant 127 : index
    %55 = vector.load %arg12[%c0_30, %c127] : memref<16x1280xbf16, #tpu.memory_space<vmem>>, vector<16x1024xbf16>
    %c0_i32_31 = arith.constant 0 : i32
    %56 = arith.sitofp %c0_i32_31 : i32 to bf16
    %57 = vector.shape_cast %18 : vector<1x1024xi1> to vector<1x1024xi1>
    %58 = vector.broadcast %57 : vector<1x1024xi1> to vector<16x1024xi1>
    %59 = vector.broadcast %56 : bf16 to vector<16x1024xbf16>
    %60 = arith.select %58, %55, %59 : vector<16x1024xi1>, vector<16x1024xbf16>
    %c48 = arith.constant 48 : index
    %c0_32 = arith.constant 0 : index
    %61 = vector.load %arg14[%c48, %c0_32] : memref<144x1024xbf16, #tpu.memory_space<vmem>>, vector<16x1024xbf16>
    tpu.vector_store %arg14[%c48, %c0_32], %60 {strides = array<i32>} : memref<144x1024xbf16, #tpu.memory_space<vmem>>, vector<16x1024xbf16>,
    %c0_33 = arith.constant 0 : index
    %c128_34 = arith.constant 128 : index
    %62 = vector.load %arg12[%c0_33, %c128_34] : memref<16x1280xbf16, #tpu.memory_space<vmem>>, vector<16x1024xbf16>
    %c64 = arith.constant 64 : index
    %c0_35 = arith.constant 0 : index
    %63 = vector.load %arg14[%c64, %c0_35] : memref<144x1024xbf16, #tpu.memory_space<vmem>>, vector<16x1024xbf16>
    tpu.vector_store %arg14[%c64, %c0_35], %62 {strides = array<i32>} : memref<144x1024xbf16, #tpu.memory_space<vmem>>, vector<16x1024xbf16>,
    %c0_36 = arith.constant 0 : index
    %c129 = arith.constant 129 : index
    %64 = vector.load %arg12[%c0_36, %c129] : memref<16x1280xbf16, #tpu.memory_space<vmem>>, vector<16x1024xbf16>
    %c0_i32_37 = arith.constant 0 : i32
    %65 = arith.sitofp %c0_i32_37 : i32 to bf16
    %66 = vector.shape_cast %20 : vector<1x1024xi1> to vector<1x1024xi1>
    %67 = vector.broadcast %66 : vector<1x1024xi1> to vector<16x1024xi1>
    %68 = vector.broadcast %65 : bf16 to vector<16x1024xbf16>
    %69 = arith.select %67, %64, %68 : vector<16x1024xi1>, vector<16x1024xbf16>
    %c80 = arith.constant 80 : index
    %c0_38 = arith.constant 0 : index
    %70 = vector.load %arg14[%c80, %c0_38] : memref<144x1024xbf16, #tpu.memory_space<vmem>>, vector<16x1024xbf16>
    tpu.vector_store %arg14[%c80, %c0_38], %69 {strides = array<i32>} : memref<144x1024xbf16, #tpu.memory_space<vmem>>, vector<16x1024xbf16>,
    %c1 = arith.constant 1 : index
    %c0_39 = arith.constant 0 : index
    %c0_40 = arith.constant 0 : index
    %71 = vector.load %arg3[%c1, %c0_39, %c0_40] : memref<3x8x48xbf16, #tpu.memory_space<vmem>>, vector<1x8x48xbf16>
    %72 = vector.shape_cast %71 : vector<1x8x48xbf16> to vector<8x48xbf16>
    %c48_41 = arith.constant 48 : index
    %c0_42 = arith.constant 0 : index
    %73 = vector.load %arg14[%c48_41, %c0_42] : memref<144x1024xbf16, #tpu.memory_space<vmem>>, vector<48x1024xbf16>
    %cst_43 = arith.constant dense<0.000000e+00> : vector<8x1024xf32>
    %74 = tpu.matmul %72, %73, %cst_43 {dimension_numbers = #tpu.dot_dimension_numbers<[1], [0], [0], [1], [0, 0, 1, 1], [], []>} : vector<8x48xbf16>, vector<48x1024xbf16>, vector<8x1024xf32> -> vector<8x1024xf32>
    %75 = arith.addf %54, %74 : vector<8x1024xf32>
    %c0_44 = arith.constant 0 : index
    %c159 = arith.constant 159 : index
    %76 = vector.load %arg12[%c0_44, %c159] : memref<16x1280xbf16, #tpu.memory_space<vmem>>, vector<16x1024xbf16>
    %c0_i32_45 = arith.constant 0 : i32
    %77 = arith.sitofp %c0_i32_45 : i32 to bf16
    %78 = vector.shape_cast %18 : vector<1x1024xi1> to vector<1x1024xi1>
    %79 = vector.broadcast %78 : vector<1x1024xi1> to vector<16x1024xi1>
    %80 = vector.broadcast %77 : bf16 to vector<16x1024xbf16>
    %81 = arith.select %79, %76, %80 : vector<16x1024xi1>, vector<16x1024xbf16>
    %c96_46 = arith.constant 96 : index
    %c0_47 = arith.constant 0 : index
    %82 = vector.load %arg14[%c96_46, %c0_47] : memref<144x1024xbf16, #tpu.memory_space<vmem>>, vector<16x1024xbf16>
    tpu.vector_store %arg14[%c96_46, %c0_47], %81 {strides = array<i32>} : memref<144x1024xbf16, #tpu.memory_space<vmem>>, vector<16x1024xbf16>,
    %c0_48 = arith.constant 0 : index
    %c160 = arith.constant 160 : index
    %83 = vector.load %arg12[%c0_48, %c160] : memref<16x1280xbf16, #tpu.memory_space<vmem>>, vector<16x1024xbf16>
    %c112 = arith.constant 112 : index
    %c0_49 = arith.constant 0 : index
    %84 = vector.load %arg14[%c112, %c0_49] : memref<144x1024xbf16, #tpu.memory_space<vmem>>, vector<16x1024xbf16>
    tpu.vector_store %arg14[%c112, %c0_49], %83 {strides = array<i32>} : memref<144x1024xbf16, #tpu.memory_space<vmem>>, vector<16x1024xbf16>,
    %c0_50 = arith.constant 0 : index
    %c161 = arith.constant 161 : index
    %85 = vector.load %arg12[%c0_50, %c161] : memref<16x1280xbf16, #tpu.memory_space<vmem>>, vector<16x1024xbf16>
    %c0_i32_51 = arith.constant 0 : i32
    %86 = arith.sitofp %c0_i32_51 : i32 to bf16
    %87 = vector.shape_cast %20 : vector<1x1024xi1> to vector<1x1024xi1>
    %88 = vector.broadcast %87 : vector<1x1024xi1> to vector<16x1024xi1>
    %89 = vector.broadcast %86 : bf16 to vector<16x1024xbf16>
    %90 = arith.select %88, %85, %89 : vector<16x1024xi1>, vector<16x1024xbf16>
    %c128_52 = arith.constant 128 : index
    %c0_53 = arith.constant 0 : index
    %91 = vector.load %arg14[%c128_52, %c0_53] : memref<144x1024xbf16, #tpu.memory_space<vmem>>, vector<16x1024xbf16>
    tpu.vector_store %arg14[%c128_52, %c0_53], %90 {strides = array<i32>} : memref<144x1024xbf16, #tpu.memory_space<vmem>>, vector<16x1024xbf16>,
    %c2 = arith.constant 2 : index
    %c0_54 = arith.constant 0 : index
    %c0_55 = arith.constant 0 : index
    %92 = vector.load %arg3[%c2, %c0_54, %c0_55] : memref<3x8x48xbf16, #tpu.memory_space<vmem>>, vector<1x8x48xbf16>
    %93 = vector.shape_cast %92 : vector<1x8x48xbf16> to vector<8x48xbf16>
    %c96_56 = arith.constant 96 : index
    %c0_57 = arith.constant 0 : index
    %94 = vector.load %arg14[%c96_56, %c0_57] : memref<144x1024xbf16, #tpu.memory_space<vmem>>, vector<48x1024xbf16>
    %cst_58 = arith.constant dense<0.000000e+00> : vector<8x1024xf32>
    %95 = tpu.matmul %93, %94, %cst_58 {dimension_numbers = #tpu.dot_dimension_numbers<[1], [0], [0], [1], [0, 0, 1, 1], [], []>} : vector<8x48xbf16>, vector<48x1024xbf16>, vector<8x1024xf32> -> vector<8x1024xf32>
    %96 = arith.addf %75, %95 : vector<8x1024xf32>
    %c0_59 = arith.constant 0 : index
    %c0_60 = arith.constant 0 : index
    %97 = vector.load %arg4[%c0_59, %c0_60] : memref<8x1xf32, #tpu.memory_space<vmem>>, vector<8x1xf32>
    %98 = vector.broadcast %97 : vector<8x1xf32> to vector<8x1024xf32>
    %99 = arith.addf %96, %98 : vector<8x1024xf32>
    %100 = arith.truncf %99 : vector<8x1024xf32> to vector<8x1024xbf16>
    %c0_61 = arith.constant 0 : index
    %c0_62 = arith.constant 0 : index
    %c0_63 = arith.constant 0 : index
    %101 = vector.load %arg11[%c0_61, %c0_62, %c0_63] : memref<1x8x1024xbf16, #tpu.memory_space<vmem>>, vector<1x8x1024xbf16>
    %102 = vector.shape_cast %101 : vector<1x8x1024xbf16> to vector<8x1024xbf16>
    %103 = vector.shape_cast %100 : vector<8x1024xbf16> to vector<1x8x1024xbf16>
    tpu.vector_store %arg11[%c0_61, %c0_62, %c0_63], %103 {strides = array<i32>} : memref<1x8x1024xbf16, #tpu.memory_space<vmem>>, vector<1x8x1024xbf16>,
    %c0_64 = arith.constant 0 : index
    %c0_65 = arith.constant 0 : index
    %104 = vector.load %arg5[%c0_64, %c0_65] : memref<8x10xbf16, #tpu.memory_space<vmem>>, vector<8x10xbf16>
    %c0_66 = arith.constant 0 : index
    %c0_67 = arith.constant 0 : index
    %c0_68 = arith.constant 0 : index
    %105 = vector.load %arg2[%c0_66, %c0_67, %c0_68] : memref<1x10x1024xbf16, #tpu.memory_space<vmem>>, vector<1x10x1024xbf16>
    %106 = vector.shape_cast %105 : vector<1x10x1024xbf16> to vector<10x1024xbf16>
    %cst_69 = arith.constant dense<0.000000e+00> : vector<8x1024xf32>
    %107 = tpu.matmul %104, %106, %cst_69 {dimension_numbers = #tpu.dot_dimension_numbers<[1], [0], [0], [1], [0, 0, 1, 1], [], []>} : vector<8x10xbf16>, vector<10x1024xbf16>, vector<8x1024xf32> -> vector<8x1024xf32>
    %108 = arith.addf %99, %107 : vector<8x1024xf32>
    %c0_70 = arith.constant 0 : index
    %c0_71 = arith.constant 0 : index
    %109 = vector.load %arg6[%c0_70, %c0_71] : memref<8x1xf32, #tpu.memory_space<vmem>>, vector<8x1xf32>
    %110 = vector.broadcast %109 : vector<8x1xf32> to vector<8x1024xf32>
    %111 = arith.addf %108, %110 : vector<8x1024xf32>
    %112 = arith.truncf %111 : vector<8x1024xf32> to vector<8x1024xbf16>
    %cst_72 = arith.constant 0.000000e+00 : bf16
    %113 = vector.broadcast %cst_72 : bf16 to vector<8x1024xbf16>
    %114 = arith.cmpf oge, %112, %113 : vector<8x1024xbf16>
    %cst_73 = arith.constant 2.001950e-01 : bf16
    %115 = vector.broadcast %cst_73 : bf16 to vector<8x1024xbf16>
    %116 = arith.mulf %115, %112 : vector<8x1024xbf16>
    %117 = arith.select %114, %112, %116 : vector<8x1024xi1>, vector<8x1024xbf16>
    %cst_74 = arith.constant 0.000000e+00 : bf16
    %118 = vector.broadcast %cst_74 : bf16 to vector<16x128xbf16>
    %c0_75 = arith.constant 0 : index
    %c0_76 = arith.constant 0 : index
    %119 = vector.load %arg13[%c0_75, %c0_76] : memref<16x1280xbf16, #tpu.memory_space<vmem>>, vector<16x128xbf16>
    tpu.vector_store %arg13[%c0_75, %c0_76], %118 {strides = array<i32>} : memref<16x1280xbf16, #tpu.memory_space<vmem>>, vector<16x128xbf16>,
    %cst_77 = arith.constant 0.000000e+00 : bf16
    %120 = vector.broadcast %cst_77 : bf16 to vector<16x128xbf16>
    %c0_78 = arith.constant 0 : index
    %c1152_79 = arith.constant 1152 : index
    %121 = vector.load %arg13[%c0_78, %c1152_79] : memref<16x1280xbf16, #tpu.memory_space<vmem>>, vector<16x128xbf16>
    tpu.vector_store %arg13[%c0_78, %c1152_79], %120 {strides = array<i32>} : memref<16x1280xbf16, #tpu.memory_space<vmem>>, vector<16x128xbf16>,
    %c0_80 = arith.constant 0 : index
    %c128_81 = arith.constant 128 : index
    %122 = vector.load %arg13[%c0_80, %c128_81] : memref<16x1280xbf16, #tpu.memory_space<vmem>>, vector<8x1024xbf16>
    tpu.vector_store %arg13[%c0_80, %c128_81], %117 {strides = array<i32>} : memref<16x1280xbf16, #tpu.memory_space<vmem>>, vector<8x1024xbf16>,
    %cst_82 = arith.constant 0.000000e+00 : bf16
    %123 = vector.broadcast %cst_82 : bf16 to vector<8x1024xbf16>
    %c8 = arith.constant 8 : index
    %c128_83 = arith.constant 128 : index
    %124 = vector.load %arg13[%c8, %c128_83] : memref<16x1280xbf16, #tpu.memory_space<vmem>>, vector<8x1024xbf16>
    tpu.vector_store %arg13[%c8, %c128_83], %123 {strides = array<i32>} : memref<16x1280xbf16, #tpu.memory_space<vmem>>, vector<8x1024xbf16>,
    %c0_84 = arith.constant 0 : index
    %c95_85 = arith.constant 95 : index
    %125 = vector.load %arg13[%c0_84, %c95_85] : memref<16x1280xbf16, #tpu.memory_space<vmem>>, vector<16x1024xbf16>
    %c0_i32_86 = arith.constant 0 : i32
    %126 = arith.sitofp %c0_i32_86 : i32 to bf16
    %127 = vector.shape_cast %18 : vector<1x1024xi1> to vector<1x1024xi1>
    %128 = vector.broadcast %127 : vector<1x1024xi1> to vector<16x1024xi1>
    %129 = vector.broadcast %126 : bf16 to vector<16x1024xbf16>
    %130 = arith.select %128, %125, %129 : vector<16x1024xi1>, vector<16x1024xbf16>
    %c0_87 = arith.constant 0 : index
    %c0_88 = arith.constant 0 : index
    %131 = vector.load %arg14[%c0_87, %c0_88] : memref<144x1024xbf16, #tpu.memory_space<vmem>>, vector<16x1024xbf16>
    tpu.vector_store %arg14[%c0_87, %c0_88], %130 {strides = array<i32>} : memref<144x1024xbf16, #tpu.memory_space<vmem>>, vector<16x1024xbf16>,
    %c0_89 = arith.constant 0 : index
    %c96_90 = arith.constant 96 : index
    %132 = vector.load %arg13[%c0_89, %c96_90] : memref<16x1280xbf16, #tpu.memory_space<vmem>>, vector<16x1024xbf16>
    %c16_91 = arith.constant 16 : index
    %c0_92 = arith.constant 0 : index
    %133 = vector.load %arg14[%c16_91, %c0_92] : memref<144x1024xbf16, #tpu.memory_space<vmem>>, vector<16x1024xbf16>
    tpu.vector_store %arg14[%c16_91, %c0_92], %132 {strides = array<i32>} : memref<144x1024xbf16, #tpu.memory_space<vmem>>, vector<16x1024xbf16>,
    %c0_93 = arith.constant 0 : index
    %c97_94 = arith.constant 97 : index
    %134 = vector.load %arg13[%c0_93, %c97_94] : memref<16x1280xbf16, #tpu.memory_space<vmem>>, vector<16x1024xbf16>
    %c0_i32_95 = arith.constant 0 : i32
    %135 = arith.sitofp %c0_i32_95 : i32 to bf16
    %136 = vector.shape_cast %20 : vector<1x1024xi1> to vector<1x1024xi1>
    %137 = vector.broadcast %136 : vector<1x1024xi1> to vector<16x1024xi1>
    %138 = vector.broadcast %135 : bf16 to vector<16x1024xbf16>
    %139 = arith.select %137, %134, %138 : vector<16x1024xi1>, vector<16x1024xbf16>
    %c32_96 = arith.constant 32 : index
    %c0_97 = arith.constant 0 : index
    %140 = vector.load %arg14[%c32_96, %c0_97] : memref<144x1024xbf16, #tpu.memory_space<vmem>>, vector<16x1024xbf16>
    tpu.vector_store %arg14[%c32_96, %c0_97], %139 {strides = array<i32>} : memref<144x1024xbf16, #tpu.memory_space<vmem>>, vector<16x1024xbf16>,
    %c0_98 = arith.constant 0 : index
    %c0_99 = arith.constant 0 : index
    %c0_100 = arith.constant 0 : index
    %141 = vector.load %arg8[%c0_98, %c0_99, %c0_100] : memref<3x8x48xbf16, #tpu.memory_space<vmem>>, vector<1x8x48xbf16>
    %142 = vector.shape_cast %141 : vector<1x8x48xbf16> to vector<8x48xbf16>
    %c0_101 = arith.constant 0 : index
    %c0_102 = arith.constant 0 : index
    %143 = vector.load %arg14[%c0_101, %c0_102] : memref<144x1024xbf16, #tpu.memory_space<vmem>>, vector<48x1024xbf16>
    %cst_103 = arith.constant dense<0.000000e+00> : vector<8x1024xf32>
    %144 = tpu.matmul %142, %143, %cst_103 {dimension_numbers = #tpu.dot_dimension_numbers<[1], [0], [0], [1], [0, 0, 1, 1], [], []>} : vector<8x48xbf16>, vector<48x1024xbf16>, vector<8x1024xf32> -> vector<8x1024xf32>
    %c0_104 = arith.constant 0 : index
    %c127_105 = arith.constant 127 : index
    %145 = vector.load %arg13[%c0_104, %c127_105] : memref<16x1280xbf16, #tpu.memory_space<vmem>>, vector<16x1024xbf16>
    %c0_i32_106 = arith.constant 0 : i32
    %146 = arith.sitofp %c0_i32_106 : i32 to bf16
    %147 = vector.shape_cast %18 : vector<1x1024xi1> to vector<1x1024xi1>
    %148 = vector.broadcast %147 : vector<1x1024xi1> to vector<16x1024xi1>
    %149 = vector.broadcast %146 : bf16 to vector<16x1024xbf16>
    %150 = arith.select %148, %145, %149 : vector<16x1024xi1>, vector<16x1024xbf16>
    %c48_107 = arith.constant 48 : index
    %c0_108 = arith.constant 0 : index
    %151 = vector.load %arg14[%c48_107, %c0_108] : memref<144x1024xbf16, #tpu.memory_space<vmem>>, vector<16x1024xbf16>
    tpu.vector_store %arg14[%c48_107, %c0_108], %150 {strides = array<i32>} : memref<144x1024xbf16, #tpu.memory_space<vmem>>, vector<16x1024xbf16>,
    %c0_109 = arith.constant 0 : index
    %c128_110 = arith.constant 128 : index
    %152 = vector.load %arg13[%c0_109, %c128_110] : memref<16x1280xbf16, #tpu.memory_space<vmem>>, vector<16x1024xbf16>
    %c64_111 = arith.constant 64 : index
    %c0_112 = arith.constant 0 : index
    %153 = vector.load %arg14[%c64_111, %c0_112] : memref<144x1024xbf16, #tpu.memory_space<vmem>>, vector<16x1024xbf16>
    tpu.vector_store %arg14[%c64_111, %c0_112], %152 {strides = array<i32>} : memref<144x1024xbf16, #tpu.memory_space<vmem>>, vector<16x1024xbf16>,
    %c0_113 = arith.constant 0 : index
    %c129_114 = arith.constant 129 : index
    %154 = vector.load %arg13[%c0_113, %c129_114] : memref<16x1280xbf16, #tpu.memory_space<vmem>>, vector<16x1024xbf16>
    %c0_i32_115 = arith.constant 0 : i32
    %155 = arith.sitofp %c0_i32_115 : i32 to bf16
    %156 = vector.shape_cast %20 : vector<1x1024xi1> to vector<1x1024xi1>
    %157 = vector.broadcast %156 : vector<1x1024xi1> to vector<16x1024xi1>
    %158 = vector.broadcast %155 : bf16 to vector<16x1024xbf16>
    %159 = arith.select %157, %154, %158 : vector<16x1024xi1>, vector<16x1024xbf16>
    %c80_116 = arith.constant 80 : index
    %c0_117 = arith.constant 0 : index
    %160 = vector.load %arg14[%c80_116, %c0_117] : memref<144x1024xbf16, #tpu.memory_space<vmem>>, vector<16x1024xbf16>
    tpu.vector_store %arg14[%c80_116, %c0_117], %159 {strides = array<i32>} : memref<144x1024xbf16, #tpu.memory_space<vmem>>, vector<16x1024xbf16>,
    %c1_118 = arith.constant 1 : index
    %c0_119 = arith.constant 0 : index
    %c0_120 = arith.constant 0 : index
    %161 = vector.load %arg8[%c1_118, %c0_119, %c0_120] : memref<3x8x48xbf16, #tpu.memory_space<vmem>>, vector<1x8x48xbf16>
    %162 = vector.shape_cast %161 : vector<1x8x48xbf16> to vector<8x48xbf16>
    %c48_121 = arith.constant 48 : index
    %c0_122 = arith.constant 0 : index
    %163 = vector.load %arg14[%c48_121, %c0_122] : memref<144x1024xbf16, #tpu.memory_space<vmem>>, vector<48x1024xbf16>
    %cst_123 = arith.constant dense<0.000000e+00> : vector<8x1024xf32>
    %164 = tpu.matmul %162, %163, %cst_123 {dimension_numbers = #tpu.dot_dimension_numbers<[1], [0], [0], [1], [0, 0, 1, 1], [], []>} : vector<8x48xbf16>, vector<48x1024xbf16>, vector<8x1024xf32> -> vector<8x1024xf32>
    %165 = arith.addf %144, %164 : vector<8x1024xf32>
    %c0_124 = arith.constant 0 : index
    %c159_125 = arith.constant 159 : index
    %166 = vector.load %arg13[%c0_124, %c159_125] : memref<16x1280xbf16, #tpu.memory_space<vmem>>, vector<16x1024xbf16>
    %c0_i32_126 = arith.constant 0 : i32
    %167 = arith.sitofp %c0_i32_126 : i32 to bf16
    %168 = vector.shape_cast %18 : vector<1x1024xi1> to vector<1x1024xi1>
    %169 = vector.broadcast %168 : vector<1x1024xi1> to vector<16x1024xi1>
    %170 = vector.broadcast %167 : bf16 to vector<16x1024xbf16>
    %171 = arith.select %169, %166, %170 : vector<16x1024xi1>, vector<16x1024xbf16>
    %c96_127 = arith.constant 96 : index
    %c0_128 = arith.constant 0 : index
    %172 = vector.load %arg14[%c96_127, %c0_128] : memref<144x1024xbf16, #tpu.memory_space<vmem>>, vector<16x1024xbf16>
    tpu.vector_store %arg14[%c96_127, %c0_128], %171 {strides = array<i32>} : memref<144x1024xbf16, #tpu.memory_space<vmem>>, vector<16x1024xbf16>,
    %c0_129 = arith.constant 0 : index
    %c160_130 = arith.constant 160 : index
    %173 = vector.load %arg13[%c0_129, %c160_130] : memref<16x1280xbf16, #tpu.memory_space<vmem>>, vector<16x1024xbf16>
    %c112_131 = arith.constant 112 : index
    %c0_132 = arith.constant 0 : index
    %174 = vector.load %arg14[%c112_131, %c0_132] : memref<144x1024xbf16, #tpu.memory_space<vmem>>, vector<16x1024xbf16>
    tpu.vector_store %arg14[%c112_131, %c0_132], %173 {strides = array<i32>} : memref<144x1024xbf16, #tpu.memory_space<vmem>>, vector<16x1024xbf16>,
    %c0_133 = arith.constant 0 : index
    %c161_134 = arith.constant 161 : index
    %175 = vector.load %arg13[%c0_133, %c161_134] : memref<16x1280xbf16, #tpu.memory_space<vmem>>, vector<16x1024xbf16>
    %c0_i32_135 = arith.constant 0 : i32
    %176 = arith.sitofp %c0_i32_135 : i32 to bf16
    %177 = vector.shape_cast %20 : vector<1x1024xi1> to vector<1x1024xi1>
    %178 = vector.broadcast %177 : vector<1x1024xi1> to vector<16x1024xi1>
    %179 = vector.broadcast %176 : bf16 to vector<16x1024xbf16>
    %180 = arith.select %178, %175, %179 : vector<16x1024xi1>, vector<16x1024xbf16>
    %c128_136 = arith.constant 128 : index
    %c0_137 = arith.constant 0 : index
    %181 = vector.load %arg14[%c128_136, %c0_137] : memref<144x1024xbf16, #tpu.memory_space<vmem>>, vector<16x1024xbf16>
    tpu.vector_store %arg14[%c128_136, %c0_137], %180 {strides = array<i32>} : memref<144x1024xbf16, #tpu.memory_space<vmem>>, vector<16x1024xbf16>,
    %c2_138 = arith.constant 2 : index
    %c0_139 = arith.constant 0 : index
    %c0_140 = arith.constant 0 : index
    %182 = vector.load %arg8[%c2_138, %c0_139, %c0_140] : memref<3x8x48xbf16, #tpu.memory_space<vmem>>, vector<1x8x48xbf16>
    %183 = vector.shape_cast %182 : vector<1x8x48xbf16> to vector<8x48xbf16>
    %c96_141 = arith.constant 96 : index
    %c0_142 = arith.constant 0 : index
    %184 = vector.load %arg14[%c96_141, %c0_142] : memref<144x1024xbf16, #tpu.memory_space<vmem>>, vector<48x1024xbf16>
    %cst_143 = arith.constant dense<0.000000e+00> : vector<8x1024xf32>
    %185 = tpu.matmul %183, %184, %cst_143 {dimension_numbers = #tpu.dot_dimension_numbers<[1], [0], [0], [1], [0, 0, 1, 1], [], []>} : vector<8x48xbf16>, vector<48x1024xbf16>, vector<8x1024xf32> -> vector<8x1024xf32>
    %186 = arith.addf %165, %185 : vector<8x1024xf32>
    %c0_144 = arith.constant 0 : index
    %c0_145 = arith.constant 0 : index
    %187 = vector.load %arg9[%c0_144, %c0_145] : memref<8x1xf32, #tpu.memory_space<vmem>>, vector<8x1xf32>
    %188 = vector.broadcast %187 : vector<8x1xf32> to vector<8x1024xf32>
    %189 = arith.addf %186, %188 : vector<8x1024xf32>
    %c0_146 = arith.constant 0 : index
    %c0_147 = arith.constant 0 : index
    %190 = vector.load %arg7[%c0_146, %c0_147] : memref<8x4xbf16, #tpu.memory_space<vmem>>, vector<8x4xbf16>
    %cst_148 = arith.constant dense<0.000000e+00> : vector<8x1024xf32>
    %191 = tpu.matmul %190, %27, %cst_148 {dimension_numbers = #tpu.dot_dimension_numbers<[1], [0], [0], [1], [0, 0, 1, 1], [], []>} : vector<8x4xbf16>, vector<4x1024xbf16>, vector<8x1024xf32> -> vector<8x1024xf32>
    %192 = arith.addf %189, %191 : vector<8x1024xf32>
    %193 = arith.truncf %192 : vector<8x1024xf32> to vector<8x1024xbf16>
    %c0_149 = arith.constant 0 : index
    %c0_150 = arith.constant 0 : index
    %c0_151 = arith.constant 0 : index
    %194 = vector.load %arg10[%c0_149, %c0_150, %c0_151] : memref<1x8x1024xbf16, #tpu.memory_space<vmem>>, vector<1x8x1024xbf16>
    %195 = vector.shape_cast %194 : vector<1x8x1024xbf16> to vector<8x1024xbf16>
    %196 = vector.shape_cast %193 : vector<8x1024xbf16> to vector<1x8x1024xbf16>
    tpu.vector_store %arg10[%c0_149, %c0_150, %c0_151], %196 {strides = array<i32>} : memref<1x8x1024xbf16, #tpu.memory_space<vmem>>, vector<1x8x1024xbf16>,
    return
  }
  func.func @transform_0(%arg0: i32) -> (i32, i32, i32) {
    %c0_i32 = arith.constant 0 : i32
    %c0_i32_0 = arith.constant 0 : i32
    %c0_i32_1 = arith.constant 0 : i32
    return %arg0, %c0_i32, %c0_i32_0 : i32, i32, i32
  }
  func.func @transform_1(%arg0: i32) -> (i32, i32, i32) {
    %c0_i32 = arith.constant 0 : i32
    %c0_i32_0 = arith.constant 0 : i32
    %c0_i32_1 = arith.constant 0 : i32
    return %arg0, %c0_i32, %c0_i32_0 : i32, i32, i32
  }
  func.func @transform_2(%arg0: i32) -> (i32, i32, i32) {
    %c0_i32 = arith.constant 0 : i32
    %c0_i32_0 = arith.constant 0 : i32
    %c0_i32_1 = arith.constant 0 : i32
    %c0_i32_2 = arith.constant 0 : i32
    return %c0_i32, %c0_i32_0, %c0_i32_1 : i32, i32, i32
  }
  func.func @transform_3(%arg0: i32) -> (i32, i32) {
    %c0_i32 = arith.constant 0 : i32
    %c0_i32_0 = arith.constant 0 : i32
    %c0_i32_1 = arith.constant 0 : i32
    return %c0_i32, %c0_i32_0 : i32, i32
  }
  func.func @transform_4(%arg0: i32) -> (i32, i32) {
    %c0_i32 = arith.constant 0 : i32
    %c0_i32_0 = arith.constant 0 : i32
    %c0_i32_1 = arith.constant 0 : i32
    return %c0_i32, %c0_i32_0 : i32, i32
  }
  func.func @transform_5(%arg0: i32) -> (i32, i32) {
    %c0_i32 = arith.constant 0 : i32
    %c0_i32_0 = arith.constant 0 : i32
    %c0_i32_1 = arith.constant 0 : i32
    return %c0_i32, %c0_i32_0 : i32, i32
  }
  func.func @transform_6(%arg0: i32) -> (i32, i32) {
    %c0_i32 = arith.constant 0 : i32
    %c0_i32_0 = arith.constant 0 : i32
    %c0_i32_1 = arith.constant 0 : i32
    return %c0_i32, %c0_i32_0 : i32, i32
  }
  func.func @transform_7(%arg0: i32) -> (i32, i32, i32) {
    %c0_i32 = arith.constant 0 : i32
    %c0_i32_0 = arith.constant 0 : i32
    %c0_i32_1 = arith.constant 0 : i32
    %c0_i32_2 = arith.constant 0 : i32
    return %c0_i32, %c0_i32_0, %c0_i32_1 : i32, i32, i32
  }
  func.func @transform_8(%arg0: i32) -> (i32, i32) {
    %c0_i32 = arith.constant 0 : i32
    %c0_i32_0 = arith.constant 0 : i32
    %c0_i32_1 = arith.constant 0 : i32
    return %c0_i32, %c0_i32_0 : i32, i32
  }
  func.func @transform_9(%arg0: i32) -> (i32, i32, i32) {
    %c0_i32 = arith.constant 0 : i32
    %c0_i32_0 = arith.constant 0 : i32
    %c0_i32_1 = arith.constant 0 : i32
    return %arg0, %c0_i32, %c0_i32_0 : i32, i32, i32
  }
  func.func @transform_10(%arg0: i32) -> (i32, i32, i32) {
    %c0_i32 = arith.constant 0 : i32
    %c0_i32_0 = arith.constant 0 : i32
    %c0_i32_1 = arith.constant 0 : i32
    return %arg0, %c0_i32, %c0_i32_0 : i32, i32, i32
  }
}

</mosaic_0001>

<bundles_post_ra>
// kernel: tpu_custom_call.1
= control target key start
LH: loop header
LB: loop body
LE: loop exit
PB: predicated region body
PF: predicated region fallthrough
CT: control target
= control target key end

     0   :  { %s7797_s0 = inlined_call_operand.vmem [shape: bf16[2,4,1024], index: 0, kind: input, shape index: {}]   ;;  %s7798_s1 = inlined_call_operand.vmem [shape: bf16[2,10,1024], index: 1, kind: input, shape index: {}]   ;;  %s7799_s2 = inlined_call_operand.vmem [shape: bf16[3,8,48], index: 2, kind: input, shape index: {}]   ;;  %s7800_s3 = inlined_call_operand.vmem [shape: f32[8,1], index: 3, kind: input, shape index: {}]   ;;  %s7801_s4 = inlined_call_operand.vmem [shape: bf16[8,10], index: 4, kind: input, shape index: {}]   ;;  %s7802_s5 = inlined_call_operand.vmem [shape: f32[8,1], index: 5, kind: input, shape index: {}]   ;;  %s7803_s6 = inlined_call_operand.vmem [shape: bf16[8,4], index: 6, kind: input, shape index: {}]   ;;  %s7804_s7 = inlined_call_operand.vmem [shape: bf16[3,8,48], index: 7, kind: input, shape index: {}]   ;;  %s7805_s8 = inlined_call_operand.vmem [shape: f32[8,1], index: 8, kind: input, shape index: {}]   ;;  %s7806_s9 = inlined_call_operand.hbm [shape: bf16[2,8,1024], index: 9, kind: output, shape index: {0}]   ;;  %s7807_s10 = inlined_call_operand.hbm [shape: bf16[2,8,1024], index: 10, kind: output, shape index: {1}]  }
   0x1   :  { %7883 = sst [smem:[#allocation38_spill]] %s7797_s0 }
   0x2   :  { %7884 = sst [smem:[#allocation39_spill]] %s7798_s1 }
   0x3   :  { %7885 = sst [smem:[#allocation40_spill]] %s7799_s2 }
   0x4   :  { %16 = vsyncpa [#allocation6], 0 }
   0x5   :  { %18 = vsyncpa [#allocation6 + $0x1], 0 }
   0x6   :  { %19 = vsyncpa [#allocation8], 0 }
   0x7   :  { %21 = vsyncpa [#allocation8 + $0x1], 0  ;;  %s5553_s13 = smov 0   ;;  %s5555_s14 = smov 0  }
   0x8   :  { %s5557_s15 = smov 0   ;;  %s5559_s16 = smov 0  }
   0x9 LB: > { %s5574_s17 = sadd.s32 4294967295, %s5484_s16   ;;  %s4899_s18 = sadd.s32 4294967294, %s5484_s16   ;;  %s5484_s16 = sphi %s5559_s16, %s8271_s16   ;;  %s5480_s15 = sphi %s5557_s15, %s8270_s15   ;;  %s5476_s14 = sphi %s5555_s14, %s8269_s14   ;;  %s5472_s13 = sphi %s5553_s13, %s8268_s13  }
   0xa   : > { %s5578_s19 = sadd.s32 1, %s5484_s16   ;;  %s233_s20 = sadd.s32 1, %s5480_s15 }
   0xb   : > { %s230_s21 = ssub.s32 %s5484_s16, %s5578_s19  ;;  %p243_p0 = scmp.ne.s32.totalorder %s5480_s15, %s5476_s14 }
   0xc   : > { %p231_p1 = scmp.eq.s32.totalorder %s230_s21, 0  ;;  %p244_p2 = scmp.eq.s32.totalorder %s5574_s17, 1 }
   0xd   : > { %p249_p3 = scmp.ne.s32.totalorder %s5476_s14, %s5472_s13  ;;  %p250_p4 = scmp.eq.s32.totalorder %s4899_s18, 1 }
   0xe   : > { %s5589_s22 = scalar_select %p231_p1, %s5480_s15, %s233_s20  }
   0xf   : > { %p5591_p5 = por %p244_p2, %p243_p0  ;;  %p5595_p6 = por %p250_p4, %p249_p3 }
  0x10   : > { %p4902_p7 = scmp.ge.s32.totalorder %s5484_s16, 1  ;;  %p331_p8 = scmp.lt.s32.totalorder %s5484_s16, 3 }
  0x12   : > { %p332_p9 = pnand %p4902_p7, %p331_p8 }
  0x14   : > { %335 = sbr.rel (%p332_p9) target bundleno = 1091 (0x443), region = 56 }
  0x19   : > { %v7812_v0 = vlaneseq  ;;  %v7829_v1 = vmov 0   ;;  %p379_p10 = scmp.lt.s32.totalorder %s5574_s17, 1  ;;  %s7896_s0 = sld [smem:[#allocation38_spill]]  ;;  %v7925_v21 = vmov 0 }
  0x1a   : > { %522 = vst [vmem:[#allocation2] sm:$0xf] %v7829_v1  ;;  %523 = vst [vmem:[#allocation2 + $0x28] sm:$0xf] %v7829_v1  ;;  %5295 = vset.pattern.permute.xlu0 %v7829_v1  ;;  %5296 = vset.pattern.permute.xlu1 %v7829_v1  ;;  %s5487_s30 = smov 1   ;;  %s5488_s11 = smov 127  }
  0x1b   : > { %524 = vst [vmem:[#allocation2 + $0x24] sm:$0xf] %v7829_v1  ;;  %525 = vst [vmem:[#allocation2 + $0x4c] sm:$0xf] %v7829_v1  ;;  %v394_v2 = vand.u32 127, %v7812_v0  ;;  %1399 = vmatprep.mubr.bf16.mxu0 %v7829_v1  ;;  %1440 = vmatprep.mubr.bf16.mxu1 %v7829_v1  ;;  %s5628_s25 = scalar_select %p379_p10, %s5574_s17, 1 }
  0x1c   : > { %566 = vst [vmem:[#allocation2 + $0x4] sm:$0xcc] %v7829_v1  ;;  %567 = vst [vmem:[#allocation2 + $0xc] sm:$0xcc] %v7829_v1  ;;  %s7873_s12 = smov 97   ;;  %s5490_s18 = smov 95  }
  0x1d   : > { %568 = vst [vmem:[#allocation2 + $0x14] sm:$0xcc] %v7829_v1  ;;  %569 = vst [vmem:[#allocation2 + $0x1c] sm:$0xcc] %v7829_v1  ;;  %v395_v3 = vadd.s32 128, %v394_v2  ;;  %v406_v4 = vand.u32 31, %v394_v2 }
  0x1e   : > { %570 = vst [vmem:[#allocation2 + $0x2c] sm:$0xff] %v7829_v1  ;;  %571 = vst [vmem:[#allocation2 + $0x34] sm:$0xff] %v7829_v1  ;;  %v396_v5 = vadd.s32 256, %v394_v2  ;;  %v397_v6 = vadd.s32 384, %v394_v2  ;;  %v398_v7 = vadd.s32 512, %v394_v2  ;;  %v399_v8 = vadd.s32 640, %v394_v2 }
  0x1f   : > { %572 = vst [vmem:[#allocation2 + $0x3c] sm:$0xff] %v7829_v1  ;;  %573 = vst [vmem:[#allocation2 + $0x44] sm:$0xff] %v7829_v1  ;;  %v400_v9 = vadd.s32 768, %v394_v2  ;;  %v401_v10 = vadd.s32 896, %v394_v2  ;;  %v413_v11 = vand.u32 31, %v395_v3  ;;  %vm5630_vm0 = vcmp.lt.s32.totalorder %v406_v4, 31 }
  0x20   : > { %2792 = vst [vmem:[#allocation3] sm:$0xf] %v7829_v1  ;;  %2793 = vst [vmem:[#allocation3 + $0x28] sm:$0xf] %v7829_v1  ;;  %vm5634_vm1 = vcmp.ge.s32.totalorder %v406_v4, 1  ;;  %v420_v14 = vand.u32 31, %v396_v5 }
  0x21   : > { %2794 = vst [vmem:[#allocation3 + $0x24] sm:$0xf] %v7829_v1  ;;  %2795 = vst [vmem:[#allocation3 + $0x4c] sm:$0xf] %v7829_v1  ;;  %v427_v15 = vand.u32 31, %v397_v6  ;;  %v434_v16 = vand.u32 31, %v398_v7 }
  0x22   : > { %2824 = vst [vmem:[#allocation3 + $0x2c] sm:$0xff] %v7829_v1  ;;  %2825 = vst [vmem:[#allocation3 + $0x34] sm:$0xff] %v7829_v1  ;;  %v441_v17 = vand.u32 31, %v399_v8  ;;  %v448_v18 = vand.u32 31, %v400_v9  ;;  %s5129_s26 = sshll.u32 %s5628_s25, 4  ;;  %vm507_vm2 = vcmp.lt.s32.totalorder %v413_v11, 31 }
  0x23   : > { %2826 = vst [vmem:[#allocation3 + $0x3c] sm:$0xff] %v7829_v1  ;;  %2827 = vst [vmem:[#allocation3 + $0x44] sm:$0xff] %v7829_v1  ;;  %vm5639_vm3 = vcmp.ge.s32.totalorder %v413_v11, 1  ;;  %vm5643_vm4 = vcmp.lt.s32.totalorder %v420_v14, 31  ;;  %s383_s29 = scalar_lea.vmem %s7896_s0, %s5129_s26  ;;  %vm5652_vm6 = vcmp.lt.s32.totalorder %v427_v15, 31  ;;  %vm5656_vm7 = vcmp.ge.s32.totalorder %v420_v14, 1 }
  0x24   : > { %vm826_vm5 = vmpackc.low %vm507_vm2, %vm5630_vm0  ;;  %vm5660_vm8 = vcmp.ge.s32.totalorder %v427_v15, 1  ;;  %v514_v24 = vld [vmem:[%s383_s29] sm:$0xff]  ;;  %vm5669_vm10 = vcmp.lt.s32.totalorder %v434_v16, 31  ;;  %vm5673_vm11 = vcmp.lt.s32.totalorder %v441_v17, 31  ;;  %v455_v28 = vand.u32 31, %v401_v10  ;;  %v515_v29 = vld [vmem:[%s383_s29 + $0x8] sm:$0xff] }
  0x25   : > { %v830_v25 = vsel %vm826_vm5, 65537, %v7829_v1  ;;  %vm600_vm9 = vmpackc.low %vm5639_vm3, %vm5634_vm1  ;;  %vm5683_vm13 = vcmp.lt.s32.totalorder %v448_v18, 31  ;;  %vm516_vm14 = vcmp.ge.bf16.partialorder %v514_v24, 0  ;;  %v518_v34 = vmul.bf16 1045249613, %v514_v24  ;;  %s5491_s20 = smov 33  }
  0x26   : > { %1111 = vrot.lane.b32.xlu0 %v830_v25, %s5487_s30  ;;  %v604_v30 = vsel %vm600_vm9, 65537, %v7829_v1  ;;  %vm827_vm12 = vmpackc.low %vm5652_vm6, %vm5643_vm4  ;;  %vm5693_vm0 = vcmp.lt.s32.totalorder %v455_v28, 31  ;;  %vm517_vm2 = vcmp.ge.bf16.partialorder %v515_v29, 0  ;;  %v519_v36 = vmul.bf16 1045249613, %v515_v29  ;;  %s5492_s21 = smov 31  }
  0x27   : > { %977 = vrot.lane.b32.xlu1 %v604_v30, %s5488_s11  ;;  %v831_v32 = vsel %vm827_vm12, 65537, %v7829_v1  ;;  %vm601_vm15 = vmpackc.low %vm5660_vm8, %vm5656_vm7  ;;  %vm5706_vm4 = vcmp.ge.s32.totalorder %v434_v16, 1  ;;  %vm5710_vm5 = vcmp.ge.s32.totalorder %v441_v17, 1  ;;  %v5714_v39 = vsel %vm516_vm14, %v514_v24, %v518_v34  ;;  %v5774_v50 = vld [vmem:[#allocation2 + $0x28] sm:$0xff]  ;;  %v5776_v51 = vld [vmem:[#allocation2 + $0x30] sm:$0xff]  ;;  %s5493_s26 = smov 32  }
  0x28   : > { %v605_v35 = vsel %vm601_vm15, 65537, %v7829_v1  ;;  %vm828_vm1 = vmpackc.low %vm5673_vm11, %vm5669_vm10  ;;  %7915 = vst [vmem:[#allocation11_spill] sm:$0xff] %v5714_v39  ;;  %vm5717_vm6 = vcmp.ge.s32.totalorder %v448_v18, 1  ;;  %vm5721_vm7 = vcmp.ge.s32.totalorder %v455_v28, 1  ;;  %v5728_v42 = vcombine.high %v5714_v39, %v5714_v39  ;;  %v5780_v53 = vld [vmem:[#allocation2 + $0x38] sm:$0xff]  ;;  %v5782_v54 = vld [vmem:[#allocation2 + $0x40] sm:$0xff] }
  0x29   : > { %vm829_vm3 = vmpackc.low %vm5693_vm0, %vm5683_vm13  ;;  %4909 = vst.sshfl [vmem:[#allocation2 + $0x4] sm:$0xf pattern:$0x76325410] %v5714_v39  ;;  %v5730_v43 = vsel %vm517_vm2, %v515_v29, %v519_v36  ;;  %v832_v44 = vsel %vm828_vm1, 65537, %v7829_v1  ;;  %v5195_v55 = vpack.i.bf16 %v5776_v51, %v5774_v50  ;;  %v5200_v56 = vpack.i.bf16 %v5782_v54, %v5780_v53  ;;  %s5494_s27 = smov 96  }
  0x2a   : > { %1113 = vrot.lane.b32.xlu0 %v831_v32, %s5487_s30  ;;  %7920 = vst [vmem:[#allocation12_spill] sm:$0xff] %v5728_v42  ;;  %7921 = vst [vmem:[#allocation13_spill] sm:$0xff] %v5730_v43  ;;  %v5737_v45 = vcombine.high %v5730_v43, %v5730_v43  ;;  %v833_v46 = vsel %vm829_vm3, 65537, %v7829_v1  ;;  %v726_v59 = vld [vmem:[#allocation2 + $0x48] sm:$0xf]  ;;  %vm7828_vm11 = vcmask 1043456  }
  0x2b   : > { %979 = vrot.lane.b32.xlu1 %v605_v35, %s5488_s11  ;;  %4911 = vst.sshfl [vmem:[#allocation2 + $0x14] sm:$0xf pattern:$0x76325410] %v5730_v43  ;;  %vm602_vm8 = vmpackc.low %vm5710_vm5, %vm5706_vm4  ;;  %v1105_v9 = vld [vmem:[#allocation2 + $0x24] sm:$0xf] }
  0x2c   : > { %7922 = vst [vmem:[#allocation14_spill] sm:$0xff] %v5737_v45  ;;  %4910 = vst.sshfl [vmem:[#allocation2 + $0xc] sm:$0xf pattern:$0x76325410] %v5728_v42  ;;  %v606_v47 = vsel %vm602_vm8, 65537, %v7829_v1 }
  0x2d   : > { %vm603_vm9 = vmpackc.low %vm5721_vm7, %vm5717_vm6  ;;  %4912 = vst.sshfl [vmem:[#allocation2 + $0x1c] sm:$0xf pattern:$0x76325410] %v5737_v45  ;;  %v1110_v10 = vld [vmem:[#allocation2 + $0x4c] sm:$0xf] }
  0x2e   : > { %1115 = vrot.lane.b32.xlu0 %v832_v44, %s5487_s30  ;;  %v607_v48 = vsel %vm603_vm9, 65537, %v7829_v1  ;;  %vm7809_vm12 = vcmask 7168   ;;  %v976_v26 = vld [vmem:[#allocation2 + $0x48] sm:$0xf]  ;;  %v3231_v31 = vld [vmem:[#allocation3 + $0x24] sm:$0xf] }
  0x2f   : > { %1117 = vrot.lane.b32.xlu1 %v833_v46, %s5487_s30  ;;  %v809_v38 = vld [vmem:[#allocation2 + $0x48] sm:$0xf]  ;;  %vm7818_vm1 = vcmask 1039360   ;;  %vm7823_vm6 = vcmask 793600   ;;  %vm7824_vm7 = vcmask 777216   ;;  %vm7822_vm9 = vcmask 269312  }
  0x30   : > { %v5772_v49 = vld [vmem:[#allocation2] sm:$0xff]  ;;  %s7996_s2 = sld [smem:[#allocation40_spill]]  ;;  %s6950_s28 = sand.u32 1, %s5476_s14  }
  0x31   : > { %v5803_v61 = vld [vmem:[#allocation2 + $0x4] sm:$0xff]  ;;  %s8083_s1 = sld [smem:[#allocation39_spill]] }
  0x32   : > { %981 = vrot.lane.b32.xlu0 %v606_v47, %s5488_s11 }
  0x33   : > { %983 = vrot.lane.b32.xlu1 %v607_v48, %s5488_s11  ;;  %v5778_v52 = vld [vmem:[#allocation2 + $0x8] sm:$0xff]  ;;  %v5793_v57 = vld [vmem:[#allocation2 + $0x10] sm:$0xff] }
  0x34   : > { %v5796_v58 = vld [vmem:[#allocation2 + $0x18] sm:$0xff]  ;;  %v721_v60 = vld [vmem:[#allocation2 + $0x20] sm:$0xf] }
  0x35   : > { %v971_v18 = vld [vmem:[#allocation2 + $0x20] sm:$0xf] }
  0x36   : > { %834 = vrot.lane.b32.xlu0 %v830_v25, %s7873_s12 }
  0x37   : > { %836 = vrot.lane.b32.xlu1 %v831_v32, %s7873_s12 }
  0x3a   : > { %608 = vrot.lane.b32.xlu0 %v604_v30, %s5490_s18 }
  0x3b   : > { %610 = vrot.lane.b32.xlu1 %v605_v35, %s5490_s18 }
  0x3e   : > { %838 = vrot.lane.b32.xlu0 %v832_v44, %s7873_s12 }
  0x3f   : > { %840 = vrot.lane.b32.xlu1 %v833_v46, %s7873_s12 }
  0x42   : > { %612 = vrot.lane.b32.xlu0 %v606_v47, %s5490_s18 }
  0x43   : > { %614 = vrot.lane.b32.xlu1 %v607_v48, %s5490_s18 }
  0x46   : > { %2027 = vrot.lane.b32.xlu0 %v830_v25, %s5491_s20 }
  0x47   : > { %2029 = vrot.lane.b32.xlu1 %v831_v32, %s5491_s20  ;;  %v3236_v32 = vld [vmem:[#allocation3 + $0x4c] sm:$0xf] }
  0x4a   : > { %1828 = vrot.lane.b32.xlu0 %v604_v30, %s5492_s21 }
  0x4b   : > { %1830 = vrot.lane.b32.xlu1 %v605_v35, %s5492_s21 }
  0x4e   : > { %2031 = vrot.lane.b32.xlu0 %v832_v44, %s5491_s20  ;;  %v804_v44 = vld [vmem:[#allocation2 + $0x20] sm:$0xf] }
  0x4f   : > { %2033 = vrot.lane.b32.xlu1 %v833_v46, %s5491_s20 }
  0x52   : > { %1834 = vrot.lane.b32.xlu0 %v607_v48, %s5492_s21 }
  0x53   : > { %1832 = vrot.lane.b32.xlu1 %v606_v47, %s5492_s21 }
  0x56   : > { %737 = vrot.lane.b32.xlu0 %v5772_v49, %s5493_s26 }
  0x57   : > { %739 = vrot.lane.b32.xlu1 %v5778_v52, %s5493_s26 }
  0x5a   : > { %5196 = vrot.lane.b32.xlu0 %v5195_v55, %s5493_s26  ;;  %v7930_v55 = vmov 0 }
  0x5b   : > { %5201 = vrot.lane.b32.xlu1 %v5200_v56, %s5493_s26 }
  0x5e   : > { %741 = vrot.lane.b32.xlu0 %v5793_v57, %s5493_s26 }
  0x5f   : > { %743 = vrot.lane.b32.xlu1 %v5796_v58, %s5493_s26 }
  0x62   : > { %755 = vrot.lane.b32.xlu0 %v726_v59, %s5493_s26 }
  0x63   : > { %745 = vrot.lane.b32.xlu1 %v721_v60, %s5493_s26 }
  0x66   : > { %1954 = vrot.lane.b32.xlu0 %v5803_v61, %s5494_s27 }
  0x98   : > { %v5808_v62 = vpop.permute.xlu0 %1111 }
  0x99   : > { %v5810_v63 = vpop.permute.xlu1 %977  ;;  %v1119_v33 = vrot.slane %v5808_v62, 4 }
  0x9a   : > { %v985_v47 = vrot.slane %v5810_v63, 4 }
  0x9c   : > { %v1114_v2 = vpop.permute.xlu0 %1113 }
  0x9d   : > { %v5812_v3 = vpop.permute.xlu1 %979  ;;  %v1120_v6 = vrot.slane %v1114_v2, 4 }
  0x9e   : > { %v986_v11 = vrot.slane %v5812_v3, 4 }
  0x9f   : > { %v1124_v48 = vsel %vm7828_vm11, %v1119_v33, %v1120_v6 }
  0xa0   : > { %v1116_v4 = vpop.permute.xlu0 %1115 }
  0xa1   : > { %v1118_v5 = vpop.permute.xlu1 %1117  ;;  %v1121_v7 = vrot.slane %v1116_v4, 4 }
  0xa2   : > { %v1122_v8 = vrot.slane %v1118_v5, 4 }
  0xa3   : > { %v1126_v15 = vsel %vm7828_vm11, %v1120_v6, %v1121_v7  ;;  %v578_v6 = vld [vmem:[#allocation2 + $0x20] sm:$0xf] }
  0xa4   : > { %vm5814_vm10 = vcmp.ne.s16.totalorder %v1122_v8, 0  ;;  %v5818_v12 = vpop.permute.xlu0 %981  ;;  %v1128_v19 = vsel %vm7828_vm11, %v1121_v7, %v1122_v8  ;;  %v5838_v23 = vsel %vm7809_vm12, %v1126_v15, %v1116_v4  ;;  %v583_v7 = vld [vmem:[#allocation2 + $0x48] sm:$0xf]  ;;  %v5894_v8 = vsel %vm7809_vm12, %v1119_v33, %v5808_v62 }
  0xa5   : > { %v5820_v13 = vpop.permute.xlu1 %983  ;;  %v1139_v14 = vsel %vm5814_vm10, %v1105_v9, 0  ;;  %v1144_v17 = vsel %vm5814_vm10, %v1110_v10, 0  ;;  %7928 = vst [vmem:[#allocation16_spill] sm:$0xff] %v5838_v23  ;;  %v5846_v27 = vsel %vm7809_vm12, %v1128_v19, %v1118_v5  ;;  %vm7816_vm14 = vcmp.ne.s16.totalorder %v5838_v23, 0 }
  0xa6   : > { %v988_v16 = vrot.slane %v5820_v13, 4  ;;  %v5205_v20 = vpack.i.bf16 %v1144_v17, %v1139_v14  ;;  %7929 = vst [vmem:[#allocation17_spill] sm:$0xff] %v5846_v27  ;;  %vm7814_vm15 = vcmp.ne.s16.totalorder %v5846_v27, 0  ;;  %v3241_v36 = vsel %vm5814_vm10, %v3231_v31, 0 }
  0xa7   : > { %v5867_v40 = vpack.i.bf16 %v3241_v36, %v7829_v1  ;;  %v3246_v41 = vsel %vm5814_vm10, %v3236_v32, 0  ;;  %v5897_v9 = vsel %vm7809_vm12, %v1124_v48, %v1114_v2  ;;  %v5902_v10 = vsel %vm7818_vm1, %v985_v47, %v5810_v63 }
  0xa8   : > { %vm5831_vm13 = vcmp.ne.s16.totalorder %v988_v16, 0  ;;  %v5835_v22 = vpop.permute.xlu0 %834  ;;  %5206 = vrot.lane.b32.xlu0 %v5205_v20, %s5488_s11  ;;  %v5872_v46 = vpack.i.bf16 %v3246_v41, %v7829_v1  ;;  %v7933_v14 = vmov 0  ;;  %vm7808_vm3 = vcmp.ne.s16.totalorder %v5894_v8, 0 }
  0xa9   : > { %v7926_v21 = vsel %vm5831_vm13, 4294967295, %v7925_v21  ;;  %v5841_v24 = vpop.permute.xlu1 %836  ;;  %v1006_v25 = vsel %vm5831_vm13, %v971_v18, 0  ;;  %v1011_v28 = vsel %vm5831_vm13, %v976_v26, 0  ;;  %vm7817_vm4 = vcmp.ne.s16.totalorder %v5897_v9, 0 }
  0xaa   : > { %7927 = vst [vmem:[#allocation15_spill] sm:$0xff] %v7926_v21  ;;  %1030 = vrot.lane.b32.xlu1 %v1006_v25, %s5487_s30  ;;  %v842_v63 = vrot.slane %v5835_v22, 4  ;;  %vm7819_vm5 = vcmp.ne.s16.totalorder %v5902_v10, 0  ;;  %v991_v17 = vsel %vm7828_vm11, %v985_v47, %v986_v11  ;;  %v1135_v18 = vsel %vm7808_vm3, %v5803_v61, 0 }
  0xab   : > { %v1002_v25 = vsel %vm7819_vm5, %v5772_v49, 0  ;;  %v987_v31 = vrot.slane %v5818_v12, 4 }
  0xac   : > { %v5852_v29 = vpop.permute.xlu0 %608  ;;  %1040 = vrot.lane.b32.xlu0 %v1011_v28, %s5487_s30  ;;  %v5927_v19 = vsel %vm7823_vm6, %v842_v63, %v5835_v22  ;;  %v5938_v28 = vsel %vm7818_vm1, %v991_v17, %v5812_v3 }
  0xad   : > { %v5856_v30 = vpop.permute.xlu1 %610  ;;  %v616_v20 = vrot.slane %v5852_v29, 4  ;;  %vm7811_vm8 = vcmp.ne.s16.totalorder %v5927_v19, 0  ;;  %vm7820_vm10 = vcmp.ne.s16.totalorder %v5938_v28, 0  ;;  %v993_v36 = vsel %vm7828_vm11, %v986_v11, %v987_v31 }
  0xae   : > { %v859_v3 = vsel %vm7811_vm8, %v5772_v49, 0  ;;  %v1003_v47 = vsel %vm7820_vm10, %v5778_v52, 0 }
  0xaf   : > { %v5948_v33 = vsel %vm7824_vm7, %v616_v20, %v5852_v29 }
  0xb0   : > { %v5859_v34 = vpop.permute.xlu0 %838  ;;  %7936 = vst [vmem:[#allocation20_spill] sm:$0xff] %v5948_v33  ;;  %vm7810_vm3 = vcmp.ne.s16.totalorder %v5948_v33, 0 }
  0xb1   : > { %v5861_v35 = vpop.permute.xlu1 %840 }
  0xb2   : > { %v845_v37 = vrot.slane %v5861_v35, 4 }
  0xb4   : > { %vm5878_vm0 = vcmp.ne.s16.totalorder %v845_v37, 0  ;;  %v5886_v60 = vpop.permute.xlu0 %612 }
  0xb5   : > { %v7931_v55 = vsel %vm5878_vm0, 4294967295, %v7930_v55  ;;  %v5882_v56 = vpop.permute.xlu1 %614  ;;  %v868_v59 = vsel %vm5878_vm0, %v809_v38, 0  ;;  %v863_v5 = vsel %vm5878_vm0, %v804_v44, 0  ;;  %v995_v38 = vsel %vm7828_vm11, %v987_v31, %v988_v16 }
  0xb6   : > { %7932 = vst [vmem:[#allocation18_spill] sm:$0xff] %v7931_v55  ;;  %v7813_v4 = vrot.slane %v5882_v56, 4  ;;  %897 = vrot.lane.b32.xlu0 %v868_v59, %s5492_s21  ;;  %887 = vrot.lane.b32.xlu1 %v863_v5, %s5492_s21  ;;  %v5971_v59 = vsel %vm7818_vm1, %v993_v36, %v5818_v12  ;;  %v634_v16 = vsel %vm7810_vm3, %v5772_v49, 0  ;;  %v5977_v5 = vld [vmem:[#allocation2 + $0x14] sm:$0xff]  ;;  %v843_v12 = vrot.slane %v5841_v24, 4 }
  0xb7   : > { %7938 = vst [vmem:[#allocation22_spill] sm:$0xff] %v5971_v59  ;;  %vm7825_vm3 = vcmp.ne.s16.totalorder %v5971_v59, 0  ;;  %v617_v36 = vrot.slane %v5856_v30, 4 }
  0xb8   : > { %vm5907_vm2 = vcmp.ne.s16.totalorder %v7813_v4, 0  ;;  %v2028_v15 = vpop.permute.xlu0 %2027  ;;  %v844_v4 = vrot.slane %v5859_v34, 4 }
  0xb9   : > { %v7934_v14 = vsel %vm5907_vm2, 4294967295, %v7933_v14  ;;  %v638_v62 = vsel %vm5907_vm2, %v578_v6, 0  ;;  %v643_v2 = vsel %vm5907_vm2, %v583_v7, 0  ;;  %v2035_v22 = vrot.slane %v2028_v15, 4  ;;  %v2030_v32 = vpop.permute.xlu1 %2029 }
  0xba   : > { %7935 = vst [vmem:[#allocation19_spill] sm:$0xff] %v7934_v14  ;;  %662 = vrot.lane.b32.xlu0 %v638_v62, %s5491_s20  ;;  %672 = vrot.lane.b32.xlu1 %v643_v2, %s5491_s20  ;;  %v5981_v6 = vsel %vm7818_vm1, %v995_v38, %v5820_v13  ;;  %v2036_v7 = vrot.slane %v2030_v32, 4  ;;  %v1137_v62 = vsel %vm7816_vm14, %v5977_v5, 0  ;;  %v5995_v13 = vld [vmem:[#allocation2 + $0x1c] sm:$0xff]  ;;  %v5997_v2 = vld [vmem:[#allocation2 + $0xc] sm:$0xff]  ;;  %vm7955_vm14 = vcmp.ne.s16.totalorder %v5948_v33, 0 }
  0xbb   : > { %v5961_v41 = vsel %vm7822_vm9, %v2035_v22, %v2028_v15  ;;  %7939 = vst [vmem:[#allocation23_spill] sm:$0xff] %v5981_v6  ;;  %vm1000_vm8 = vcmp.ne.s16.totalorder %v5981_v6, 0  ;;  %v1138_v38 = vsel %vm7814_vm15, %v5995_v13, 0  ;;  %vm7821_vm15 = vcmask 252928  }
  0xbc   : > { %v5934_v26 = vpop.permute.xlu0 %1828  ;;  %7937 = vst [vmem:[#allocation21_spill] sm:$0xff] %v5961_v41  ;;  %vm7815_vm12 = vcmp.ne.s16.totalorder %v5961_v41, 0  ;;  %v2040_v15 = vsel %vm7828_vm11, %v2035_v22, %v2036_v7  ;;  %v1136_v22 = vsel %vm7817_vm4, %v5997_v2, 0 }
  0xbd   : > { %v5967_v48 = vpop.permute.xlu1 %1830  ;;  %v2051_v49 = vsel %vm7815_vm12, %v5803_v61, 0  ;;  %v1836_v17 = vrot.slane %v5934_v26, 4 }
  0xbe   : > { %1155 = vrot.lane.b32.xlu0 %v1135_v18, %s5488_s11  ;;  %1022 = vrot.lane.b32.xlu1 %v1002_v25, %s5487_s30  ;;  %v1837_v18 = vrot.slane %v5967_v48, 4 }
  0xc0   : > { %v2032_v44 = vpop.permute.xlu0 %2031 }
  0xc1   : > { %v2037_v11 = vrot.slane %v2032_v44, 4  ;;  %v2034_v31 = vpop.permute.xlu1 %2033 }
  0xc2   : > { %5211 = vrot.lane.b32.xlu0 %v7829_v1, %s5488_s11  ;;  %879 = vrot.lane.b32.xlu1 %v859_v3, %s5492_s21  ;;  %v848_v3 = vsel %vm7828_vm11, %v842_v63, %v843_v12  ;;  %v6019_v63 = vsel %vm7822_vm9, %v2040_v15, %v2030_v32  ;;  %v1841_v32 = vsel %vm7828_vm11, %v1836_v17, %v1837_v18 }
  0xc3   : > { %v2042_v25 = vsel %vm7828_vm11, %v2036_v7, %v2037_v11  ;;  %7940 = vst [vmem:[#allocation24_spill] sm:$0xff] %v6019_v63  ;;  %v1008_v7 = vsel %vm7820_vm10, %v5776_v51, 0  ;;  %v6030_v0 = vsel %vm7823_vm6, %v848_v3, %v5841_v24  ;;  %v623_v15 = vsel %vm7828_vm11, %v616_v20, %v617_v36 }
  0xc4   : > { %v6045_v24 = vsel %vm7821_vm15, %v1836_v17, %v5934_v26  ;;  %vm7827_vm12 = vcmp.ne.s16.totalorder %v6019_v63, 0  ;;  %vm855_vm4 = vcmp.ne.s16.totalorder %v6030_v0, 0  ;;  %v6053_v29 = vsel %vm7821_vm15, %v1841_v32, %v5967_v48  ;;  %v8099_v0 = vld [vmem:[#allocation20_spill] sm:$0xff] }
  0xc5   : > { %7942 = vst [vmem:[#allocation26_spill] sm:$0xff] %v6045_v24  ;;  %7943 = vst [vmem:[#allocation27_spill] sm:$0xff] %v6053_v29  ;;  %v850_v26 = vsel %vm7828_vm11, %v843_v12, %v844_v4  ;;  %vm7826_vm10 = vcmp.ne.s16.totalorder %v6053_v29, 0  ;;  %v7949_v32 = vrot.slane %v5882_v56, 4 }
  0xc6   : > { %1024 = vrot.lane.b32.xlu0 %v1003_v47, %s5487_s30  ;;  %654 = vrot.lane.b32.xlu1 %v634_v16, %s5491_s20  ;;  %v1009_v47 = vsel %vm7825_vm3, %v5780_v53, 0  ;;  %v1010_v16 = vsel %vm1000_vm8, %v5782_v54, 0 }
  0xca   : > { %1159 = vrot.lane.b32.xlu0 %v1137_v62, %s5488_s11  ;;  %2071 = vrot.lane.b32.xlu1 %v2051_v49, %s5490_s18  ;;  %v6026_v62 = vsel %vm7822_vm9, %v2042_v25, %v2032_v44  ;;  %v2038_v49 = vrot.slane %v2034_v31, 4  ;;  %v5225_v44 = vpack.i.bf16 %v1010_v16, %v1009_v47  ;;  %v1007_v25 = vsel %vm7819_vm5, %v5774_v50, 0 }
  0xcb   : > { %7941 = vst [vmem:[#allocation25_spill] sm:$0xff] %v6026_v62  ;;  %v5215_v3 = vpack.i.bf16 %v1008_v7, %v1007_v25  ;;  %v618_v47 = vrot.slane %v5886_v60, 4  ;;  %v6081_v16 = vsel %vm7823_vm6, %v850_v26, %v5859_v34  ;;  %v852_v7 = vsel %vm7828_vm11, %v844_v4, %v845_v37  ;;  %v4102_v34 = vld [vmem:[#allocation3 + $0x4c] sm:$0xf] }
  0xcc   : > { %v2044_v20 = vsel %vm7828_vm11, %v2037_v11, %v2038_v49  ;;  %vm6063_vm5 = vcmp.ne.s16.totalorder %v2038_v49, 0  ;;  %v860_v11 = vsel %vm855_vm4, %v5778_v52, 0  ;;  %7947 = vst [vmem:[#allocation29_spill] sm:$0xff] %v6081_v16  ;;  %vm856_vm1 = vcmp.ne.s16.totalorder %v6081_v16, 0 }
  0xcd   : > { %v625_v49 = vsel %vm7828_vm11, %v617_v36, %v618_v47  ;;  %v6102_v37 = vsel %vm7823_vm6, %v852_v7, %v5861_v35  ;;  %v861_v35 = vsel %vm856_vm1, %v5793_v57, 0  ;;  %v1005_v26 = vsel %vm1000_vm8, %v5796_v58, 0 }
  0xce   : > { %1161 = vrot.lane.b32.xlu0 %v1138_v38, %s5488_s11  ;;  %1157 = vrot.lane.b32.xlu1 %v1136_v22, %s5488_s11  ;;  %v6058_v38 = vsel %vm7824_vm7, %v623_v15, %v5856_v30  ;;  %v4097_v22 = vld [vmem:[#allocation3 + $0x24] sm:$0xf]  ;;  %v6073_v30 = vsel %vm7822_vm9, %v2044_v20, %v2034_v31  ;;  %v627_v15 = vsel %vm7828_vm11, %v618_v47, %v7949_v32  ;;  %vm857_vm6 = vcmp.ne.s16.totalorder %v6102_v37, 0 }
  0xcf   : > { %7946 = vst [vmem:[#allocation28_spill] sm:$0xff] %v6073_v30  ;;  %vm630_vm15 = vcmp.ne.s16.totalorder %v6058_v38, 0  ;;  %v4107_v12 = vsel %vm6063_vm5, %v4097_v22, 0  ;;  %7950 = vst [vmem:[#allocation31_spill] sm:$0xff] %v6102_v37  ;;  %v6107_v4 = vsel %vm7824_vm7, %v625_v49, %v5886_v60  ;;  %v6111_v36 = vsel %vm7824_vm7, %v627_v15, %v5882_v56 }
  0xd0   : > { %v6089_v31 = vpack.i.bf16 %v4107_v12, %v7829_v1  ;;  %7951 = vst [vmem:[#allocation32_spill] sm:$0xff] %v6107_v4  ;;  %7952 = vst [vmem:[#allocation33_spill] sm:$0xff] %v6111_v36  ;;  %vm7868_vm9 = vcmp.ne.s16.totalorder %v6107_v4, 0  ;;  %vm7862_vm7 = vcmp.ne.s16.totalorder %v6111_v36, 0  ;;  %v1004_v56 = vsel %vm7825_vm3, %v5793_v57, 0 }
  0xd1   : > { %v862_v60 = vsel %vm857_vm6, %v5796_v58, 0  ;;  %v642_v20 = vsel %vm7862_vm7, %v5782_v54, 0  ;;  %vm7954_vm3 = vcmp.ne.s16.totalorder %v5927_v19, 0  ;;  %v865_v47 = vsel %vm855_vm4, %v5776_v51, 0 }
  0xd2   : > { %5226 = vrot.lane.b32.xlu0 %v5225_v44, %s5487_s30  ;;  %5216 = vrot.lane.b32.xlu1 %v5215_v3, %s5487_s30  ;;  %7948 = vst [vmem:[#allocation30_spill] sm:$0xff] %v6089_v31  ;;  %v635_v44 = vsel %vm630_vm15, %v5778_v52, 0  ;;  %v4112_v52 = vsel %vm6063_vm5, %v4102_v34, 0  ;;  %v641_v3 = vsel %vm7868_vm9, %v5780_v53, 0  ;;  %v864_v22 = vsel %vm7954_vm3, %v5774_v50, 0 }
  0xd3   : > { %v6118_v25 = vpack.i.bf16 %v4112_v52, %v7829_v1  ;;  %v5230_v12 = vpack.i.bf16 %v865_v47, %v864_v22  ;;  %v639_v7 = vsel %vm7955_vm14, %v5774_v50, 0  ;;  %v640_v49 = vsel %vm630_vm15, %v5776_v51, 0  ;;  %v1833_v52 = vpop.permute.xlu1 %1832 }
  0xd4   : > { %v5235_v32 = vpack.i.bf16 %v640_v49, %v639_v7  ;;  %v637_v15 = vsel %vm7862_vm7, %v5796_v58, 0  ;;  %v866_v34 = vsel %vm856_vm1, %v5780_v53, 0  ;;  %v867_v50 = vsel %vm857_vm6, %v5782_v54, 0  ;;  %v1835_v58 = vpop.permute.xlu0 %1834  ;;  %v1943_v7 = vld [vmem:[#allocation2 + $0x4c] sm:$0xf] }
  0xd5   : > { %7953 = vst [vmem:[#allocation34_spill] sm:$0xff] %v6118_v25  ;;  %v5240_v51 = vpack.i.bf16 %v867_v50, %v866_v34  ;;  %v636_v53 = vsel %vm7868_vm9, %v5793_v57, 0  ;;  %v1853_v54 = vsel %vm7826_vm10, %v5997_v2, 0  ;;  %vm7956_vm14 = vcmp.ne.s16.totalorder %v6026_v62, 0  ;;  %v2026_v34 = vld [vmem:[#allocation2 + $0x4c] sm:$0xf] }
  0xd6   : > { %881 = vrot.lane.b32.xlu0 %v860_v11, %s5492_s21  ;;  %5221 = vrot.lane.b32.xlu1 %v7829_v1, %s5488_s11  ;;  %v5245_v11 = vpack.i.bf16 %v642_v20, %v641_v3  ;;  %v2053_v3 = vsel %vm7956_vm14, %v5977_v5, 0  ;;  %vm7957_vm3 = vcmp.ne.s16.totalorder %v6045_v24, 0  ;;  %vm7958_vm10 = vcmask 252928  }
  0xd7   : > { %v1852_v20 = vsel %vm7957_vm3, %v5803_v61, 0  ;;  %vm7967_vm3 = vcmp.ne.s16.totalorder %v5938_v28, 0 }
  0xda   : > { %656 = vrot.lane.b32.xlu0 %v635_v44, %s5491_s20  ;;  %1956 = vrot.lane.b32.xlu1 %v5997_v2, %s5494_s27  ;;  %v2052_v44 = vsel %vm7827_vm12, %v5997_v2, 0  ;;  %vm7960_vm12 = vmmov %vm7958_vm10 }
  0xde   : > { %883 = vrot.lane.b32.xlu0 %v861_v35, %s5492_s21  ;;  %1026 = vrot.lane.b32.xlu1 %v1004_v56, %s5487_s30  ;;  %v1839_v35 = vrot.slane %v1835_v58, 4  ;;  %v1838_v56 = vrot.slane %v1833_v52, 4 }
  0xe0   : > { %v1843_v57 = vsel %vm7828_vm11, %v1837_v18, %v1838_v56  ;;  %v6211_v18 = vpop.permute.xlu0 %737 }
  0xe2   : > { %885 = vrot.lane.b32.xlu0 %v862_v60, %s5492_s21  ;;  %1028 = vrot.lane.b32.xlu1 %v1005_v26, %s5487_s30  ;;  %v1845_v60 = vsel %vm7828_vm11, %v1838_v56, %v1839_v35  ;;  %v6199_v26 = vsel %vm7958_vm10, %v1843_v57, %v1833_v52  ;;  %vm7962_vm10 = vcmp.ne.s16.totalorder %v6073_v30, 0  ;;  %v7963_v52 = vmov 0  ;;  %v1827_v56 = vld [vmem:[#allocation2 + $0x4c] sm:$0xf] }
  0xe3   : > { %7959 = vst [vmem:[#allocation35_spill] sm:$0xff] %v6199_v26  ;;  %v6203_v48 = vsel %vm7960_vm12, %v1845_v60, %v1835_v58  ;;  %vm7851_vm11 = vcmp.ne.s16.totalorder %v6199_v26, 0  ;;  %v2054_v22 = vsel %vm7962_vm10, %v5995_v13, 0  ;;  %v2060_v58 = vsel %vm6063_vm5, %v2026_v34, 0 }
  0xe4   : > { %7961 = vst [vmem:[#allocation36_spill] sm:$0xff] %v6203_v48  ;;  %vm7849_vm14 = vcmp.ne.s16.totalorder %v6203_v48, 0  ;;  %v6221_v47 = vpop.permute.xlu0 %5196  ;;  %v1854_v49 = vsel %vm7851_vm11, %v5977_v5, 0  ;;  %vm6242_vm12 = vcmp.ne.s16.totalorder %v1839_v35, 0  ;;  %vm7968_vm10 = vcmp.ne.s16.totalorder %v5902_v10, 0 }
  0xe5   : > { %v7964_v52 = vsel %vm6242_vm12, 4294967295, %v7963_v52  ;;  %v1861_v35 = vsel %vm6242_vm12, %v1827_v56, 0 }
  0xe6   : > { %5246 = vrot.lane.b32.xlu0 %v5245_v11, %s5491_s20  ;;  %5231 = vrot.lane.b32.xlu1 %v5230_v12, %s5492_s21  ;;  %v1855_v11 = vsel %vm7849_vm14, %v5995_v13, 0  ;;  %v1938_v12 = vld [vmem:[#allocation2 + $0x24] sm:$0xf]  ;;  %7965 = vst [vmem:[#allocation37_spill] sm:$0xff] %v7964_v52 }
  0xe8   : > { %v6233_v50 = vpop.permute.xlu0 %741 }
  0xea   : > { %660 = vrot.lane.b32.xlu0 %v637_v15, %s5491_s20  ;;  %5236 = vrot.lane.b32.xlu1 %v5235_v32, %s5491_s20  ;;  %v5285_v32 = vpack.i.bf16 %v1943_v7, %v1938_v12  ;;  %v2021_v15 = vld [vmem:[#allocation2 + $0x24] sm:$0xf] }
  0xec   : > { %v6251_v60 = vpop.permute.xlu0 %755 }
  0xee   : > { %2073 = vrot.lane.b32.xlu0 %v2052_v44, %s5490_s18  ;;  %5241 = vrot.lane.b32.xlu1 %v5240_v51, %s5492_s21  ;;  %v6235_v51 = vpop.permute.xlu1 %739  ;;  %v2055_v44 = vsel %vm6063_vm5, %v2021_v15, 0  ;;  %vm7966_vm5 = vcmp.ne.s16.totalorder %v5971_v59, 0  ;;  %v766_v59 = vrot.slane %v6251_v60, 4 }
  0xef   : > { %v5280_v57 = vpack.i.bf16 %v2060_v58, %v2055_v44  ;;  %v3125_v44 = vld [vmem:[#allocation3 + $0x30] sm:$0xff]  ;;  %v3124_v58 = vld [vmem:[#allocation3 + $0x28] sm:$0xff] }
  0xf2   : > { %5251 = vrot.lane.b32.xlu0 %v7829_v1, %s5494_s27  ;;  %658 = vrot.lane.b32.xlu1 %v636_v53, %s5491_s20  ;;  %v2454_v53 = vld [vmem:[%s7800_s3] sm:$0xff] }
  0xf6   : > { %1874 = vrot.lane.b32.xlu0 %v1853_v54, %s7873_s12  ;;  %5256 = vrot.lane.b32.xlu1 %v7829_v1, %s5490_s18  ;;  %v1822_v54 = vld [vmem:[#allocation2 + $0x24] sm:$0xf] }
  0xf7   : > { %v1856_v17 = vsel %vm6242_vm12, %v1822_v54, 0 }
  0xfa   : > { %2075 = vrot.lane.b32.xlu0 %v2053_v3, %s5490_s18  ;;  %1872 = vrot.lane.b32.xlu1 %v1852_v20, %s7873_s12  ;;  %v3126_v3 = vld [vmem:[#allocation3 + $0x38] sm:$0xff]  ;;  %v3127_v20 = vld [vmem:[#allocation3 + $0x40] sm:$0xff] }
  0xfb   : > { %v3136_v12 = vsel %vm7966_vm5, %v3126_v3, 0  ;;  %v3137_v7 = vsel %vm1000_vm8, %v3127_v20, 0  ;;  %v3020_v54 = vsel %vm857_vm6, %v3127_v20, 0  ;;  %vm7969_vm5 = vcmp.ne.s16.totalorder %v5927_v19, 0 }
  0xfc   : > { %v5312_v15 = vpack.i.bf16 %v3137_v7, %v3136_v12  ;;  %v5332_v7 = vpack.i.bf16 %v3125_v44, %v3124_v58 }
  0xfe   : > { %1958 = vrot.lane.b32.xlu0 %v5977_v5, %s5494_s27  ;;  %5261 = vrot.lane.b32.xlu1 %v7829_v1, %s7873_s12 }
 0x102   : > { %2077 = vrot.lane.b32.xlu0 %v2054_v22, %s5490_s18  ;;  %5266 = vrot.lane.b32.xlu1 %v7829_v1, %s5490_s18  ;;  %v6257_v22 = vpop.permute.xlu1 %5201 }
 0x106   : > { %5276 = vrot.lane.b32.xlu0 %v7829_v1, %s7873_s12  ;;  %5271 = vrot.lane.b32.xlu1 %v7829_v1, %s5494_s27  ;;  %v6272_v34 = vpop.permute.xlu1 %743 }
 0x107   : > { %v760_v36 = vrot.slane %v6272_v34, 4 }
 0x10a   : > { %1878 = vrot.lane.b32.xlu0 %v1855_v11, %s7873_s12  ;;  %1876 = vrot.lane.b32.xlu1 %v1854_v49, %s7873_s12  ;;  %v5290_v11 = vpack.i.bf16 %v1861_v35, %v1856_v17  ;;  %v6267_v49 = vpop.permute.xlu0 %1954  ;;  %v6285_v17 = vpop.permute.xlu1 %745  ;;  %v3134_v35 = vsel %vm7968_vm10, %v3124_v58, 0  ;;  %vm7971_vm10 = vcmask 1043456  }
 0x10e   : > { %5286 = vrot.lane.b32.xlu0 %v5285_v32, %s5494_s27  ;;  %1960 = vrot.lane.b32.xlu1 %v5995_v13, %s5494_s27  ;;  %v2746_v32 = vld [vmem:[%s7802_s5] sm:$0xff] }
 0x112   : > { %2457 = vperm.xlu0 %5295, %v2454_v53   ;;  %5281 = vrot.lane.b32.xlu1 %v5280_v57, %s5490_s18  ;;  %v3019_v53 = vsel %vm856_vm1, %v3126_v3, 0  ;;  %v3135_v57 = vsel %vm7967_vm3, %v3125_v44, 0  ;;  %vm7970_vm3 = vcmp.ne.s16.totalorder %v5948_v33, 0 }
 0x113   : > { %v5307_v12 = vpack.i.bf16 %v3135_v57, %v3134_v35  ;;  %v3018_v57 = vsel %vm855_vm4, %v3125_v44, 0  ;;  %v2843_v42 = vsel %vm7970_vm3, %v3124_v58, 0  ;;  %vm7972_vm3 = vmmov %vm7971_vm10 }
 0x114   : > { %vm7973_vm14 = vmmov %vm7972_vm3 }
 0x115   : > { %vm7974_vm11 = vmmov %vm7972_vm3 }
 0x116   : > { %5298 = vrot.lane.b32.xlu0 %v7829_v1, %s5488_s11  ;;  %5291 = vrot.lane.b32.xlu1 %v5290_v11, %s7873_s12  ;;  %v5327_v11 = vpack.i.bf16 %v3020_v54, %v3019_v53  ;;  %v2845_v1 = vsel %vm7868_vm9, %v3126_v3, 0  ;;  %v3017_v54 = vsel %vm7969_vm5, %v3124_v58, 0  ;;  %v5199_v58 = vunpack.i.h.bf16 %v6221_v47  ;;  %s5130_s12 = sshll.u32 %s5628_s25, 6 }
 0x117   : > { %v5322_v45 = vpack.i.bf16 %v3018_v57, %v3017_v54  ;;  %vm7867_vm5 = vcmask 261120   ;;  %s6884_s29 = scalar_lea.vmem %s8083_s1, %s5130_s12 }
 0x118   : > { %v763_v48 = vrot.slane %v5199_v58, 4 }
 0x11a   : > { %5313 = vrot.lane.b32.xlu0 %v5312_v15, %s5487_s30  ;;  %2749 = vperm.xlu1 %5296, %v2746_v32   ;;  %v6279_v56 = vpop.permute.xlu0 %5206  ;;  %v3128_v32 = vld [vmem:[#allocation3 + $0x48] sm:$0xf] }
 0x11b   : > { %v3138_v53 = vsel %vm5831_vm13, %v3128_v32, 0  ;;  %v5337_v32 = vpack.i.bf16 %v3127_v20, %v3126_v3 }
 0x11c   : > { %v6295_v15 = vpop.permute.xlu1 %1030 }
 0x11e   : > { %5318 = vrot.lane.b32.xlu0 %v5872_v46, %s5488_s11  ;;  %5303 = vrot.lane.b32.xlu1 %v5867_v40, %s5488_s11  ;;  %v6293_v46 = vpop.permute.xlu0 %1040  ;;  %v2846_v40 = vsel %vm7862_vm7, %v3127_v20, 0 }
 0x122   : > { %5328 = vrot.lane.b32.xlu0 %v5327_v11, %s5492_s21  ;;  %5308 = vrot.lane.b32.xlu1 %v5307_v12, %s5487_s30  ;;  %v5347_v11 = vpack.i.bf16 %v2846_v40, %v2845_v1 }
 0x126   : > { %5333 = vrot.lane.b32.xlu0 %v5332_v7, %s5493_s26  ;;  %3167 = vrot.lane.b32.xlu1 %v3138_v53, %s5487_s30  ;;  %v2844_v53 = vsel %vm630_vm15, %v3125_v44, 0  ;;  %v5198_v44 = vunpack.i.l.bf16 %v6221_v47  ;;  %v759_v47 = vrot.slane %v6233_v50, 4 }
 0x127   : > { %v5342_v54 = vpack.i.bf16 %v2844_v53, %v2843_v42  ;;  %v757_v53 = vrot.slane %v6211_v18, 4 }
 0x128   : > { %v6309_v35 = vpop.permute.xlu0 %897  ;;  %v6311_v12 = vpop.permute.xlu1 %887  ;;  %v762_v52 = vrot.slane %v5198_v44, 4 }
 0x12a   : > { %5348 = vrot.lane.b32.xlu0 %v5347_v11, %s5491_s20  ;;  %5323 = vrot.lane.b32.xlu1 %v5322_v45, %s5492_s21  ;;  %v3011_v45 = vld [vmem:[#allocation3 + $0x48] sm:$0xf]  ;;  %v5203_v11 = vunpack.i.l.bf16 %v6257_v22  ;;  %v776_v24 = vsel %vm7972_vm3, %v762_v52, %v763_v48 }
 0x12b   : > { %v3021_v57 = vsel %vm5878_vm0, %v3011_v45, 0 }
 0x12c   : > { %v6315_v7 = vpop.permute.xlu0 %662  ;;  %v6317_v43 = vpop.permute.xlu1 %672  ;;  %v764_v25 = vrot.slane %v5203_v11, 4 }
 0x12e   : > { %5338 = vrot.lane.b32.xlu1 %v5337_v32, %s5493_s26  ;;  %v778_v21 = vsel %vm7974_vm11, %v763_v48, %v764_v25  ;;  %vm7976_vm11 = vmmov %vm7972_vm3 }
 0x130   : > { %v1156_v1 = vpop.permute.xlu0 %1155  ;;  %v6324_v40 = vpop.permute.xlu1 %1022 }
 0x131   : > { %v1042_v60 = vrot.slane %v6324_v40, 4 }
 0x132   : > { %5343 = vrot.lane.b32.xlu1 %v5342_v54, %s5491_s20  ;;  %v758_v54 = vrot.slane %v6235_v51, 4 }
 0x134   : > { %v6327_v3 = vpop.permute.xlu0 %5211  ;;  %v6329_v20 = vpop.permute.xlu1 %879  ;;  %v767_v55 = vsel %vm7971_vm10, %v757_v53, %v758_v54  ;;  %v770_v16 = vsel %vm7973_vm14, %v758_v54, %v759_v47  ;;  %vm7975_vm14 = vmmov %vm7972_vm3  ;;  %v6380_v54 = vsel %vm7867_vm5, %v5198_v44, %v776_v24 }
 0x135   : > { %v7854_v39 = vunpack.i.h.bf16 %v6327_v3  ;;  %v5213_v45 = vunpack.i.l.bf16 %v6327_v3  ;;  %v6374_v52 = vsel %vm7867_vm5, %v6211_v18, %v767_v55  ;;  %v6385_v27 = vsel %vm7867_vm5, %v6235_v51, %v770_v16  ;;  %vm7977_vm10 = vmmov %vm7972_vm3 }
 0x136   : > { %3050 = vrot.lane.b32.xlu1 %v3021_v57, %s5492_s21  ;;  %v7855_v57 = vunpack.i.h.bf16 %v6257_v22  ;;  %v772_v55 = vsel %vm7976_vm11, %v759_v47, %v760_v36  ;;  %v761_v18 = vrot.slane %v6285_v17, 4  ;;  %vm7982_vm11 = vmmov %vm7972_vm3 }
 0x137   : > { %v6353_v26 = vrot.slane %v7854_v39, 4  ;;  %v1180_v29 = vrot.slane %v5213_v45, 4  ;;  %v6366_v39 = vld [vmem:[#allocation2 + $0x2c] sm:$0xff]  ;;  %v6412_v23 = vsel %vm7867_vm5, %v6233_v50, %v772_v55 }
 0x138   : > { %v6337_v32 = vpop.permute.xlu0 %1024  ;;  %v6339_v42 = vpop.permute.xlu1 %654  ;;  %v765_v4 = vrot.slane %v7855_v57, 4  ;;  %v4923_v53 = vcombine.high %v5803_v61, %v6366_v39  ;;  %v4922_v31 = vcombine.low %v5803_v61, %v6366_v39  ;;  %v1175_v57 = vrot.slane %v1156_v1, 4 }
 0x139   : > { %v1193_v48 = vsel %vm7975_vm14, %v1180_v29, %v6353_v26  ;;  %v6388_v61 = vsel %vm7867_vm5, %v5199_v58, %v778_v21  ;;  %vm7978_vm14 = vcmask 1039360  }
 0x13a   : > { %v780_v29 = vsel %vm7972_vm3, %v764_v25, %v765_v4  ;;  %vm7979_vm7 = vmmov %vm7978_vm14  ;;  %v782_v25 = vsel %vm7982_vm11, %v765_v4, %v766_v59 }
 0x13b   : > { %v1194_v58 = vsel %vm7979_vm7, %v5213_v45, %v1193_v48  ;;  %vm7981_vm7 = vmmov %vm7972_vm3 }
 0x13c   : > { %v6347_v30 = vpop.permute.xlu0 %1159  ;;  %v6349_v62 = vpop.permute.xlu1 %2071 }
 0x140   : > { %v6360_v37 = vpop.permute.xlu0 %1161  ;;  %v6364_v6 = vpop.permute.xlu1 %1157 }
 0x141   : > { %v1176_v63 = vrot.slane %v6364_v6, 4  ;;  %v7984_v50 = vrot.slane %v6360_v37, 4 }
 0x143   : > { %v1185_v24 = vsel %vm7977_vm10, %v1175_v57, %v1176_v63  ;;  %v1177_v57 = vrot.slane %v6347_v30, 4  ;;  %vm7983_vm10 = vmmov %vm7972_vm3 }
 0x144   : > { %v6393_v14 = vpop.permute.xlu0 %5226  ;;  %v6399_v51 = vpop.permute.xlu1 %5216  ;;  %v1186_v21 = vsel %vm7978_vm14, %v1156_v1, %v1185_v24  ;;  %v7980_v24 = vrot.slane %v6337_v32, 4  ;;  %v774_v16 = vsel %vm7983_vm10, %v760_v36, %v761_v18  ;;  %vm7985_vm14 = vmmov %vm7972_vm3 }
 0x145   : > { %v7864_v17 = vunpack.i.h.bf16 %v6399_v51  ;;  %v5218_v44 = vunpack.i.l.bf16 %v6399_v51  ;;  %v4931_v47 = vcombine.high %v1186_v21, %v1194_v58  ;;  %v4930_v41 = vcombine.low %v1186_v21, %v1194_v58  ;;  %vm7988_vm10 = vmmov %vm7972_vm3 }
 0x146   : > { %v1052_v21 = vsel %vm7981_vm7, %v1042_v60, %v7980_v24  ;;  %v6422_v58 = vsel %vm7867_vm5, %v5203_v11, %v780_v29  ;;  %v1189_v55 = vsel %vm7972_vm3, %v1177_v57, %v7984_v50  ;;  %v7866_v33 = vunpack.i.l.bf16 %v6393_v14 }
 0x147   : > { %v1048_v1 = vrot.slane %v7864_v17, 4  ;;  %v1047_v45 = vrot.slane %v5218_v44, 4  ;;  %1377 = vmatprep.subr.bf16.mxu0 %v4931_v47  ;;  %vm7986_vm7 = vcmask 7168   ;;  %v5209_v47 = vunpack.i.h.bf16 %v6279_v56 }
 0x148   : > { %v6416_v48 = vpop.permute.xlu0 %881  ;;  %1378 = vmatpush1.bf16.msra.mxu0 %v4930_v41  ;;  %v6429_v17 = vpop.permute.xlu1 %5221  ;;  %v1054_v4 = vsel %vm7986_vm7, %v6324_v40, %v1052_v21  ;;  %vm7987_vm11 = vmmov %vm7986_vm7  ;;  %vm7989_vm3 = vcmask 1039360   ;;  %v6456_v21 = vsel %vm7867_vm5, %v6272_v34, %v774_v16  ;;  %v5229_v41 = vunpack.i.h.bf16 %v6393_v14 }
 0x149   : > { %v5224_v60 = vunpack.i.h.bf16 %v6429_v17  ;;  %v5223_v11 = vunpack.i.l.bf16 %v6429_v17  ;;  %1379 = vmatprep.subr.bf16.mxu0 %v4923_v53  ;;  %v1061_v59 = vsel %vm7985_vm14, %v1047_v45, %v1048_v1  ;;  %v1187_v45 = vsel %vm7988_vm10, %v1176_v63, %v1177_v57  ;;  %vm7991_vm14 = vmmov %vm7988_vm10 }
 0x14a   : > { %v1062_v36 = vsel %vm7987_vm11, %v5218_v44, %v1061_v59  ;;  %v1190_v44 = vsel %vm7989_vm3, %v6347_v30, %v1189_v55  ;;  %v7990_v59 = vunpack.i.h.bf16 %v6257_v22  ;;  %v1049_v63 = vrot.slane %v7866_v33, 4  ;;  %vm7992_vm7 = vmmov %vm7988_vm10 }
 0x14b   : > { %v1183_v29 = vrot.slane %v5224_v60, 4  ;;  %v1182_v24 = vrot.slane %v5223_v11, 4  ;;  %v4915_v53 = vcombine.high %v1054_v4, %v1062_v36  ;;  %v4914_v57 = vcombine.low %v1054_v4, %v1062_v36  ;;  %vm7993_vm11 = vmmov %vm7989_vm3 }
 0x14c   : > { %v6446_v50 = vpop.permute.xlu0 %656  ;;  %1380 = vmatpush1.bf16.msra.mxu0 %v4922_v31  ;;  %v6450_v40 = vpop.permute.xlu1 %1956  ;;  %v6461_v18 = vsel %vm7867_vm5, %v7990_v59, %v782_v25  ;;  %v1188_v34 = vsel %vm7993_vm11, %v6364_v6, %v1187_v45  ;;  %v7994_v22 = vunpack.i.h.bf16 %v6327_v3  ;;  %vm7995_vm10 = vmmov %vm7989_vm3  ;;  %v5208_v55 = vunpack.i.l.bf16 %v6279_v56  ;;  %v6483_v6 = vld [vmem:[%s7996_s2 + $0x4] sm:$0xf] }
 0x14d   : > { %1381 = vmatprep.subr.bf16.mxu0 %v4915_v53  ;;  %v1195_v31 = vsel %vm7991_vm14, %v6353_v26, %v1182_v24  ;;  %v1197_v30 = vsel %vm7992_vm7, %v1182_v24, %v1183_v29  ;;  %v4925_v26 = vcombine.high %v5997_v2, %v6366_v39  ;;  %vm1363_vm14 = vcmask 392192   ;;  %vm7998_vm11 = vmmov %vm7992_vm7 }
 0x14e   : > { %v1196_v16 = vsel %vm7995_vm10, %v7994_v22, %v1195_v31  ;;  %v1198_v25 = vsel %vm7989_vm3, %v5223_v11, %v1197_v30  ;;  %v4924_v3 = vcombine.low %v5997_v2, %v6366_v39  ;;  %v1184_v11 = vrot.slane %v5209_v47, 4  ;;  %vm7999_vm10 = vmmov %vm7992_vm7 }
 0x14f   : > { %v4933_v53 = vcombine.high %v1188_v34, %v1196_v16  ;;  %v4935_v33 = vcombine.high %v1190_v44, %v1198_v25  ;;  %v4932_v4 = vcombine.low %v1188_v34, %v1196_v16  ;;  %v1063_v45 = vsel %vm7992_vm7, %v1048_v1, %v1049_v63 }
 0x150   : > { %v6476_v59 = vpop.permute.xlu0 %883  ;;  %v1027_v24 = vpop.permute.xlu1 %1026  ;;  %1382 = vmatpush1.bf16.msra.mxu0 %v4914_v57  ;;  %v4927_v31 = vcombine.high %v5977_v5, %v6366_v39  ;;  %v1050_v30 = vrot.slane %v5229_v41, 4  ;;  %v4934_v57 = vcombine.low %v1190_v44, %v1198_v25  ;;  %v4926_v2 = vcombine.low %v5977_v5, %v6366_v39 }
 0x151   : > { %v1044_v36 = vrot.slane %v1027_v24, 4  ;;  %1418 = vmatprep.subr.bf16.mxu1 %v4933_v53  ;;  %1459 = vmatprep.subr.bf16.mxu0 %v4935_v33  ;;  %v1179_v47 = vrot.slane %v5208_v55, 4  ;;  %v7997_v22 = vrot.slane %v6337_v32, 4  ;;  %v1199_v44 = vsel %vm7999_vm10, %v1183_v29, %v1184_v11 }
 0x152   : > { %1419 = vmatpush1.bf16.msra.mxu1 %v4932_v4  ;;  %v1974_v5 = vrot.slane %v6267_v49, 4  ;;  %vm8000_vm3 = vcmask 7168   ;;  %v8001_v53 = vunpack.i.h.bf16 %v6399_v51  ;;  %v8003_v29 = vrot.slane %v6360_v37, 4 }
 0x153   : > { %v1055_v33 = vsel %vm7998_vm11, %v7997_v22, %v1044_v36  ;;  %4938 = vmatmul.mubr.msk.bf16.vlgmr.msra.gmra.mxu0 %vm1363_vm14, %v6483_v6  ;;  %1420 = vmatprep.subr.bf16.mxu1 %v4925_v26  ;;  %vm8002_vm7 = vmmov %vm8000_vm3  ;;  %v4928_v26 = vcombine.low %v5995_v13, %v6366_v39  ;;  %v900_v51 = vrot.slane %v6416_v48, 4 }
 0x154   : > { %v6503_v1 = vpop.permute.xlu0 %885  ;;  %v1029_v25 = vpop.permute.xlu1 %1028  ;;  %1460 = vmatpush1.bf16.msra.mxu0 %v4934_v57  ;;  %v1056_v55 = vsel %vm8000_vm3, %v6337_v32, %v1055_v33  ;;  %v1064_v4 = vsel %vm8002_vm7, %v8001_v53, %v1063_v45  ;;  %1481 = vmatprep.mubr.bf16.mxu0 %v6366_v39  ;;  %vm8004_vm11 = vmmov %vm7999_vm10  ;;  %v4929_v57 = vcombine.high %v5995_v13, %v6366_v39  ;;  %v1051_v32 = vrot.slane %v6293_v46, 4 }
 0x155   : > { %v1191_v11 = vsel %vm8004_vm11, %v8003_v29, %v1179_v47  ;;  %v1045_v22 = vrot.slane %v1029_v25, 4  ;;  %v4917_v34 = vcombine.high %v1056_v55, %v1064_v4  ;;  %1461 = vmatprep.subr.bf16.mxu0 %v4927_v31  ;;  %v1065_v45 = vsel %vm7999_vm10, %v1049_v63, %v1050_v30  ;;  %vm8006_vm7 = vmmov %vm7999_vm10 }
 0x156   : > { %1421 = vmatpush1.bf16.msra.mxu1 %v4924_v3  ;;  %vm8005_vm3 = vcmask 1039360   ;;  %v1046_v53 = vrot.slane %v6295_v15, 4  ;;  %v899_v31 = vrot.slane %v6329_v20, 4  ;;  %vm8008_vm5 = vmmov %vm8006_vm7  ;;  %v4916_v17 = vcombine.low %v1056_v55, %v1064_v4 }
 0x157   : > { %v1200_v33 = vsel %vm8005_vm3, %v5224_v60, %v1199_v44  ;;  %v1057_v29 = vsel %vm8006_vm7, %v1044_v36, %v1045_v22  ;;  %1422 = vmatprep.subr.bf16.mxu1 %v4917_v34  ;;  %vm8007_vm11 = vmmov %vm8005_vm3  ;;  %v1067_v63 = vsel %vm8008_vm5, %v1050_v30, %v1051_v32  ;;  %vm8009_vm10 = vcmask 7168  }
 0x158   : > { %v6532_v16 = vpop.permute.xlu0 %5246  ;;  %v1192_v46 = vsel %vm8007_vm11, %v6360_v37, %v1191_v11  ;;  %v6537_v3 = vpop.permute.xlu1 %5231  ;;  %1462 = vmatpush1.bf16.msra.mxu0 %v4926_v2  ;;  %v1058_v15 = vsel %vm8009_vm10, %v1027_v24, %v1057_v29  ;;  %v8010_v36 = vunpack.i.l.bf16 %v6393_v14  ;;  %vm8011_vm3 = vmmov %vm8009_vm10  ;;  %v675_v37 = vrot.slane %v6446_v50, 4 }
 0x159   : > { %v5234_v60 = vunpack.i.h.bf16 %v6537_v3  ;;  %v5233_v44 = vunpack.i.l.bf16 %v6537_v3  ;;  %v4937_v56 = vcombine.high %v1192_v46, %v1200_v33  ;;  %vm8012_vm7 = vmmov %vm8008_vm5  ;;  %v901_v2 = vrot.slane %v6476_v59, 4 }
 0x15a   : > { %v1066_v34 = vsel %vm8011_vm3, %v8010_v36, %v1065_v45  ;;  %v909_v47 = vsel %vm8012_vm7, %v899_v31, %v900_v51  ;;  %1423 = vmatpush1.bf16.msra.mxu1 %v4916_v17  ;;  %v1059_v24 = vsel %vm8008_vm5, %v1045_v22, %v1046_v53  ;;  %v674_v31 = vrot.slane %v6339_v42, 4  ;;  %vm8013_vm11 = vmmov %vm8011_vm3 }
 0x15b   : > { %v4918_v30 = vcombine.low %v1058_v15, %v1066_v34  ;;  %v4919_v11 = vcombine.high %v1058_v15, %v1066_v34  ;;  %v905_v55 = vrot.slane %v5234_v60, 4  ;;  %v904_v4 = vrot.slane %v5233_v44, 4  ;;  %1500 = vmatprep.subr.bf16.mxu1 %v4937_v56  ;;  %vm8015_vm3 = vmmov %vm8008_vm5 }
 0x15c   : > { %v6551_v32 = vpop.permute.xlu0 %660  ;;  %v1068_v29 = vsel %vm8013_vm11, %v5229_v41, %v1067_v63  ;;  %v4936_v17 = vcombine.low %v1192_v46, %v1200_v33  ;;  %v6558_v15 = vpop.permute.xlu1 %5236  ;;  %vm8014_vm10 = vcmask 252928   ;;  %v7870_v14 = vrot.slane %v6450_v40, 4  ;;  %vm8016_vm7 = vmmov %vm8015_vm3 }
 0x15d   : > { %1463 = vmatprep.subr.bf16.mxu0 %v4919_v11  ;;  %v7869_v22 = vunpack.i.h.bf16 %v6558_v15  ;;  %v5238_v53 = vunpack.i.l.bf16 %v6558_v15  ;;  %4939 = vmatmul.mubr.msk.bf16.vlgmr.msra.gmra.mxu1 %vm1363_vm14, %v6483_v6  ;;  %v911_v56 = vsel %vm8014_vm10, %v6329_v20, %v909_v47  ;;  %v918_v36 = vsel %vm8015_vm3, %v904_v4, %v905_v55  ;;  %vm8017_vm5 = vmmov %vm8013_vm11 }
 0x15e   : > { %1464 = vmatpush1.bf16.msra.mxu0 %v4918_v30  ;;  %v684_v41 = vsel %vm8016_vm7, %v674_v31, %v675_v37  ;;  %v1060_v33 = vsel %vm8017_vm5, %v1029_v25, %v1059_v24  ;;  %1501 = vmatpush1.bf16.msra.mxu1 %v4936_v17  ;;  %vm8018_vm11 = vmmov %vm8014_vm10  ;;  %v902_v11 = vrot.slane %v6503_v1, 4  ;;  %v5249_v4 = vunpack.i.h.bf16 %v6532_v16 }
 0x15f   : > { %v919_v46 = vsel %vm8018_vm11, %v5233_v44, %v918_v36  ;;  %1522 = vmatprep.mubr.bf16.mxu1 %v6366_v39  ;;  %vm8019_vm9 = vmmov %vm8015_vm3  ;;  %v680_v20 = vrot.slane %v7869_v22, 4  ;;  %v679_v47 = vrot.slane %v5238_v53, 4  ;;  %1502 = vmatprep.subr.bf16.mxu1 %v4929_v57  ;;  %v7871_v25 = vunpack.i.l.bf16 %v6532_v16 }
 0x160   : > { %v912_v63 = vsel %vm8019_vm9, %v900_v51, %v901_v2  ;;  %v6577_v34 = vpop.permute.xlu0 %2073  ;;  %v4958_v30 = vcombine.low %v911_v56, %v919_v46  ;;  %v6582_v24 = vpop.permute.xlu1 %5241  ;;  %v4959_v44 = vcombine.high %v911_v56, %v919_v46  ;;  %v4921_v51 = vcombine.high %v1060_v33, %v1068_v29  ;;  %vm8020_vm9 = vmmov %vm8015_vm3 }
 0x161   : > { %4940 = vmatmul.mubr.msk.bf16.vlgmr.msra.gmra.mxu0 %vm1363_vm14, %v6483_v6  ;;  %v7872_v31 = vunpack.i.h.bf16 %v6582_v24  ;;  %v5243_v17 = vunpack.i.l.bf16 %v6582_v24  ;;  %v693_v57 = vsel %vm8020_vm9, %v679_v47, %v680_v20  ;;  %v678_v36 = vrot.slane %v6315_v7, 4  ;;  %vm8021_vm10 = vmmov %vm8015_vm3 }
 0x162   : > { %1686 = vmatprep.mubr.bf16.mxu0 %v6366_v39  ;;  %v683_v22 = vrot.slane %v6317_v43, 4  ;;  %v6597_v56 = vsel %vm8021_vm10, %v1974_v5, %v7870_v14  ;;  %1664 = vmatprep.subr.bf16.mxu0 %v4959_v44  ;;  %vm8022_vm3 = vcmask 269312   ;;  %vm8024_vm5 = vmmov %vm8018_vm11  ;;  %v4920_v44 = vcombine.low %v1060_v33, %v1068_v29 }
 0x163   : > { %1503 = vmatpush1.bf16.msra.mxu1 %v4928_v26  ;;  %v686_v46 = vsel %vm8022_vm3, %v6339_v42, %v684_v41  ;;  %v907_v7 = vrot.slane %v7872_v31, 4  ;;  %v906_v47 = vrot.slane %v5243_v17, 4  ;;  %1665 = vmatpush1.bf16.msra.mxu0 %v4958_v30  ;;  %vm8023_vm7 = vmmov %vm8022_vm3  ;;  %v913_v5 = vsel %vm8024_vm5, %v6416_v48, %v912_v63 }
 0x164   : > { %1504 = vmatprep.subr.bf16.mxu1 %v4921_v51  ;;  %v6606_v43 = vpop.permute.xlu0 %5251  ;;  %v694_v45 = vsel %vm8023_vm7, %v5238_v53, %v693_v57  ;;  %vm8025_vm11 = vmmov %vm8020_vm9  ;;  %v682_v26 = vrot.slane %v5249_v4, 4  ;;  %v681_v42 = vrot.slane %v7871_v25, 4  ;;  %v8026_v41 = vcombine.high %v6374_v52, %v6380_v54  ;;  %v659_v30 = vpop.permute.xlu1 %658 }
 0x165   : > { %v914_v13 = vsel %vm8025_vm11, %v901_v2, %v902_v11  ;;  %v677_v51 = vrot.slane %v6551_v32, 4  ;;  %v676_v53 = vrot.slane %v659_v30, 4  ;;  %v920_v57 = vsel %vm8020_vm9, %v905_v55, %v906_v47  ;;  %vm8027_vm10 = vmmov %vm8020_vm9 }
 0x166   : > { %1666 = vmatprep.subr.bf16.mxu0 %v8026_v41  ;;  %v922_v48 = vsel %vm8027_vm10, %v906_v47, %v907_v7  ;;  %v5254_v2 = vunpack.i.h.bf16 %v6606_v43  ;;  %v5253_v29 = vunpack.i.l.bf16 %v6606_v43  ;;  %v4943_v33 = vcombine.high %v686_v46, %v694_v45  ;;  %vm8028_vm3 = vmmov %vm8024_vm5 }
 0x167   : > { %1505 = vmatpush1.bf16.msra.mxu1 %v4920_v44  ;;  %v921_v63 = vsel %vm8028_vm3, %v5234_v60, %v920_v57  ;;  %vm8029_vm7 = vmmov %vm8020_vm9  ;;  %v8030_v14 = vcombine.low %v6374_v52, %v6380_v54  ;;  %v8032_v44 = vrot.slane %v6311_v12, 4  ;;  %v915_v52 = vsel %vm8028_vm3, %v6476_v59, %v914_v13 }
 0x168   : > { %v687_v41 = vsel %vm8029_vm7, %v675_v37, %v676_v53  ;;  %v6633_v55 = vpop.permute.xlu0 %1874  ;;  %v4960_v47 = vcombine.low %v913_v5, %v921_v63  ;;  %v4961_v25 = vcombine.high %v913_v5, %v921_v63  ;;  %vm8031_vm5 = vmmov %vm8028_vm3  ;;  %v6641_v37 = vpop.permute.xlu1 %5256  ;;  %v4942_v54 = vcombine.low %v686_v46, %v694_v45 }
 0x169   : > { %1667 = vmatpush1.bf16.msra.mxu0 %v8030_v14  ;;  %v923_v31 = vsel %vm8031_vm5, %v5243_v17, %v922_v48  ;;  %vm8033_vm11 = vmmov %vm8029_vm7  ;;  %v5259_v14 = vunpack.i.h.bf16 %v6641_v37  ;;  %v5258_v5 = vunpack.i.l.bf16 %v6641_v37  ;;  %v695_v12 = vsel %vm8029_vm7, %v680_v20, %v681_v42 }
 0x16a   : > { %v916_v3 = vsel %vm8033_vm11, %v902_v11, %v8032_v44  ;;  %vm8034_vm9 = vmmov %vm8029_vm7  ;;  %1668 = vmatprep.subr.bf16.mxu0 %v4943_v33  ;;  %4941 = vmatmul.mubr.msk.bf16.vlgmr.msra.gmra.mxu1 %vm1363_vm14, %v6483_v6  ;;  %v4963_v11 = vcombine.high %v915_v52, %v923_v31  ;;  %vm8037_vm11 = vcmask 269312   ;;  %v2092_v59 = vrot.slane %v6577_v34, 4 }
 0x16b   : > { %v699_v60 = vsel %vm8034_vm9, %v682_v26, %v683_v22  ;;  %vm8035_vm10 = vmmov %vm8029_vm7  ;;  %1705 = vmatprep.subr.bf16.mxu1 %v4961_v25  ;;  %v688_v17 = vsel %vm8037_vm11, %v6446_v50, %v687_v41  ;;  %1727 = vmatprep.mubr.bf16.mxu1 %v6366_v39  ;;  %vm1985_vm9 = vcmask 785408   ;;  %v6657_v45 = vrot.slane %v5254_v2, 4  ;;  %v6669_v50 = vld [vmem:[%s7996_s2] sm:$0xf] }
 0x16c   : > { %v697_v57 = vsel %vm8035_vm10, %v681_v42, %v682_v26  ;;  %vm8036_vm5 = vmmov %vm8029_vm7  ;;  %1706 = vmatpush1.bf16.msra.mxu1 %v4960_v47  ;;  %v1979_v6 = vrot.slane %v5253_v29, 4  ;;  %v8038_v20 = vcombine.high %v6385_v27, %v6388_v61  ;;  %v6664_v25 = vpop.permute.xlu0 %2075  ;;  %v6677_v26 = vrot.slane %v5259_v14, 4  ;;  %v6679_v48 = vpop.permute.xlu1 %1872 }
 0x16d   : > { %v691_v22 = vsel %vm8036_vm5, %v677_v51, %v678_v36  ;;  %1669 = vmatpush1.bf16.msra.mxu0 %v4942_v54  ;;  %v8039_v36 = vrot.slane %v6309_v35, 4  ;;  %vm8040_vm10 = vmmov %vm8036_vm5  ;;  %v2096_v42 = vrot.slane %v5258_v5, 4  ;;  %v8042_v33 = vunpack.i.h.bf16 %v6558_v15 }
 0x16e   : > { %1707 = vmatprep.subr.bf16.mxu1 %v8038_v20  ;;  %vm8041_vm3 = vmmov %vm8036_vm5  ;;  %1746 = vmatprep.subr.bf16.mxu0 %v4963_v11  ;;  %vm8044_vm5 = vcmask 252928   ;;  %v4962_v35 = vcombine.low %v915_v52, %v923_v31  ;;  %v2093_v11 = vrot.slane %v6664_v25, 4  ;;  %v1892_v20 = vrot.slane %v6679_v48, 4 }
 0x16f   : > { %v924_v46 = vsel %vm8040_vm10, %v907_v7, %v8039_v36  ;;  %v689_v13 = vsel %vm8041_vm3, %v676_v53, %v677_v51  ;;  %vm8043_vm7 = vmmov %vm8037_vm11  ;;  %v917_v41 = vsel %vm8044_vm5, %v6503_v1, %v916_v3  ;;  %v6689_v7 = vsel %vm1985_vm9, %v6267_v49, %v6597_v56 }
 0x170   : > { %v696_v63 = vsel %vm8043_vm7, %v8042_v33, %v695_v12  ;;  %v2091_v51 = vrot.slane %v6349_v62, 4  ;;  %vm8045_vm11 = vmmov %vm8043_vm7  ;;  %4966 = vmatmul.mubr.msk.bf16.vlgmr.msra.gmra.mxu0 %vm1363_vm14, %v6669_v50  ;;  %v8047_v1 = vcombine.low %v6385_v27, %v6388_v61  ;;  %v8048_v49 = vunpack.i.h.bf16 %v6582_v24 }
 0x171   : > { %v4945_v47 = vcombine.high %v688_v17, %v696_v63  ;;  %v6694_v53 = vsel %vm8045_vm11, %v6551_v32, %v691_v22  ;;  %vm8046_vm10 = vmmov %vm8043_vm7  ;;  %v690_v56 = vsel %vm8043_vm7, %v659_v30, %v689_v13  ;;  %v8050_v32 = vunpack.i.l.bf16 %v6532_v16  ;;  %1747 = vmatpush1.bf16.msra.mxu0 %v4962_v35  ;;  %v6723_v30 = vpop.permute.xlu1 %5261  ;;  %1768 = vmatprep.mubr.bf16.mxu0 %v6366_v39 }
 0x172   : > { %v6699_v15 = vsel %vm8046_vm10, %v5249_v4, %v699_v60  ;;  %1708 = vmatpush1.bf16.msra.mxu1 %v8047_v1  ;;  %vm8049_vm3 = vmmov %vm8044_vm5  ;;  %v6713_v4 = vpop.permute.xlu0 %1958  ;;  %vm8052_vm11 = vcmask 1043456   ;;  %v4944_v61 = vcombine.low %v688_v17, %v696_v63  ;;  %v8054_v24 = vcombine.high %v6412_v23, %v6422_v58 }
 0x173   : > { %v925_v31 = vsel %vm8049_vm3, %v8048_v49, %v924_v46  ;;  %vm8051_vm5 = vmmov %vm8043_vm7  ;;  %1709 = vmatprep.subr.bf16.mxu1 %v4945_v47  ;;  %v1993_v3 = vsel %vm8052_vm11, %v1979_v6, %v6657_v45  ;;  %v4948_v60 = vcombine.low %v6694_v53, %v6699_v15  ;;  %v5263_v52 = vunpack.i.l.bf16 %v6723_v30 }
 0x174   : > { %v698_v44 = vsel %vm8051_vm5, %v8050_v32, %v697_v57  ;;  %vm8053_vm10 = vmmov %vm8052_vm11  ;;  %1748 = vmatprep.subr.bf16.mxu0 %v8054_v24  ;;  %v5264_v57 = vunpack.i.h.bf16 %v6723_v30  ;;  %v4965_v54 = vcombine.high %v917_v41, %v925_v31  ;;  %v4949_v12 = vcombine.high %v6694_v53, %v6699_v15 }
 0x175   : > { %v2101_v27 = vsel %vm8053_vm10, %v2091_v51, %v2092_v59  ;;  %vm8055_vm3 = vmmov %vm8053_vm10  ;;  %v4947_v22 = vcombine.high %v690_v56, %v698_v44  ;;  %v6738_v17 = vsel %vm1985_vm9, %v5253_v29, %v1993_v3  ;;  %v1893_v6 = vrot.slane %v6633_v55, 4  ;;  %v6755_v47 = vpop.permute.xlu1 %5266 }
 0x176   : > { %v2109_v16 = vsel %vm8055_vm3, %v2096_v42, %v6677_v26  ;;  %1710 = vmatpush1.bf16.msra.mxu1 %v4944_v61  ;;  %v8056_v36 = vcombine.low %v6412_v23, %v6422_v58  ;;  %v6745_v46 = vpop.permute.xlu0 %2077  ;;  %vm8057_vm7 = vcmask 777216   ;;  %v6752_v29 = vrot.slane %v5264_v57, 4  ;;  %vm8059_vm11 = vmmov %vm8055_vm3 }
 0x177   : > { %1787 = vmatprep.subr.bf16.mxu1 %v4965_v54  ;;  %v2102_v13 = vsel %vm8057_vm7, %v6349_v62, %v2101_v27  ;;  %vm8058_vm5 = vmmov %vm8057_vm7  ;;  %v1897_v33 = vrot.slane %v5263_v52, 4  ;;  %v1976_v63 = vrot.slane %v6713_v4, 4  ;;  %v4964_v35 = vcombine.low %v917_v41, %v925_v31 }
 0x178   : > { %1749 = vmatpush1.bf16.msra.mxu0 %v8056_v36  ;;  %v2110_v42 = vsel %vm8058_vm5, %v5258_v5, %v2109_v16  ;;  %v4946_v23 = vcombine.low %v690_v56, %v698_v44  ;;  %v5269_v58 = vunpack.i.h.bf16 %v6755_v47  ;;  %v5268_v51 = vunpack.i.l.bf16 %v6755_v47  ;;  %vm8060_vm10 = vmmov %vm8055_vm3 }
 0x179   : > { %1750 = vmatprep.subr.bf16.mxu0 %v4947_v22  ;;  %4967 = vmatmul.mubr.msk.bf16.vlgmr.msra.gmra.mxu1 %vm1363_vm14, %v6669_v50  ;;  %v4979_v62 = vcombine.low %v6689_v7, %v6738_v17  ;;  %v2103_v5 = vsel %vm8059_vm11, %v2092_v59, %v2093_v11  ;;  %v4988_v1 = vcombine.high %v2102_v13, %v2110_v42  ;;  %v2094_v27 = vrot.slane %v6745_v46, 4  ;;  %v6787_v61 = vpop.permute.xlu1 %5271  ;;  %vm8063_vm7 = vmmov %vm8055_vm3 }
 0x17a   : > { %1788 = vmatpush1.bf16.msra.mxu1 %v4964_v35  ;;  %v4980_v41 = vcombine.high %v6689_v7, %v6738_v17  ;;  %1809 = vmatprep.mubr.bf16.mxu1 %v6366_v39  ;;  %v1902_v49 = vsel %vm8060_vm10, %v1892_v20, %v1893_v6  ;;  %v6774_v31 = vrot.slane %v5269_v58, 4  ;;  %v2098_v56 = vrot.slane %v5268_v51, 4  ;;  %v6779_v44 = vpop.permute.xlu0 %5276  ;;  %vm8064_vm5 = vmmov %vm8055_vm3 }
 0x17b   : > { %v8061_v59 = vcombine.high %v6456_v21, %v6461_v18  ;;  %v4987_v32 = vcombine.low %v2102_v13, %v2110_v42  ;;  %v8062_v7 = vrot.slane %v6450_v40, 4  ;;  %v5278_v24 = vunpack.i.l.bf16 %v6779_v44  ;;  %vm8065_vm11 = vmmov %vm8055_vm3 }
 0x17c   : > { %1751 = vmatpush1.bf16.msra.mxu0 %v4946_v23  ;;  %v1910_v16 = vsel %vm8063_vm7, %v1897_v33, %v6752_v29  ;;  %v5274_v54 = vunpack.i.h.bf16 %v6787_v61  ;;  %v5273_v22 = vunpack.i.l.bf16 %v6787_v61  ;;  %v2111_v17 = vsel %vm8064_vm5, %v6677_v26, %v2098_v56 }
 0x17d   : > { %1789 = vmatprep.subr.bf16.mxu1 %v8061_v59  ;;  %v1987_v3 = vsel %vm8055_vm3, %v8062_v7, %v1976_v63  ;;  %2292 = vmatprep.subr.bf16.mxu0 %v4988_v1  ;;  %v2113_v20 = vsel %vm8065_vm11, %v2098_v56, %v6774_v31  ;;  %vm8066_vm10 = vcmask 793600   ;;  %v8067_v13 = vcombine.low %v6456_v21, %v6461_v18 }
 0x17e   : > { %v1903_v36 = vsel %vm8066_vm10, %v6679_v48, %v1902_v49  ;;  %vm8068_vm3 = vcmask 777216   ;;  %v1981_v33 = vrot.slane %v5273_v22, 4  ;;  %v5279_v35 = vunpack.i.h.bf16 %v6779_v44  ;;  %v6815_v23 = vpop.permute.xlu0 %1878  ;;  %vm8070_vm5 = vmmov %vm8066_vm10 }
 0x17f   : > { %4968 = vmatmul.mubr.msk.bf16.vlgmr.msra.gmra.mxu0 %vm1363_vm14, %v6669_v50  ;;  %1790 = vmatpush1.bf16.msra.mxu1 %v8067_v13  ;;  %v2104_v42 = vsel %vm8068_vm3, %v6577_v34, %v2103_v5  ;;  %vm8069_vm7 = vmmov %vm8068_vm3  ;;  %v1899_v48 = vrot.slane %v5278_v24, 4  ;;  %v1911_v18 = vsel %vm8070_vm5, %v5263_v52, %v1910_v16  ;;  %v2105_v21 = vsel %vm8065_vm11, %v2093_v11, %v2094_v27  ;;  %v1877_v34 = vpop.permute.xlu1 %1876 }
 0x180   : > { %v2112_v26 = vsel %vm8069_vm7, %v5259_v14, %v2111_v17  ;;  %2293 = vmatpush1.bf16.msra.mxu0 %v4987_v32  ;;  %1791 = vmatprep.subr.bf16.mxu1 %v4949_v12  ;;  %v1988_v37 = vsel %vm1985_vm9, %v6450_v40, %v1987_v3  ;;  %vm8071_vm10 = vmmov %vm8068_vm3  ;;  %v1982_v12 = vrot.slane %v5274_v54, 4  ;;  %v1894_v5 = vrot.slane %v1877_v34, 4 }
 0x181   : > { %2294 = vmatprep.subr.bf16.mxu0 %v4980_v41  ;;  %v2114_v14 = vsel %vm8071_vm10, %v5268_v51, %v2113_v20  ;;  %2314 = vmatprep.mubr.bf16.mxu0 %v6366_v39  ;;  %v4990_v1 = vcombine.high %v2104_v42, %v2112_v26  ;;  %vm8072_vm3 = vmmov %vm8065_vm11  ;;  %v1895_v49 = vrot.slane %v6815_v23, 4  ;;  %v4971_v11 = vcombine.low %v1903_v36, %v1911_v18  ;;  %v6865_v20 = vld [vmem:[%s7996_s2 + $0x8] sm:$0xf] }
 0x182   : > { %v1995_v52 = vsel %vm8072_vm3, %v6657_v45, %v1981_v33  ;;  %v4972_v40 = vcombine.high %v1903_v36, %v1911_v18  ;;  %v6838_v41 = vrot.slane %v5279_v35, 4  ;;  %vm8073_vm7 = vmmov %vm8072_vm3  ;;  %v5287_v56 = vpop.permute.xlu0 %5286  ;;  %v4989_v43 = vcombine.low %v2104_v42, %v2112_v26 }
 0x183   : > { %1792 = vmatpush1.bf16.msra.mxu1 %v4948_v60  ;;  %v1996_v51 = vsel %vm1985_vm9, %v5254_v2, %v1995_v52  ;;  %v1904_v45 = vsel %vm8073_vm7, %v1893_v6, %v1894_v5  ;;  %vm8074_vm5 = vmmov %vm8071_vm10  ;;  %v1961_v2 = vpop.permute.xlu1 %1960  ;;  %v5289_v60 = vunpack.i.h.bf16 %v5287_v56  ;;  %v5288_v59 = vunpack.i.l.bf16 %v5287_v56 }
 0x184   : > { %2295 = vmatpush1.bf16.msra.mxu0 %v4979_v62  ;;  %2333 = vmatprep.subr.bf16.mxu1 %v4990_v1  ;;  %v2106_v53 = vsel %vm8074_vm5, %v6664_v25, %v2105_v21  ;;  %vm8075_vm11 = vmmov %vm8072_vm3  ;;  %v1977_v7 = vrot.slane %v1961_v2, 4  ;;  %v4982_v6 = vcombine.high %v1988_v37, %v1996_v51  ;;  %vm8076_vm10 = vcmask 793600  }
 0x185   : > { %v1912_v15 = vsel %vm8075_vm11, %v6752_v29, %v1899_v48  ;;  %2296 = vmatprep.subr.bf16.mxu0 %v4972_v40  ;;  %v4991_v32 = vcombine.low %v2106_v53, %v2114_v14  ;;  %v1905_v62 = vsel %vm8076_vm10, %v6633_v55, %v1904_v45  ;;  %v1997_v25 = vsel %vm8072_vm3, %v1981_v33, %v1982_v12  ;;  %vm8077_vm7 = vmmov %vm8072_vm3  ;;  %v2509_v45 = vld [vmem:[%s6884_s29 + $0x20] sm:$0x11] }
 0x186   : > { %4969 = vmatmul.mubr.msk.bf16.vlgmr.msra.gmra.mxu1 %vm1363_vm14, %v6669_v50  ;;  %v1906_v29 = vsel %vm8077_vm7, %v1894_v5, %v1895_v49  ;;  %v4992_v3 = vcombine.high %v2106_v53, %v2114_v14  ;;  %vm8078_vm5 = vmmov %vm8076_vm10  ;;  %v1983_v17 = vrot.slane %v5289_v60, 4  ;;  %v1978_v55 = vrot.slane %v5288_v59, 4 }
 0x187   : > { %2334 = vmatpush1.bf16.msra.mxu1 %v4989_v43  ;;  %v1913_v16 = vsel %vm8078_vm5, %v5264_v57, %v1912_v15  ;;  %2355 = vmatprep.mubr.bf16.mxu1 %v6366_v39  ;;  %vm8079_vm11 = vmmov %vm8072_vm3  ;;  %v4981_v57 = vcombine.low %v1988_v37, %v1996_v51  ;;  %v5282_v36 = vpop.permute.xlu1 %5281  ;;  %v1998_v42 = vsel %vm1985_vm9, %v5273_v22, %v1997_v25  ;;  %v2505_v51 = vld [vmem:[%s6884_s29] sm:$0xff]  ;;  %v2506_v25 = vld [vmem:[%s6884_s29 + $0x8] sm:$0xff] }
 0x188   : > { %v1989_v50 = vsel %vm8079_vm11, %v1976_v63, %v1977_v7  ;;  %2297 = vmatpush1.bf16.msra.mxu0 %v4971_v11  ;;  %2335 = vmatprep.subr.bf16.mxu1 %v4982_v6  ;;  %vm8080_vm10 = vmmov %vm8072_vm3  ;;  %v4974_v13 = vcombine.high %v1905_v62, %v1913_v16  ;;  %v5284_v26 = vunpack.i.h.bf16 %v5282_v36  ;;  %v5283_v33 = vunpack.i.l.bf16 %v5282_v36 }
 0x189   : > { %v1914_v30 = vsel %vm8080_vm10, %v1899_v48, %v6838_v41  ;;  %2374 = vmatprep.subr.bf16.mxu0 %v4992_v3  ;;  %v1990_v63 = vsel %vm1985_vm9, %v6713_v4, %v1989_v50  ;;  %vm8081_vm3 = vmmov %vm8078_vm5  ;;  %v4973_v14 = vcombine.low %v1905_v62, %v1913_v16 }
 0x18a   : > { %v4984_v18 = vcombine.high %v1990_v63, %v1998_v42  ;;  %v1907_v21 = vsel %vm8081_vm3, %v1877_v34, %v1906_v29  ;;  %vm8082_vm7 = vmmov %vm8081_vm3  ;;  %v2100_v34 = vrot.slane %v5284_v26, 4  ;;  %v2095_v37 = vrot.slane %v5283_v33, 4  ;;  %v2510_v29 = vld [vmem:[%s6884_s29 + $0x28] sm:$0x11] }
 0x18b   : > { %4995 = vmatmul.mubr.msk.bf16.vlgmr.msra.gmra.mxu0 %vm1363_vm14, %v6865_v20  ;;  %2336 = vmatpush1.bf16.msra.mxu1 %v4981_v57  ;;  %v1915_v48 = vsel %vm8082_vm7, %v5278_v24, %v1914_v30  ;;  %vm8084_vm5 = vmmov %vm8080_vm10  ;;  %v4983_v5 = vcombine.low %v1990_v63, %v1998_v42  ;;  %v5292_v1 = vpop.permute.xlu1 %5291  ;;  %vm8088_vm7 = vcmask 777216   ;;  %v5006_v44 = vcombine.high %v2506_v25, %v2510_v29  ;;  %v2504_v30 = vld [vmem:[%s7801_s4] sm:$0xf] }
 0x18c   : > { %v1999_v4 = vsel %vm8084_vm5, %v1982_v12, %v1983_v17  ;;  %vm8085_vm11 = vmmov %vm8084_vm5  ;;  %2375 = vmatpush1.bf16.msra.mxu0 %v4991_v32  ;;  %2337 = vmatprep.subr.bf16.mxu1 %v4974_v13  ;;  %v4976_v24 = vcombine.high %v1907_v21, %v1915_v48  ;;  %v5294_v11 = vunpack.i.h.bf16 %v5292_v1  ;;  %v5293_v40 = vunpack.i.l.bf16 %v5292_v1  ;;  %v2508_v17 = vld [vmem:[%s6884_s29 + $0x18] sm:$0xff] }
 0x18d   : > { %v1991_v22 = vsel %vm8085_vm11, %v1977_v7, %v1978_v55  ;;  %2376 = vmatprep.subr.bf16.mxu0 %v4984_v18  ;;  %2396 = vmatprep.mubr.bf16.mxu0 %v6366_v39  ;;  %vm8086_vm10 = vmmov %vm8084_vm5  ;;  %v4975_v32 = vcombine.low %v1907_v21, %v1915_v48  ;;  %v5003_v7 = vcombine.low %v2505_v51, %v2509_v45  ;;  %v2512_v55 = vld [vmem:[%s6884_s29 + $0x38] sm:$0x11] }
 0x18e   : > { %v2107_v52 = vsel %vm8086_vm10, %v2094_v27, %v2095_v37  ;;  %vm8087_vm3 = vmmov %vm8084_vm5  ;;  %v1992_v15 = vsel %vm1985_vm9, %v1961_v2, %v1991_v22  ;;  %v2000_v27 = vsel %vm1985_vm9, %v5274_v54, %v1999_v4  ;;  %v1896_v43 = vrot.slane %v5293_v40, 4  ;;  %v2507_v54 = vld [vmem:[%s6884_s29 + $0x10] sm:$0xff] }
 0x18f   : > { %v2115_v12 = vsel %vm8087_vm3, %v6774_v31, %v2100_v34  ;;  %2338 = vmatpush1.bf16.msra.mxu1 %v4973_v14  ;;  %v2108_v56 = vsel %vm8088_vm7, %v6745_v46, %v2107_v52  ;;  %vm8089_vm5 = vmmov %vm8088_vm7  ;;  %v1901_v31 = vrot.slane %v5294_v11, 4  ;;  %v5004_v46 = vcombine.high %v2505_v51, %v2509_v45  ;;  %v2511_v2 = vld [vmem:[%s6884_s29 + $0x30] sm:$0x11]  ;;  %s7881_s29 = sshll.u32 %s6950_s28, 5 }
 0x190   : > { %v2116_v53 = vsel %vm8089_vm5, %v5269_v58, %v2115_v12  ;;  %2377 = vmatpush1.bf16.msra.mxu0 %v4983_v5  ;;  %vm8090_vm11 = vmmov %vm8087_vm3  ;;  %v4986_v61 = vcombine.high %v1992_v15, %v2000_v27  ;;  %vm8092_vm7 = vcmask 793600   ;;  %v5008_v3 = vcombine.high %v2507_v54, %v2511_v2  ;;  %s6955_s12 = scalar_lea.vmem [#allocation7], %s7881_s29 }
 0x191   : > { %v4993_v60 = vcombine.low %v2108_v56, %v2116_v53  ;;  %v4994_v59 = vcombine.high %v2108_v56, %v2116_v53  ;;  %2378 = vmatprep.subr.bf16.mxu0 %v4976_v24  ;;  %v1908_v47 = vsel %vm8090_vm11, %v1895_v49, %v1896_v43  ;;  %vm8091_vm10 = vmmov %vm8087_vm3  ;;  %vm2549_vm3 = vcmask 1044480   ;;  %s4796_s25 = sshll.u32 %s6955_s12, 4  ;;  %s4797_s25 = int_to_ptr.vmem [resolvable:$true] %s4796_s25 }
 0x192   : > { %v1916_v58 = vsel %vm8091_vm10, %v6838_v41, %v1901_v31  ;;  %4996 = vmatmul.mubr.msk.bf16.vlgmr.msra.gmra.mxu1 %vm1363_vm14, %v6865_v20  ;;  %v1909_v6 = vsel %vm8092_vm7, %v6815_v23, %v1908_v47  ;;  %vm8093_vm5 = vmmov %vm8092_vm7  ;;  %v4985_v41 = vcombine.low %v1992_v15, %v2000_v27  ;;  %v2551_v62 = vsel %vm2549_vm3, %v5003_v7, 0 }
 0x193   : > { %2415 = vmatprep.subr.bf16.mxu1 %v4994_v59  ;;  %v1917_v49 = vsel %vm8093_vm5, %v5279_v35, %v1916_v58  ;;  %2437 = vmatprep.mubr.bf16.mxu1 %v6366_v39  ;;  %v5005_v35 = vcombine.low %v2506_v25, %v2510_v29  ;;  %v5007_v50 = vcombine.low %v2507_v54, %v2511_v2  ;;  %vm2545_vm11 = vcmask 80896  }
 0x194   : > { %2416 = vmatpush1.bf16.msra.mxu1 %v4993_v60  ;;  %2379 = vmatpush1.bf16.msra.mxu0 %v4975_v32  ;;  %v4978_v16 = vcombine.high %v1909_v6, %v1917_v49  ;;  %v4977_v23 = vcombine.low %v1909_v6, %v1917_v49  ;;  %v5010_v13 = vcombine.high %v2508_v17, %v2512_v55  ;;  %v2458_v49 = vpop.permute.xlu0 %2457 }
 0x195   : > { %2417 = vmatprep.subr.bf16.mxu1 %v4986_v61  ;;  %5011 = vmatprep.subr.msk.bf16.mxu0 %vm2549_vm3, %v5004_v46  ;;  %v2557_v57 = vsel %vm2549_vm3, %v5005_v35, 0  ;;  %v2563_v36 = vsel %vm2549_vm3, %v5007_v50, 0  ;;  %v5009_v63 = vcombine.low %v2508_v17, %v2512_v55 }
 0x197   : > { %4997 = vmatmul.mubr.msk.bf16.vlgmr.msra.gmra.mxu0 %vm1363_vm14, %v6865_v20  ;;  %v2569_v42 = vsel %vm2549_vm3, %v5009_v63, 0 }
 0x198   : > { %2418 = vmatpush1.bf16.msra.mxu1 %v4985_v41  ;;  %2589 = vmatpush1.bf16.msra.mxu0 %v2551_v62 }
 0x199   : > { %2419 = vmatprep.subr.bf16.mxu1 %v4978_v16  ;;  %2606 = vmatprep.mubr.bf16.mxu0 %v6366_v39 }
 0x19a   : > { %5015 = vmatprep.subr.msk.bf16.mxu0 %vm2549_vm3, %v5008_v3 }
 0x19c   : > { %2420 = vmatpush1.bf16.msra.mxu1 %v4977_v23 }
 0x19d   : > { %5013 = vmatprep.subr.msk.bf16.mxu1 %vm2549_vm3, %v5006_v44 }
 0x19f   : > { %4998 = vmatmul.mubr.msk.bf16.vlgmr.msra.gmra.mxu1 %vm1363_vm14, %v6865_v20  ;;  %5012 = vmatmul.mubr.msk.bf16.vlgmr.msra.gmra.mxu0 %vm2545_vm11, %v2504_v30 }
 0x1a0   : > { %2630 = vmatpush1.bf16.msra.mxu1 %v2557_v57  ;;  %2671 = vmatpush1.bf16.msra.mxu0 %v2563_v36 }
 0x1a1   : > { %2647 = vmatprep.mubr.bf16.mxu1 %v6366_v39  ;;  %2688 = vmatprep.mubr.bf16.mxu0 %v6366_v39 }
 0x1a2   : > { %5017 = vmatprep.subr.msk.bf16.mxu1 %vm2549_vm3, %v5010_v13 }
 0x1a7   : > { %5014 = vmatmul.mubr.msk.bf16.vlgmr.msra.gmra.mxu1 %vm2545_vm11, %v2504_v30  ;;  %5016 = vmatmul.mubr.msk.bf16.vlgmr.msra.gmra.mxu0 %vm2545_vm11, %v2504_v30 }
 0x1a8   : > { %2712 = vmatpush1.bf16.msra.mxu1 %v2569_v42  ;;  %2729 = vmatprep.mubr.bf16.mxu1 %v6366_v39 }
 0x1a9   : > { %3500 = vmatprep.mubr.bf16.mxu0 %v6366_v39 }
 0x1af   : > { %5018 = vmatmul.mubr.msk.bf16.vlgmr.msra.gmra.mxu1 %vm2545_vm11, %v2504_v30 }
 0x1b0   : > { %3541 = vmatprep.mubr.bf16.mxu1 %v6366_v39 }
 0x213   : > { %v1401_v20 = vpop.f32.mrf.mxu0 }
 0x215   : > { %v1403_v26 = vpop.f32.mrf.mxu0 }
 0x217   : > { %v1405_v33 = vpop.f32.mrf.mxu0 }
 0x219   : > { %v1406_v18 = vpop.f32.mrf.mxu0 }
 0x21d   : > { %v1442_v21 = vpop.f32.mrf.mxu1 }
 0x21f   : > { %v1444_v48 = vpop.f32.mrf.mxu1 }
 0x221   : > { %v1483_v4 = vpop.f32.mrf.mxu0  ;;  %v1446_v22 = vpop.f32.mrf.mxu1 }
 0x223   : > { %v1485_v34 = vpop.f32.mrf.mxu0  ;;  %v1447_v37 = vpop.f32.mrf.mxu1 }
 0x225   : > { %v1487_v14 = vpop.f32.mrf.mxu0 }
 0x227   : > { %v1488_v5 = vpop.f32.mrf.mxu0 }
 0x22a   : > { %v1524_v1 = vpop.f32.mrf.mxu1 }
 0x22c   : > { %v1526_v24 = vpop.f32.mrf.mxu1 }
 0x22e   : > { %v1528_v52 = vpop.f32.mrf.mxu1 }
 0x230   : > { %v1688_v12 = vpop.f32.mrf.mxu0  ;;  %v1529_v11 = vpop.f32.mrf.mxu1 }
 0x231   : > { %v1689_v46 = vadd.f32 %v1688_v12, %v1401_v20 }
 0x232   : > { %v1690_v40 = vpop.f32.mrf.mxu0 }
 0x233   : > { %v1691_v58 = vadd.f32 %v1690_v40, %v1403_v26 }
 0x234   : > { %v1692_v39 = vpop.f32.mrf.mxu0 }
 0x236   : > { %v1693_v51 = vpop.f32.mrf.mxu0 }
 0x239   : > { %v1729_v45 = vpop.f32.mrf.mxu1 }
 0x23a   : > { %v1730_v29 = vadd.f32 %v1729_v45, %v1442_v21 }
 0x23b   : > { %v1731_v56 = vpop.f32.mrf.mxu1 }
 0x23c   : > { %v1732_v35 = vadd.f32 %v1731_v56, %v1444_v48 }
 0x23d   : > { %v1733_v53 = vpop.f32.mrf.mxu1 }
 0x23f   : > { %v1770_v15 = vpop.f32.mrf.mxu0  ;;  %v1734_v27 = vpop.f32.mrf.mxu1 }
 0x240   : > { %v1771_v55 = vadd.f32 %v1770_v15, %v1483_v4 }
 0x241   : > { %v1772_v31 = vpop.f32.mrf.mxu0 }
 0x242   : > { %v1773_v63 = vadd.f32 %v1772_v31, %v1485_v34  ;;  %v6960_v34 = vpop.permute.xlu1 %2749 }
 0x243   : > { %v1774_v43 = vpop.f32.mrf.mxu0 }
 0x245   : > { %v1775_v60 = vpop.f32.mrf.mxu0 }
 0x246   : > { %v1811_v59 = vpop.f32.mrf.mxu1 }
 0x247   : > { %v1812_v37 = vadd.f32 %v1811_v59, %v1524_v1 }
 0x248   : > { %v1813_v32 = vpop.f32.mrf.mxu1 }
 0x249   : > { %v1814_v4 = vadd.f32 %v1813_v32, %v1526_v24 }
 0x24a   : > { %v1815_v7 = vpop.f32.mrf.mxu1 }
 0x24b   : > { %v2316_v47 = vpop.f32.mrf.mxu0 }
 0x24c   : > { %v2446_v61 = vadd.f32 %v2316_v47, %v1689_v46  ;;  %v1816_v54 = vpop.f32.mrf.mxu1 }
 0x24d   : > { %v2318_v2 = vpop.f32.mrf.mxu0 }
 0x24e   : > { %v2447_v6 = vadd.f32 %v2318_v2, %v1691_v58  ;;  %v2460_v62 = vadd.f32 %v2458_v49, %v2446_v61 }
 0x24f   : > { %v2320_v41 = vpop.f32.mrf.mxu0 }
 0x250   : > { %v2461_v25 = vadd.f32 %v2458_v49, %v2447_v6 }
 0x251   : > { %v2321_v3 = vpop.f32.mrf.mxu0 }
 0x252   : > { %v2357_v16 = vpop.f32.mrf.mxu1  ;;  %v5131_v44 = vpack.c.bf16 %v2461_v25, %v2460_v62 }
 0x253   : > { %v2448_v23 = vadd.f32 %v2357_v16, %v1730_v29 }
 0x254   : > { %v2359_v50 = vpop.f32.mrf.mxu1  ;;  %2500 = vst [vmem:[%s6955_s12] sm:$0xff] %v5131_v44 }
 0x255   : > { %v2449_v17 = vadd.f32 %v2359_v50, %v1732_v35  ;;  %v2462_v36 = vadd.f32 %v2458_v49, %v2448_v23 }
 0x256   : > { %v2361_v30 = vpop.f32.mrf.mxu1 }
 0x257   : > { %v2398_v57 = vpop.f32.mrf.mxu0  ;;  %v2463_v13 = vadd.f32 %v2458_v49, %v2449_v17 }
 0x258   : > { %v2450_v42 = vadd.f32 %v2398_v57, %v1771_v55  ;;  %v2362_v20 = vpop.f32.mrf.mxu1 }
 0x259   : > { %v2400_v26 = vpop.f32.mrf.mxu0  ;;  %v5132_v33 = vpack.c.bf16 %v2463_v13, %v2462_v36 }
 0x25a   : > { %v2451_v18 = vadd.f32 %v2400_v26, %v1773_v63  ;;  %v2464_v48 = vadd.f32 %v2458_v49, %v2450_v42 }
 0x25b   : > { %v2402_v21 = vpop.f32.mrf.mxu0  ;;  %2501 = vst [vmem:[%s6955_s12 + $0x8] sm:$0xff] %v5132_v33 }
 0x25c   : > { %v2465_v22 = vadd.f32 %v2458_v49, %v2451_v18 }
 0x25d   : > { %v2403_v14 = vpop.f32.mrf.mxu0 }
 0x25e   : > { %v5133_v52 = vpack.c.bf16 %v2465_v22, %v2464_v48 }
 0x25f   : > { %v2439_v5 = vpop.f32.mrf.mxu1  ;;  %v2608_v11 = vpop.f32.mrf.mxu0 }
 0x260   : > { %v2452_v12 = vadd.f32 %v2439_v5, %v1812_v37  ;;  %v2738_v40 = vadd.f32 %v2608_v11, %v2460_v62  ;;  %2502 = vst [vmem:[%s6955_s12 + $0x10] sm:$0xff] %v5133_v52 }
 0x261   : > { %v2441_v39 = vpop.f32.mrf.mxu1  ;;  %v2610_v45 = vpop.f32.mrf.mxu0 }
 0x262   : > { %v2453_v51 = vadd.f32 %v2441_v39, %v1814_v4  ;;  %v2752_v56 = vadd.f32 %v6960_v34, %v2738_v40  ;;  %v2739_v53 = vadd.f32 %v2610_v45, %v2461_v25  ;;  %v2466_v1 = vadd.f32 %v2458_v49, %v2452_v12 }
 0x263   : > { %v2443_v15 = vpop.f32.mrf.mxu1  ;;  %v2612_v27 = vpop.f32.mrf.mxu0 }
 0x264   : > { %v2467_v31 = vadd.f32 %v2458_v49, %v2453_v51  ;;  %v2760_v43 = vpack.c.bf16 %v2752_v56, %v2752_v56  ;;  %v2753_v24 = vadd.f32 %v6960_v34, %v2739_v53 }
 0x265   : > { %v2444_v60 = vpop.f32.mrf.mxu1  ;;  %v2613_v59 = vpop.f32.mrf.mxu0 }
 0x266   : > { %v5134_v32 = vpack.c.bf16 %v2467_v31, %v2466_v1  ;;  %v2776_v46 = vmul.bf16 1045249613, %v2760_v43  ;;  %v2761_v7 = vpack.c.bf16 %v2753_v24, %v2753_v24  ;;  %vm2768_vm10 = vcmp.ge.bf16.partialorder %v2760_v43, 0 }
 0x267   : > { %v2649_v47 = vpop.f32.mrf.mxu1  ;;  %v2690_v61 = vpop.f32.mrf.mxu0 }
 0x268   : > { %v2740_v58 = vadd.f32 %v2649_v47, %v2462_v36  ;;  %2503 = vst [vmem:[%s6955_s12 + $0x18] sm:$0xff] %v5134_v32  ;;  %vm2769_vm3 = vcmp.ge.bf16.partialorder %v2761_v7, 0  ;;  %v2777_v54 = vmul.bf16 1045249613, %v2761_v7  ;;  %v2742_v2 = vadd.f32 %v2690_v61, %v2464_v48  ;;  %v2837_v61 = vld [vmem:[#allocation3 + $0x48] sm:$0xf] }
 0x269   : > { %v2651_v6 = vpop.f32.mrf.mxu1  ;;  %v2692_v62 = vpop.f32.mrf.mxu0  ;;  %v6966_v25 = vsel %vm2768_vm10, %v2760_v43, %v2776_v46 }
 0x26a   : > { %v2754_v41 = vadd.f32 %v6960_v34, %v2740_v58  ;;  %v2741_v49 = vadd.f32 %v2651_v6, %v2463_v13  ;;  %v2785_v29 = vsel %vm2769_vm3, %v2761_v7, %v2777_v54  ;;  %v2756_v3 = vadd.f32 %v6960_v34, %v2742_v2  ;;  %v2929_v58 = vld [vmem:[#allocation3 + $0x48] sm:$0xf]  ;;  %v8104_v6 = vld [vmem:[#allocation21_spill] sm:$0xff] }
 0x26b   : > { %v2743_v16 = vadd.f32 %v2692_v62, %v2465_v22  ;;  %v2653_v44 = vpop.f32.mrf.mxu1  ;;  %v6970_v35 = vcombine.low %v6966_v25, %v2785_v29  ;;  %v2694_v17 = vpop.f32.mrf.mxu0  ;;  %v2847_v2 = vsel %vm5907_vm2, %v2837_v61, 0  ;;  %v8108_v29 = vld [vmem:[#allocation22_spill] sm:$0xff] }
 0x26c   : > { %v2762_v23 = vpack.c.bf16 %v2754_v41, %v2754_v41  ;;  %v2755_v50 = vadd.f32 %v6960_v34, %v2741_v49  ;;  %v2764_v55 = vpack.c.bf16 %v2756_v3, %v2756_v3  ;;  %v8106_v49 = vld [vmem:[#allocation17_spill] sm:$0xff] }
 0x26d   : > { %v2757_v30 = vadd.f32 %v6960_v34, %v2743_v16  ;;  %v2654_v57 = vpop.f32.mrf.mxu1  ;;  %2820 = vst [vmem:[#allocation3 + $0x4] sm:$0xff] %v6970_v35  ;;  %v2695_v63 = vpop.f32.mrf.mxu0  ;;  %v8110_v16 = vld [vmem:[#allocation24_spill] sm:$0xff] }
 0x26e   : > { %v2778_v36 = vmul.bf16 1045249613, %v2762_v23  ;;  %v2763_v13 = vpack.c.bf16 %v2755_v50, %v2755_v50  ;;  %vm2770_vm7 = vcmp.ge.bf16.partialorder %v2762_v23, 0  ;;  %v2780_v42 = vmul.bf16 1045249613, %v2764_v55 }
 0x26f   : > { %v2765_v20 = vpack.c.bf16 %v2757_v30, %v2757_v30  ;;  %v2731_v26 = vpop.f32.mrf.mxu1  ;;  %vm2772_vm5 = vcmp.ge.bf16.partialorder %v2764_v55, 0  ;;  %v8114_v57 = vmov 0  }
 0x270   : > { %vm2771_vm11 = vcmp.ge.bf16.partialorder %v2763_v13, 0  ;;  %v2779_v33 = vmul.bf16 1045249613, %v2763_v13  ;;  %v2744_v18 = vadd.f32 %v2731_v26, %v2466_v1  ;;  %v6975_v22 = vsel %vm2770_vm7, %v2762_v23, %v2778_v36  ;;  %v8112_v23 = vld [vmem:[#allocation30_spill] sm:$0xff] }
 0x271   : > { %vm2773_vm10 = vcmp.ge.bf16.partialorder %v2765_v20, 0  ;;  %v2781_v21 = vmul.bf16 1045249613, %v2765_v20  ;;  %v2733_v48 = vpop.f32.mrf.mxu1  ;;  %v6978_v52 = vsel %vm2772_vm5, %v2764_v55, %v2780_v42  ;;  %vm8094_vm5 = vcmp.ne.s16.totalorder %v5894_v8, 0  ;;  %v7056_v55 = vld [vmem:[#allocation2 + $0x2c] sm:$0xff] }
 0x272   : > { %v2787_v37 = vsel %vm2771_vm11, %v2763_v13, %v2779_v33  ;;  %v2758_v14 = vadd.f32 %v6960_v34, %v2744_v18  ;;  %v2745_v5 = vadd.f32 %v2733_v48, %v2467_v31  ;;  %v3237_v1 = vsel %vm8094_vm5, %v6970_v35, 0  ;;  %v8118_v18 = vld [vmem:[#allocation32_spill] sm:$0xff]  ;;  %v8120_v48 = vld [vmem:[#allocation26_spill] sm:$0xff] }
 0x273   : > { %v6981_v4 = vcombine.low %v6975_v22, %v2787_v37  ;;  %v2789_v12 = vsel %vm2773_vm10, %v2765_v20, %v2781_v21  ;;  %v2735_v11 = vpop.f32.mrf.mxu1  ;;  %vm8095_vm11 = vcmp.ne.s16.totalorder %v5938_v28, 0  ;;  %vm8096_vm10 = vcmp.ne.s16.totalorder %v5897_v9, 0 }
 0x274   : > { %v6984_v40 = vcombine.low %v6978_v52, %v2789_v12  ;;  %v2766_v39 = vpack.c.bf16 %v2758_v14, %v2758_v14  ;;  %v2759_v51 = vadd.f32 %v6960_v34, %v2745_v5  ;;  %v2920_v45 = vld [vmem:[#allocation3] sm:$0xff]  ;;  %v5362_v30 = vpack.i.bf16 %v7056_v55, %v7056_v55 }
 0x275   : > { %2821 = vst [vmem:[#allocation3 + $0xc] sm:$0xff] %v6981_v4  ;;  %v2736_v56 = vpop.f32.mrf.mxu1  ;;  %2940 = vrot.lane.b32.xlu1 %v2920_v45, %s5493_s26  ;;  %v3238_v8 = vsel %vm8096_vm10, %v6981_v4, 0  ;;  %vm8109_vm10 = vcmp.ne.s16.totalorder %v8108_v29, 0  ;;  %v8123_v14 = vld [vmem:[#allocation33_spill] sm:$0xff] }
 0x276   : > { %2822 = vst [vmem:[#allocation3 + $0x14] sm:$0xff] %v6984_v40  ;;  %v2782_v53 = vmul.bf16 1045249613, %v2766_v39  ;;  %v2767_v15 = vpack.c.bf16 %v2759_v51, %v2759_v51  ;;  %vm2774_vm3 = vcmp.ge.bf16.partialorder %v2766_v39, 0  ;;  %v8126_v51 = vld [vmem:[#allocation27_spill] sm:$0xff]  ;;  %v7095_v56 = vpop.permute.xlu1 %5303 }
 0x278   : > { %vm2775_vm7 = vcmp.ge.bf16.partialorder %v2767_v15, 0  ;;  %v2783_v27 = vmul.bf16 1045249613, %v2767_v15  ;;  %v6993_v31 = vsel %vm2774_vm3, %v2766_v39, %v2782_v53  ;;  %vm8097_vm3 = vcmp.ne.s16.totalorder %v5902_v10, 0  ;;  %v8101_v10 = vld [vmem:[#allocation16_spill] sm:$0xff]  ;;  %v8128_v53 = vld [vmem:[#allocation35_spill] sm:$0xff] }
 0x279   : > { %3257 = vrot.lane.b32.xlu1 %v3237_v1, %s5488_s11  ;;  %v3129_v32 = vsel %vm8097_vm3, %v2920_v45, 0  ;;  %vm8102_vm5 = vcmp.ne.s16.totalorder %v8101_v10, 0  ;;  %vm8111_vm3 = vcmp.ne.s16.totalorder %v8110_v16, 0 }
 0x27a   : > { %v2791_v34 = vsel %vm2775_vm7, %v2767_v15, %v2783_v27  ;;  %vm8098_vm7 = vcmp.ne.s16.totalorder %v5927_v19, 0  ;;  %v3239_v38 = vsel %vm8102_vm5, %v6984_v40, 0  ;;  %v4104_v44 = vsel %vm8111_vm3, %v6981_v4, 0 }
 0x27b   : > { %v6997_v43 = vcombine.low %v6993_v31, %v2791_v34  ;;  %v3012_v9 = vsel %vm8098_vm7, %v2920_v45, 0  ;;  %vm8129_vm7 = vcmp.ne.s16.totalorder %v8128_v53, 0  ;;  %v7106_v34 = vpop.permute.xlu1 %5308 }
 0x27c   : > { %v2921_v24 = vld [vmem:[#allocation3 + $0x8] sm:$0xff]  ;;  %v3936_v15 = vsel %vm8129_vm7, %v7056_v55, 0  ;;  %vm8138_vm5 = vmmov %vm8129_vm7 }
 0x27d   : > { %2823 = vst [vmem:[#allocation3 + $0x1c] sm:$0xff] %v6997_v43  ;;  %2942 = vrot.lane.b32.xlu0 %v2921_v24, %s5493_s26  ;;  %v3130_v60 = vsel %vm8095_vm11, %v2921_v24, 0  ;;  %v3013_v59 = vsel %vm855_vm4, %v2921_v24, 0  ;;  %v2839_v28 = vsel %vm630_vm15, %v2921_v24, 0  ;;  %v2922_v46 = vld [vmem:[#allocation3 + $0x10] sm:$0xff]  ;;  %vm8100_vm4 = vcmp.ne.s16.totalorder %v8099_v0, 0 }
 0x27e   : > { %3151 = vrot.lane.b32.xlu1 %v3130_v60, %s5487_s30  ;;  %v2838_v7 = vsel %vm8100_vm4, %v2920_v45, 0  ;;  %vm8105_vm15 = vcmp.ne.s16.totalorder %v8104_v6, 0  ;;  %vm8107_vm11 = vcmp.ne.s16.totalorder %v8106_v49, 0  ;;  %v3131_v3 = vsel %vm8109_vm10, %v2922_v46, 0  ;;  %v8130_v24 = vld [vmem:[#allocation25_spill] sm:$0xff]  ;;  %v8134_v0 = vld [vmem:[#allocation34_spill] sm:$0xff] }
 0x27f   : > { %v4103_v41 = vsel %vm8105_vm15, %v6970_v35, 0  ;;  %v3240_v62 = vsel %vm8107_vm11, %v6997_v43, 0  ;;  %v3014_v20 = vsel %vm856_vm1, %v2922_v46, 0  ;;  %vm8124_vm1 = vcmp.ne.s16.totalorder %v8123_v14, 0 }
 0x280   : > { %vm8142_vm10 = vcmask 1039360  }
 0x281   : > { %3259 = vrot.lane.b32.xlu0 %v3238_v8, %s5488_s11  ;;  %v8132_v8 = vld [vmem:[#allocation28_spill] sm:$0xff]  ;;  %vm8143_vm3 = vmmov %vm8142_vm10 }
 0x282   : > { %3034 = vrot.lane.b32.xlu1 %v3013_v59, %s5492_s21  ;;  %vm8133_vm4 = vcmp.ne.s16.totalorder %v8132_v8, 0 }
 0x283   : > { %v4106_v59 = vsel %vm8133_vm4, %v6997_v43, 0  ;;  %vm8150_vm4 = vmmov %vm8143_vm3 }
 0x284   : > { %v2923_v47 = vld [vmem:[#allocation3 + $0x18] sm:$0xff]  ;;  %v2924_v19 = vld [vmem:[#allocation3 + $0x20] sm:$0xf] }
 0x285   : > { %3149 = vrot.lane.b32.xlu0 %v3129_v32, %s5487_s30  ;;  %v3132_v17 = vsel %vm1000_vm8, %v2923_v47, 0  ;;  %v3123_v36 = vld [vmem:[#allocation3 + $0x20] sm:$0xf]  ;;  %v3015_v33 = vsel %vm857_vm6, %v2923_v47, 0  ;;  %vm8119_vm8 = vcmp.ne.s16.totalorder %v8118_v18, 0  ;;  %v2841_v5 = vsel %vm8124_vm1, %v2923_v47, 0 }
 0x286   : > { %2860 = vrot.lane.b32.xlu1 %v2839_v28, %s5491_s20  ;;  %v3133_v63 = vsel %vm5831_vm13, %v3123_v36, 0  ;;  %v2840_v21 = vsel %vm8119_vm8, %v2922_v46, 0  ;;  %vm8121_vm13 = vcmp.ne.s16.totalorder %v8120_v48, 0  ;;  %v3006_v12 = vld [vmem:[#allocation3 + $0x20] sm:$0xf]  ;;  %vm8127_vm6 = vcmp.ne.s16.totalorder %v8126_v51, 0 }
 0x287   : > { %v3929_v37 = vsel %vm8121_vm13, %v6970_v35, 0  ;;  %v3016_v39 = vsel %vm5878_vm0, %v3006_v12, 0  ;;  %v3930_v45 = vsel %vm8127_vm6, %v6981_v4, 0  ;;  %v2832_v27 = vld [vmem:[#allocation3 + $0x20] sm:$0xf]  ;;  %vm8131_vm0 = vcmp.ne.s16.totalorder %v8130_v24, 0 }
 0x288   : > { %v2842_v1 = vsel %vm5907_vm2, %v2832_v27, 0  ;;  %v4105_v60 = vsel %vm8131_vm0, %v6984_v40, 0  ;;  %v3923_v32 = vld [vmem:[#allocation3 + $0x24] sm:$0xf]  ;;  %v4020_v28 = vld [vmem:[#allocation3 + $0x4c] sm:$0xf]  ;;  %v5311_v18 = vunpack.i.h.bf16 %v7106_v34 }
 0x289   : > { %3032 = vrot.lane.b32.xlu0 %v3012_v9, %s5492_s21  ;;  %v7118_v9 = vpop.permute.xlu1 %3167  ;;  %v3933_v10 = vsel %vm6242_vm12, %v3923_v32, 0  ;;  %vm8146_vm1 = vcmask 7168  }
 0x28a   : > { %2944 = vrot.lane.b32.xlu1 %v2922_v46, %s5493_s26  ;;  %v7120_v46 = vpop.permute.xlu0 %5298  ;;  %v7180_v11 = vrot.slane %v5311_v18, 4  ;;  %vm8147_vm6 = vmmov %vm8146_vm1 }
 0x28b   : > { %v5301_v36 = vunpack.i.h.bf16 %v7120_v46  ;;  %v5300_v13 = vunpack.i.l.bf16 %v7120_v46  ;;  %v5033_v46 = vcombine.high %v6970_v35, %v7056_v55 }
 0x28d   : > { %2858 = vrot.lane.b32.xlu0 %v2838_v7, %s5491_s20  ;;  %v3282_v26 = vrot.slane %v5300_v13, 4 }
 0x28e   : > { %3261 = vrot.lane.b32.xlu1 %v3239_v38, %s5488_s11  ;;  %v8136_v38 = vld [vmem:[#allocation36_spill] sm:$0xff]  ;;  %v7138_v6 = vpop.permute.xlu0 %5313 }
 0x28f   : > { %vm8137_vm2 = vcmp.ne.s16.totalorder %v8136_v38, 0 }
 0x290   : > { %vm8139_vm15 = vmmov %vm8137_vm2 }
 0x291   : > { %2946 = vrot.lane.b32.xlu0 %v2923_v47, %s5493_s26  ;;  %v3937_v47 = vsel %vm8137_vm2, %v7056_v55, 0  ;;  %vm8151_vm2 = vmmov %vm8143_vm3 }
 0x292   : > { %2948 = vrot.lane.b32.xlu1 %v2924_v19, %s5493_s26  ;;  %v4015_v19 = vld [vmem:[#allocation3 + $0x24] sm:$0xf]  ;;  %v5382_v61 = vpack.i.bf16 %v3937_v47, %v3933_v10  ;;  %v7149_v29 = vpop.permute.xlu0 %5318 }
 0x293   : > { %v5377_v54 = vpack.i.bf16 %v7056_v55, %v4015_v19  ;;  %v5390_v19 = vcombine.low %v6966_v25, %v7056_v55 }
 0x295   : > { %2958 = vrot.lane.b32.xlu0 %v2929_v58, %s5493_s26  ;;  %v3931_v58 = vsel %vm8138_vm5, %v6984_v40, 0 }
 0x296   : > { %2876 = vrot.lane.b32.xlu1 %v2847_v2, %s5491_s20  ;;  %v7135_v2 = vpop.permute.xlu1 %5323 }
 0x299   : > { %4123 = vrot.lane.b32.xlu0 %v4103_v41, %s5490_s18  ;;  %v4506_v41 = vld [vmem:[%s7805_s8] sm:$0xff] }
 0x29a   : > { %3263 = vrot.lane.b32.xlu1 %v3240_v62, %s5488_s11  ;;  %v7144_v49 = vpop.permute.xlu1 %5338  ;;  %v3932_v62 = vsel %vm8139_vm15, %v6997_v43, 0  ;;  %s5394_s11 = scalar_lea.vmem %s4797_s25, 512 }
 0x29b   : > { %p5395_p11 = scmp.ne.s32.totalorder %s4797_s25, %s5394_s11 }
 0x29d   : > { %3153 = vrot.lane.b32.xlu0 %v3131_v3, %s5487_s30  ;;  %v3928_v3 = vld [vmem:[#allocation3 + $0x4c] sm:$0xf]  ;;  %p5396_p12 = pnand %p5395_p11, %p5591_p5 }
 0x29e   : > { %4125 = vrot.lane.b32.xlu1 %v4104_v44, %s5490_s18  ;;  %v3938_v16 = vsel %vm6242_vm12, %v3928_v3, 0  ;;  %v7155_v44 = vpop.permute.xlu1 %5343  ;;  %vm8140_vm12 = vcmask 1043456  }
 0x29f   : > { %vm8141_vm11 = vmmov %vm8140_vm12  ;;  %p5397_p13 = pneg %p5396_p12 }
 0x2a0   : > { %vm8144_vm8 = vmmov %vm8141_vm11 }
 0x2a1   : > { %5358 = vrot.lane.b32.xlu0 %v8112_v23, %s5490_s18  ;;  %v7157_v23 = vpop.permute.xlu0 %5328  ;;  %vm8145_vm13 = vmmov %vm8144_vm8 }
 0x2a2   : > { %3155 = vrot.lane.b32.xlu1 %v3132_v17, %s5487_s30  ;;  %v7159_v50 = vpop.permute.xlu1 %3050  ;;  %vm8148_vm7 = vmmov %vm8144_vm8  ;;  %v7878_v25 = vunpack.i.h.bf16 %v7157_v23 }
 0x2a3   : > { %vm8149_vm0 = vmmov %vm8148_vm7 }
 0x2a4   : > { %vm8152_vm5 = vmmov %vm8149_vm0 }
 0x2a5   : > { %4033 = vrot.lane.b32.xlu0 %v6981_v4, %s5494_s27  ;;  %v7161_v17 = vpop.permute.xlu0 %5333  ;;  %vm8153_vm15 = vmmov %vm8149_vm0 }
 0x2a6   : > { %5353 = vrot.lane.b32.xlu1 %v8114_v57, %s5490_s18 }
 0x2a9   : > { %5363 = vrot.lane.b32.xlu0 %v5362_v30, %s5494_s27 }
 0x2aa   : > { %4031 = vrot.lane.b32.xlu1 %v6970_v35, %s5494_s27  ;;  %v5316_v35 = vunpack.i.h.bf16 %v7138_v6 }
 0x2ad   : > { %3157 = vrot.lane.b32.xlu0 %v3133_v63, %s5487_s30  ;;  %s8122_s30 = smov 97  }
 0x2ae   : > { %4035 = vrot.lane.b32.xlu1 %v6984_v40, %s5494_s27 }
 0x2b1   : > { %3036 = vrot.lane.b32.xlu0 %v3014_v20, %s5492_s21  ;;  %v3283_v20 = vrot.slane %v5301_v36, 4 }
 0x2b2   : > { %3038 = vrot.lane.b32.xlu1 %v3015_v33, %s5492_s21 }
 0x2b3   : > { %v3295_v12 = vsel %vm8140_vm12, %v3282_v26, %v3283_v20  ;;  %v5330_v26 = vunpack.i.l.bf16 %v7157_v23  ;;  %vm8154_vm12 = vmmov %vm8149_vm0 }
 0x2b5   : > { %2862 = vrot.lane.b32.xlu0 %v2840_v21, %s5491_s20  ;;  %v5310_v21 = vunpack.i.l.bf16 %v7106_v34 }
 0x2b6   : > { %4045 = vrot.lane.b32.xlu1 %v7056_v55, %s5494_s27 }
 0x2b9   : > { %3949 = vrot.lane.b32.xlu0 %v3929_v37, %s8122_s30 }
 0x2ba   : > { %2864 = vrot.lane.b32.xlu1 %v2841_v5, %s5491_s20 }
 0x2bd   : > { %3040 = vrot.lane.b32.xlu0 %v3016_v39, %s5492_s21  ;;  %v3174_v39 = vrot.slane %v5310_v21, 4 }
 0x2be   : > { %3951 = vrot.lane.b32.xlu1 %v3930_v45, %s8122_s30 }
 0x2bf   : > { %v3187_v32 = vsel %vm8144_vm8, %v3174_v39, %v7180_v11  ;;  %vm8158_vm8 = vmmov %vm8151_vm2 }
 0x2c0   : > { %v3188_v47 = vsel %vm8147_vm6, %v5310_v21, %v3187_v32  ;;  %vm8161_vm6 = vmmov %vm8149_vm0 }
 0x2c1   : > { %3963 = vrot.lane.b32.xlu0 %v3936_v15, %s8122_s30  ;;  %v3296_v15 = vsel %vm8143_vm3, %v5300_v13, %v3295_v12  ;;  %v5321_v13 = vunpack.i.h.bf16 %v7149_v29  ;;  %v7221_v12 = vld [vmem:[%s7804_s7 + $0x4] sm:$0xf]  ;;  %vm8157_vm3 = vmmov %vm8151_vm2 }
 0x2c2   : > { %5368 = vrot.lane.b32.xlu1 %v8114_v57, %s8122_s30  ;;  %v7165_v57 = vpop.permute.xlu0 %5348 }
 0x2c5   : > { %2866 = vrot.lane.b32.xlu0 %v2842_v1, %s5491_s20  ;;  %s7882_s20 = sshll.u32 %s5574_s17, 9 }
 0x2c6   : > { %4037 = vrot.lane.b32.xlu1 %v6997_v43, %s5494_s27 }
 0x2c9   : > { %4127 = vrot.lane.b32.xlu0 %v4105_v60, %s5490_s18 }
 0x2ca   : > { %4129 = vrot.lane.b32.xlu1 %v4106_v59, %s5490_s18  ;;  %v5305_v59 = vunpack.i.l.bf16 %v7095_v56 }
 0x2cc   : > { %v3284_v38 = vrot.slane %v5305_v59, 4 }
 0x2cd   : > { %5373 = vrot.lane.b32.xlu0 %v8134_v0, %s5490_s18  ;;  %s5496_s18 = smov [#allocation7]  }
 0x2ce   : > { %4049 = vrot.lane.b32.xlu1 %v4020_v28, %s5494_s27  ;;  %s5398_s29 = sshll.u32 %s5496_s18, 4  ;;  %s5399_s29 = int_to_ptr.vmem [resolvable:$false] %s5398_s29 }
 0x2cf   : > { %s5400_s0 = scalar_lea.vmem %s5399_s29, 1024  ;;  %p5401_p0 = scmp.lt.s32.totalorder %s4797_s25, %s5399_s29 }
 0x2d0   : > { %p5402_p1 = scmp.lt.s32.totalorder %s5400_s0, %s5394_s11 }
 0x2d1   : > { %3953 = vrot.lane.b32.xlu0 %v3931_v58, %s8122_s30 }
 0x2d2   : > { %5383 = vrot.lane.b32.xlu1 %v5382_v61, %s8122_s30  ;;  %p5403_p2 = por %p5402_p1, %p5401_p0 }
 0x2d4   : > { %p5404_p3 = pnand %p5403_p2, %p5397_p13 }
 0x2d5   : > { %5378 = vrot.lane.b32.xlu0 %v5377_v54, %s5494_s27  ;;  %s4794_s27 = scalar_lea.hbm %s7807_s10, %s7882_s20 }
 0x2d6   : > { %4509 = vperm.xlu1 %5296, %v4506_v41   ;;  %v5315_v41 = vunpack.i.l.bf16 %v7138_v6  ;;  %v5393_v6 = vcombine.low %v6993_v31, %v7056_v55 }
 0x2d9   : > { %3955 = vrot.lane.b32.xlu0 %v3932_v62, %s8122_s30 }
 0x2dd   : > { %3967 = vrot.lane.b32.xlu0 %v3938_v16, %s8122_s30  ;;  %v3297_v16 = vsel %vm8148_vm7, %v3283_v20, %v3284_v38  ;;  %vm8162_vm7 = vmmov %vm8149_vm0  ;;  %s4768_s30 = scalar_lea.sflag [#allocation8], %s6950_s28 }
 0x2e7   : > { %v7163_v30 = vpop.permute.xlu1 %2940 }
 0x2eb   : > { %v3258_v63 = vpop.permute.xlu1 %3257 }
 0x2ec   : > { %v3277_v37 = vrot.slane %v3258_v63, 4 }
 0x2ef   : > { %v7169_v42 = vpop.permute.xlu0 %2942 }
 0x2f0   : > { %v7171_v33 = vpop.permute.xlu1 %3151 }
 0x2f1   : > { %v3170_v27 = vrot.slane %v7171_v33, 4 }
 0x2f3   : > { %v3260_v48 = vpop.permute.xlu0 %3259 }
 0x2f4   : > { %v3278_v14 = vrot.slane %v3260_v48, 4  ;;  %v7175_v5 = vpop.permute.xlu1 %3034 }
 0x2f6   : > { %v3287_v51 = vsel %vm8141_vm11, %v3277_v37, %v3278_v14  ;;  %vm8155_vm11 = vmmov %vm8149_vm0 }
 0x2f7   : > { %v3150_v45 = vpop.permute.xlu0 %3149  ;;  %v3288_v53 = vsel %vm8142_vm10, %v3258_v63, %v3287_v51  ;;  %v5320_v63 = vunpack.i.l.bf16 %v7149_v29  ;;  %v3298_v29 = vsel %vm8151_vm2, %v5301_v36, %v3297_v16  ;;  %v3177_v51 = vrot.slane %v5316_v35, 4  ;;  %vm8156_vm10 = vmmov %vm8146_vm1 }
 0x2f8   : > { %v3169_v1 = vrot.slane %v3150_v45, 4  ;;  %v7186_v24 = vpop.permute.xlu1 %2860  ;;  %v5040_v60 = vcombine.low %v3288_v53, %v3296_v15  ;;  %v5041_v8 = vcombine.high %v3288_v53, %v3296_v15  ;;  %v3286_v15 = vrot.slane %v5321_v13, 4 }
 0x2f9   : > { %v5035_v36 = vcombine.high %v6981_v4, %v7056_v55  ;;  %v5335_v4 = vunpack.i.l.bf16 %v7161_v17 }
 0x2fa   : > { %v3179_v28 = vsel %vm8145_vm13, %v3169_v1, %v3170_v27  ;;  %3478 = vmatprep.subr.bf16.mxu0 %v5041_v8  ;;  %v3285_v1 = vrot.slane %v5320_v63, 4  ;;  %v7235_v8 = vrot.slane %v5330_v26, 4  ;;  %vm8159_vm13 = vmmov %vm8149_vm0 }
 0x2fb   : > { %v3180_v0 = vsel %vm8146_vm1, %v3150_v45, %v3179_v28  ;;  %3479 = vmatpush1.bf16.msra.mxu0 %v5040_v60  ;;  %v7197_v7 = vpop.permute.xlu0 %3032  ;;  %v3176_v45 = vrot.slane %v5315_v41, 4  ;;  %v7233_v60 = vrot.slane %v7878_v25, 4  ;;  %v5306_v28 = vunpack.i.h.bf16 %v7095_v56 }
 0x2fc   : > { %3480 = vmatprep.subr.bf16.mxu0 %v5033_v46  ;;  %v7199_v10 = vpop.permute.xlu1 %2944  ;;  %v5025_v58 = vcombine.high %v3180_v0, %v3188_v47  ;;  %v5024_v62 = vcombine.low %v3180_v0, %v3188_v47  ;;  %v5391_v0 = vcombine.low %v6975_v22, %v7056_v55  ;;  %v3301_v47 = vsel %vm8153_vm15, %v3285_v1, %v3286_v15 }
 0x2fd   : > { %v3191_v46 = vsel %vm8152_vm5, %v3176_v45, %v3177_v51  ;;  %v3074_v16 = vsel %vm8155_vm11, %v7235_v8, %v7233_v60  ;;  %v3281_v22 = vrot.slane %v5306_v28, 4  ;;  %v3189_v15 = vsel %vm8159_vm13, %v7180_v11, %v3176_v45 }
 0x2fe   : > { %vm8160_vm1 = vcmask 252928   ;;  %v5325_v56 = vunpack.i.l.bf16 %v7135_v2  ;;  %v2960_v25 = vrot.slane %v7163_v30, 4 }
 0x2ff   : > { %3481 = vmatpush1.bf16.msra.mxu0 %v5390_v19  ;;  %v7206_v61 = vpop.permute.xlu0 %2858  ;;  %v3299_v19 = vsel %vm8154_vm12, %v3284_v38, %v3285_v1  ;;  %v7271_v1 = vsel %vm8160_vm1, %v5330_v26, %v3074_v16 }
 0x300   : > { %3482 = vmatprep.subr.bf16.mxu0 %v5025_v58  ;;  %v3262_v54 = vpop.permute.xlu1 %3261  ;;  %v7875_v58 = vunpack.i.h.bf16 %v7161_v17 }
 0x301   : > { %v3279_v3 = vrot.slane %v3262_v54, 4 }
 0x303   : > { %v3289_v21 = vsel %vm8149_vm0, %v3278_v14, %v3279_v3  ;;  %3483 = vmatpush1.bf16.msra.mxu0 %v5024_v62  ;;  %v7216_v37 = vpop.permute.xlu0 %2946  ;;  %vm8163_vm0 = vmmov %vm8151_vm2 }
 0x304   : > { %v7223_v39 = vpop.permute.xlu1 %2948  ;;  %v3290_v20 = vsel %vm8150_vm4, %v3260_v48, %v3289_v21  ;;  %v7258_v21 = vsel %vm8156_vm10, %v5315_v41, %v3191_v46  ;;  %v7275_v41 = vrot.slane %v7875_v58, 4  ;;  %v7879_v46 = vunpack.i.l.bf16 %v7165_v57  ;;  %vm8164_vm4 = vmmov %vm8156_vm10 }
 0x305   : > { %v5042_v53 = vcombine.low %v3290_v20, %v3298_v29  ;;  %v5043_v14 = vcombine.high %v3290_v20, %v3298_v29  ;;  %v7261_v20 = vsel %vm8157_vm3, %v5320_v63, %v3301_v47  ;;  %v3300_v29 = vsel %vm8158_vm8, %v5305_v59, %v3299_v19  ;;  %vm8165_vm2 = vmmov %vm8152_vm5 }
 0x306   : > { %5048 = vmatmul.mubr.msk.bf16.vlgmr.msra.gmra.mxu0 %vm1363_vm14, %v7221_v12  ;;  %v7279_v63 = vrot.slane %v5335_v4, 4  ;;  %v3190_v19 = vsel %vm8164_vm4, %v5311_v18, %v3189_v15  ;;  %vm8166_vm5 = vmmov %vm8165_vm2 }
 0x307   : > { %v7237_v48 = vpop.permute.xlu0 %2958  ;;  %3519 = vmatprep.subr.bf16.mxu1 %v5043_v14  ;;  %3582 = vmatprep.mubr.bf16.mxu0 %v7056_v55  ;;  %v5326_v14 = vunpack.i.h.bf16 %v7135_v2  ;;  %vm8167_vm15 = vmmov %vm8163_vm0  ;;  %v2962_v2 = vrot.slane %v7199_v10, 4 }
 0x308   : > { %3520 = vmatpush1.bf16.msra.mxu1 %v5042_v53  ;;  %v7242_v32 = vpop.permute.xlu1 %2876  ;;  %v3178_v53 = vrot.slane %v7118_v9, 4  ;;  %vm8168_vm12 = vmmov %vm8164_vm4 }
 0x309   : > { %3521 = vmatprep.subr.bf16.mxu1 %v5035_v36  ;;  %v7876_v36 = vunpack.i.h.bf16 %v7165_v57  ;;  %v3058_v16 = vrot.slane %v5326_v14, 4  ;;  %vm8169_vm11 = vmmov %vm8165_vm2 }
 0x30a   : > { %vm8170_vm10 = vmmov %vm8165_vm2 }
 0x30b   : > { %v7252_v62 = vpop.permute.xlu0 %4123  ;;  %vm8171_vm3 = vmmov %vm8165_vm2 }
 0x30c   : > { %3522 = vmatpush1.bf16.msra.mxu1 %v5391_v0  ;;  %v3264_v13 = vpop.permute.xlu1 %3263  ;;  %v3052_v0 = vrot.slane %v7197_v7, 4  ;;  %vm8172_vm8 = vmmov %vm8160_vm1 }
 0x30d   : > { %v3280_v38 = vrot.slane %v3264_v13, 4  ;;  %vm8173_vm13 = vmmov %vm8164_vm4 }
 0x30e   : > { %vm8174_vm1 = vmmov %vm8165_vm2 }
 0x30f   : > { %v3291_v9 = vsel %vm8161_vm6, %v3279_v3, %v3280_v38  ;;  %v3154_v59 = vpop.permute.xlu0 %3153  ;;  %v3293_v11 = vsel %vm8162_vm7, %v3280_v38, %v3281_v22  ;;  %v3193_v3 = vsel %vm8165_vm2, %v3177_v51, %v3178_v53  ;;  %v7309_v51 = vrot.slane %v7876_v36, 4  ;;  %vm8175_vm6 = vmmov %vm8174_vm1 }
 0x310   : > { %v3171_v45 = vrot.slane %v3154_v59, 4  ;;  %v7285_v26 = vpop.permute.xlu1 %4125  ;;  %v3292_v28 = vsel %vm8163_vm0, %v3262_v54, %v3291_v9  ;;  %v3057_v54 = vrot.slane %v5325_v56, 4  ;;  %v7877_v9 = vrot.slane %v7175_v5, 4  ;;  %vm8176_vm7 = vmmov %vm8172_vm8 }
 0x311   : > { %v5044_v47 = vcombine.low %v3292_v28, %v3300_v29  ;;  %v5045_v38 = vcombine.high %v3292_v28, %v3300_v29  ;;  %v3294_v58 = vsel %vm8167_vm15, %v3264_v13, %v3293_v11  ;;  %v2885_v13 = vrot.slane %v7879_v46, 4  ;;  %vm8177_vm0 = vmmov %vm8164_vm4 }
 0x312   : > { %v3181_v22 = vsel %vm8166_vm5, %v3170_v27, %v3171_v45  ;;  %v5037_v27 = vcombine.high %v6984_v40, %v7056_v55  ;;  %v5341_v11 = vunpack.i.h.bf16 %v7144_v49  ;;  %v2961_v40 = vrot.slane %v7169_v42, 4  ;;  %vm8178_vm4 = vmmov %vm8174_vm1 }
 0x313   : > { %v7303_v34 = vpop.permute.xlu0 %5358  ;;  %v3182_v18 = vsel %vm8168_vm12, %v7171_v33, %v3181_v22  ;;  %3560 = vmatprep.subr.bf16.mxu0 %v5045_v38  ;;  %v3062_v33 = vsel %vm8169_vm11, %v3052_v0, %v7877_v9  ;;  %v5346_v22 = vunpack.i.h.bf16 %v7155_v44  ;;  %v5345_v38 = vunpack.i.l.bf16 %v7155_v44  ;;  %vm8179_vm2 = vmmov %vm8174_vm1 }
 0x314   : > { %v7311_v53 = vpop.permute.xlu1 %3155  ;;  %v5026_v29 = vcombine.low %v3182_v18, %v3190_v19  ;;  %v5027_v15 = vcombine.high %v3182_v18, %v3190_v19  ;;  %3561 = vmatpush1.bf16.msra.mxu0 %v5044_v47  ;;  %v5047_v19 = vcombine.high %v3294_v58, %v7261_v20  ;;  %v5340_v18 = vunpack.i.l.bf16 %v7144_v49  ;;  %vm8180_vm5 = vmmov %vm8174_vm1 }
 0x315   : > { %v7880_v28 = vrot.slane %v7311_v53, 4  ;;  %3562 = vmatprep.subr.bf16.mxu0 %v5037_v27  ;;  %v3070_v36 = vsel %vm8170_vm10, %v3057_v54, %v3058_v16  ;;  %v5392_v47 = vcombine.low %v6978_v52, %v7056_v55  ;;  %v3063_v27 = vsel %vm8172_vm8, %v7197_v7, %v3062_v33  ;;  %vm8182_vm12 = vmmov %vm8176_vm7 }
 0x316   : > { %3523 = vmatprep.subr.bf16.mxu1 %v5027_v15  ;;  %v3072_v46 = vsel %vm8174_vm1, %v3058_v16, %v7235_v8  ;;  %v5046_v52 = vcombine.low %v3294_v58, %v7261_v20  ;;  %v2884_v7 = vrot.slane %v5346_v22, 4  ;;  %v2883_v33 = vrot.slane %v5345_v38, 4  ;;  %vm8183_vm11 = vmmov %vm8174_vm1 }
 0x317   : > { %v3183_v0 = vsel %vm8171_vm3, %v3171_v45, %v7880_v28  ;;  %v7333_v9 = vpop.permute.xlu0 %4033  ;;  %3524 = vmatpush1.bf16.msra.mxu1 %v5026_v29  ;;  %v2878_v45 = vrot.slane %v7206_v61, 4  ;;  %v5039_v8 = vcombine.high %v6997_v43, %v7056_v55  ;;  %v3061_v58 = vrot.slane %v7159_v50, 4  ;;  %vm8184_vm10 = vmmov %vm8174_vm1 }
 0x318   : > { %3601 = vmatprep.subr.bf16.mxu1 %v5047_v19  ;;  %v7338_v15 = vpop.permute.xlu1 %5353  ;;  %v3184_v54 = vsel %vm8173_vm13, %v3154_v59, %v3183_v0  ;;  %3563 = vmatpush1.bf16.msra.mxu0 %v5392_v47  ;;  %v2970_v59 = vsel %vm8175_vm6, %v2960_v25, %v2961_v40  ;;  %v3071_v20 = vsel %vm8176_vm7, %v5325_v56, %v3070_v36  ;;  %vm8181_vm15 = vcmask 261120   ;;  %vm8185_vm3 = vmmov %vm8174_vm1 }
 0x319   : > { %v5028_v29 = vcombine.low %v3184_v54, %v7258_v21  ;;  %v5029_v28 = vcombine.high %v3184_v54, %v7258_v21  ;;  %v2879_v21 = vrot.slane %v7186_v24, 4  ;;  %v3194_v25 = vsel %vm8177_vm0, %v5316_v35, %v3193_v3  ;;  %vm8186_vm8 = vmmov %vm8181_vm15 }
 0x31a   : > { %5049 = vmatmul.mubr.msk.bf16.vlgmr.msra.gmra.mxu1 %vm1363_vm14, %v7221_v12  ;;  %v5069_v19 = vcombine.high %v3063_v27, %v3071_v20  ;;  %v2978_v43 = vsel %vm8178_vm4, %v7279_v63, %v7275_v41  ;;  %v2900_v50 = vsel %vm8179_vm2, %v2885_v13, %v7309_v51  ;;  %v2971_v35 = vsel %vm8181_vm15, %v7163_v30, %v2970_v59  ;;  %vm8193_vm0 = vmmov %vm8179_vm2 }
 0x31b   : > { %v7363_v16 = vpop.permute.xlu0 %5363  ;;  %3564 = vmatprep.subr.bf16.mxu0 %v5029_v28  ;;  %3602 = vmatpush1.bf16.msra.mxu1 %v5046_v52  ;;  %v2888_v56 = vsel %vm8180_vm5, %v2878_v45, %v2879_v21  ;;  %v7386_v63 = vsel %vm8182_vm12, %v5326_v14, %v3072_v46  ;;  %v7390_v36 = vrot.slane %v5341_v11, 4  ;;  %v2967_v3 = vrot.slane %v5340_v18, 4  ;;  %vm8194_vm4 = vmmov %vm8193_vm0 }
 0x31c   : > { %3603 = vmatprep.subr.bf16.mxu1 %v5039_v8  ;;  %v7368_v0 = vpop.permute.xlu1 %4031  ;;  %3623 = vmatprep.mubr.bf16.mxu1 %v7056_v55  ;;  %v2896_v28 = vsel %vm8183_vm11, %v2883_v33, %v2884_v7  ;;  %v2898_v31 = vsel %vm8184_vm10, %v2884_v7, %v2885_v13  ;;  %v3076_v30 = vsel %vm8185_vm3, %v7233_v60, %v3061_v58  ;;  %vm8187_vm13 = vcmask 269312   ;;  %vm8195_vm2 = vmmov %vm8193_vm0 }
 0x31d   : > { %3565 = vmatpush1.bf16.msra.mxu0 %v5028_v29  ;;  %v5068_v47 = vcombine.low %v3063_v27, %v3071_v20  ;;  %v2979_v46 = vsel %vm8186_vm8, %v5335_v4, %v2978_v43  ;;  %v2889_v54 = vsel %vm8187_vm13, %v7206_v61, %v2888_v56  ;;  %v2963_v45 = vrot.slane %v7216_v37, 4  ;;  %vm8188_vm1 = vmmov %vm8187_vm13 }
 0x31e   : > { %3765 = vmatprep.subr.bf16.mxu0 %v5069_v19  ;;  %v5061_v60 = vcombine.high %v2971_v35, %v2979_v46  ;;  %v2897_v27 = vsel %vm8188_vm1, %v5345_v38, %v2896_v28  ;;  %vm8189_vm6 = vmmov %vm8188_vm1  ;;  %v8190_v4 = vunpack.i.l.bf16 %v7165_v57  ;;  %v8192_v7 = vrot.slane %v7311_v53, 4 }
 0x31f   : > { %v3158_v14 = vpop.permute.xlu0 %3157  ;;  %3604 = vmatpush1.bf16.msra.mxu1 %v5393_v6  ;;  %v7416_v61 = vsel %vm8189_vm6, %v5346_v22, %v2898_v31  ;;  %vm8191_vm7 = vmmov %vm8188_vm1  ;;  %v2980_v38 = vsel %vm8194_vm4, %v7275_v41, %v2967_v3  ;;  %v2982_v59 = vsel %vm8195_vm2, %v2967_v3, %v7390_v36  ;;  %v8196_v44 = vunpack.i.h.bf16 %v7157_v23 }
 0x320   : > { %v3173_v52 = vrot.slane %v3158_v14, 4  ;;  %5050 = vmatmul.mubr.msk.bf16.vlgmr.msra.gmra.mxu0 %vm1363_vm14, %v7221_v12  ;;  %v7407_v13 = vpop.permute.xlu1 %4035  ;;  %v7421_v29 = vsel %vm8191_vm7, %v8190_v4, %v2900_v50  ;;  %vm8197_vm5 = vmmov %vm8182_vm12  ;;  %v5053_v58 = vcombine.high %v2889_v54, %v2897_v27  ;;  %v5060_v20 = vcombine.low %v2971_v35, %v2979_v46 }
 0x321   : > { %3766 = vmatpush1.bf16.msra.mxu0 %v5068_v47  ;;  %3787 = vmatprep.mubr.bf16.mxu0 %v7056_v55  ;;  %v7433_v22 = vsel %vm8197_vm5, %v8196_v44, %v3076_v30  ;;  %vm8198_vm15 = vmmov %vm8193_vm0  ;;  %vm8199_vm12 = vcmask 7168   ;;  %v5356_v3 = vunpack.i.h.bf16 %v7338_v15  ;;  %v5355_v28 = vunpack.i.l.bf16 %v7338_v15 }
 0x322   : > { %v3185_v33 = vsel %vm8193_vm0, %v8192_v7, %v3173_v52  ;;  %3767 = vmatprep.subr.bf16.mxu0 %v5061_v60  ;;  %v2972_v8 = vsel %vm8198_vm15, %v2961_v40, %v2962_v2  ;;  %vm8200_vm11 = vmmov %vm8193_vm0  ;;  %v8201_v35 = vunpack.i.h.bf16 %v7161_v17  ;;  %v5052_v31 = vcombine.low %v2889_v54, %v2897_v27 }
 0x323   : > { %v3037_v19 = vpop.permute.xlu0 %3036  ;;  %v3186_v43 = vsel %vm8199_vm12, %v7311_v53, %v3185_v33  ;;  %v2974_v41 = vsel %vm8200_vm11, %v2962_v2, %v2963_v45  ;;  %vm8202_vm10 = vmmov %vm8186_vm8  ;;  %v8203_v30 = vrot.slane %v7175_v5, 4  ;;  %v2964_v2 = vrot.slane %v7223_v39, 4 }
 0x324   : > { %v3054_v50 = vrot.slane %v3037_v19, 4  ;;  %v7443_v56 = vpop.permute.xlu1 %3038  ;;  %v5030_v23 = vcombine.low %v3186_v43, %v3194_v25  ;;  %v5031_v6 = vcombine.high %v3186_v43, %v3194_v25  ;;  %v2981_v53 = vsel %vm8202_vm10, %v8201_v35, %v2980_v38  ;;  %vm8204_vm3 = vmmov %vm8193_vm0 }
 0x325   : > { %3768 = vmatpush1.bf16.msra.mxu0 %v5060_v20  ;;  %v3055_v40 = vrot.slane %v7443_v56, 4  ;;  %v2973_v25 = vsel %vm8186_vm8, %v7169_v42, %v2972_v8  ;;  %vm8205_vm13 = vmmov %vm8193_vm0  ;;  %v7471_v4 = vrot.slane %v5356_v3, 4  ;;  %v4148_v7 = vrot.slane %v5355_v28, 4 }
 0x326   : > { %v3064_v47 = vsel %vm8204_vm3, %v8203_v30, %v3054_v50  ;;  %3769 = vmatprep.subr.bf16.mxu0 %v5053_v58  ;;  %3605 = vmatprep.subr.bf16.mxu1 %v5031_v6  ;;  %vm8206_vm1 = vmmov %vm8197_vm5  ;;  %v5365_v38 = vunpack.i.l.bf16 %v7363_v16  ;;  %v5063_v8 = vcombine.high %v2973_v25, %v2981_v53  ;;  %v2969_v58 = vrot.slane %v7237_v48, 4 }
 0x327   : > { %v3066_v14 = vsel %vm8205_vm13, %v3054_v50, %v3055_v40  ;;  %v2863_v46 = vpop.permute.xlu0 %2862  ;;  %3606 = vmatpush1.bf16.msra.mxu1 %v5030_v23  ;;  %v3065_v17 = vsel %vm8206_vm1, %v7175_v5, %v3064_v47  ;;  %vm8207_vm6 = vmmov %vm8186_vm8  ;;  %v7478_v5 = vld [vmem:[%s7804_s7] sm:$0xf]  ;;  %vm8210_vm2 = vcmask 269312   ;;  %v5062_v48 = vcombine.low %v2973_v25, %v2981_v53 }
 0x328   : > { %v2975_v54 = vsel %vm8207_vm6, %v7199_v10, %v2974_v41  ;;  %v2880_v52 = vrot.slane %v2863_v46, 4  ;;  %v7464_v60 = vpop.permute.xlu1 %4045  ;;  %v5070_v27 = vcombine.low %v3065_v17, %v7386_v63  ;;  %v5071_v42 = vcombine.high %v3065_v17, %v7386_v63  ;;  %vm8208_vm7 = vmmov %vm8206_vm1 }
 0x329   : > { %v3067_v39 = vsel %vm8208_vm7, %v3037_v19, %v3066_v14  ;;  %3770 = vmatpush1.bf16.msra.mxu0 %v5052_v31  ;;  %v5366_v63 = vunpack.i.h.bf16 %v7363_v16  ;;  %vm8209_vm4 = vmmov %vm8207_vm6  ;;  %v4051_v50 = vrot.slane %v7368_v0, 4  ;;  %v4056_v6 = vrot.slane %v5365_v38, 4 }
 0x32a   : > { %v5072_v10 = vcombine.low %v3067_v39, %v7271_v1  ;;  %v5073_v33 = vcombine.high %v3067_v39, %v7271_v1  ;;  %v2890_v44 = vsel %vm8193_vm0, %v2879_v21, %v2880_v52  ;;  %5051 = vmatmul.mubr.msk.bf16.vlgmr.msra.gmra.mxu1 %vm1363_vm14, %v7221_v12  ;;  %3806 = vmatprep.subr.bf16.mxu1 %v5071_v42  ;;  %vm8211_vm5 = vmmov %vm8193_vm0  ;;  %v4144_v12 = vrot.slane %v7285_v26, 4 }
 0x32b   : > { %v7490_v20 = vpop.permute.xlu0 %3949  ;;  %3807 = vmatpush1.bf16.msra.mxu1 %v5070_v27  ;;  %v2983_v1 = vsel %vm8209_vm4, %v5340_v18, %v2982_v59  ;;  %v2891_v19 = vsel %vm8210_vm2, %v7186_v24, %v2890_v44  ;;  %v2976_v21 = vsel %vm8211_vm5, %v2963_v45, %v2964_v2  ;;  %3828 = vmatprep.mubr.bf16.mxu1 %v7056_v55  ;;  %vm8212_vm15 = vmmov %vm8193_vm0  ;;  %v4143_v59 = vrot.slane %v7252_v62, 4 }
 0x32c   : > { %3847 = vmatprep.subr.bf16.mxu0 %v5073_v33  ;;  %5076 = vmatmul.mubr.msk.bf16.vlgmr.msra.gmra.mxu0 %vm1363_vm14, %v7478_v5  ;;  %v7503_v43 = vpop.permute.xlu1 %2864  ;;  %v5065_v41 = vcombine.high %v2975_v54, %v2983_v1  ;;  %v5064_v24 = vcombine.low %v2975_v54, %v2983_v1  ;;  %v4161_v45 = vsel %vm8212_vm15, %v4148_v7, %v7471_v4  ;;  %v7513_v23 = vrot.slane %v5366_v63, 4  ;;  %vm8213_vm12 = vmmov %vm8193_vm0 }
 0x32d   : > { %3808 = vmatprep.subr.bf16.mxu1 %v5063_v8  ;;  %3848 = vmatpush1.bf16.msra.mxu0 %v5072_v10  ;;  %v2881_v18 = vrot.slane %v7503_v43, 4  ;;  %v5055_v35 = vcombine.high %v2891_v19, %v7416_v61  ;;  %v2984_v53 = vsel %vm8213_vm12, %v7390_v36, %v2969_v58  ;;  %v4052_v31 = vrot.slane %v7333_v9, 4  ;;  %vm8214_vm11 = vmmov %vm8193_vm0 }
 0x32e   : > { %3849 = vmatprep.subr.bf16.mxu0 %v5065_v41  ;;  %3869 = vmatprep.mubr.bf16.mxu0 %v7056_v55  ;;  %vm8215_vm10 = vmmov %vm8209_vm4  ;;  %vm8218_vm13 = vcmask 777216   ;;  %v2887_v39 = vrot.slane %v7242_v32, 4  ;;  %v5360_v7 = vunpack.i.l.bf16 %v7303_v34  ;;  %vm8223_vm4 = vcmask 252928  }
 0x32f   : > { %v2892_v30 = vsel %vm8214_vm11, %v2880_v52, %v2881_v18  ;;  %v3041_v47 = vpop.permute.xlu0 %3040  ;;  %3809 = vmatpush1.bf16.msra.mxu1 %v5062_v48  ;;  %v7527_v25 = vsel %vm8215_vm10, %v7216_v37, %v2976_v21  ;;  %vm8216_vm3 = vmmov %vm8193_vm0  ;;  %v4162_v54 = vsel %vm8218_vm13, %v5355_v28, %v4161_v45  ;;  %v5054_v37 = vcombine.low %v2891_v19, %v7416_v61 }
 0x330   : > { %v4153_v2 = vsel %vm8216_vm3, %v4143_v59, %v4144_v12  ;;  %v3056_v14 = vrot.slane %v3041_v47, 4  ;;  %3810 = vmatprep.subr.bf16.mxu1 %v5055_v35  ;;  %v7532_v17 = vpop.permute.xlu1 %3951  ;;  %vm8217_vm8 = vmmov %vm8210_vm2  ;;  %v7577_v19 = vrot.slane %v5360_v7, 4  ;;  %v8228_v47 = vunpack.i.h.bf16 %v7165_v57 }
 0x331   : > { %v2893_v36 = vsel %vm8217_vm8, %v2863_v46, %v2892_v30  ;;  %vm8219_vm1 = vmmov %vm8193_vm0  ;;  %3850 = vmatpush1.bf16.msra.mxu0 %v5064_v24  ;;  %v3970_v10 = vrot.slane %v7532_v17, 4  ;;  %v4053_v57 = vrot.slane %v7407_v13, 4 }
 0x332   : > { %v4061_v52 = vsel %vm8219_vm1, %v4051_v50, %v4052_v31  ;;  %v5056_v27 = vcombine.low %v2893_v36, %v7421_v29  ;;  %v5057_v42 = vcombine.high %v2893_v36, %v7421_v29  ;;  %vm8220_vm6 = vmmov %vm8193_vm0 }
 0x333   : > { %v4069_v46 = vsel %vm8220_vm6, %v4056_v6, %v7513_v23  ;;  %vm8221_vm7 = vmmov %vm8193_vm0  ;;  %v7552_v33 = vpop.permute.xlu0 %3963  ;;  %3811 = vmatpush1.bf16.msra.mxu1 %v5054_v37  ;;  %v4062_v44 = vsel %vm1985_vm9, %v7368_v0, %v4061_v52  ;;  %v5495_v6 = vmov 1983009808  }
 0x334   : > { %v3068_v28 = vsel %vm8221_vm7, %v3055_v40, %v3056_v14  ;;  %3851 = vmatprep.subr.bf16.mxu0 %v5057_v42  ;;  %vm8222_vm0 = vmmov %vm8218_vm13  ;;  %v7563_v40 = vpop.permute.xlu1 %5368  ;;  %v530_v35 = vunpack.c.l.s4 %v5495_v6 }
 0x335   : > { %v4154_v61 = vsel %vm8222_vm0, %v7252_v62, %v4153_v2  ;;  %v3069_v32 = vsel %vm8223_vm4, %v7443_v56, %v3068_v28  ;;  %vm8224_vm2 = vmmov %vm8215_vm10  ;;  %v4070_v62 = vsel %vm1985_vm9, %v5365_v38, %v4069_v46  ;;  %v3969_v56 = vrot.slane %v7490_v20, 4  ;;  %3852 = vmatpush1.bf16.msra.mxu0 %v5056_v27 }
 0x336   : > { %v2985_v29 = vsel %vm8224_vm2, %v5341_v11, %v2984_v53  ;;  %v5098_v8 = vcombine.high %v4154_v61, %v4162_v54  ;;  %v5074_v58 = vcombine.low %v3069_v32, %v7433_v22  ;;  %v5075_v1 = vcombine.high %v3069_v32, %v7433_v22  ;;  %vm8225_vm5 = vmmov %vm8219_vm1  ;;  %5077 = vmatmul.mubr.msk.bf16.vlgmr.msra.gmra.mxu1 %vm1363_vm14, %v7478_v5 }
 0x337   : > { %v5371_v49 = vunpack.i.h.bf16 %v7563_v40  ;;  %v5370_v11 = vunpack.i.l.bf16 %v7563_v40  ;;  %v2902_v0 = vsel %vm8225_vm5, %v7309_v51, %v2887_v39  ;;  %v5067_v22 = vcombine.high %v7527_v25, %v2985_v29  ;;  %vm8226_vm15 = vmmov %vm8219_vm1  ;;  %v2867_v51 = vpop.permute.xlu0 %2866  ;;  %3910 = vmatprep.mubr.bf16.mxu1 %v7056_v55 }
 0x338   : > { %4344 = vmatprep.subr.bf16.mxu0 %v5098_v8  ;;  %v3979_v38 = vsel %vm8226_vm15, %v3969_v56, %v3970_v10  ;;  %v5097_v41 = vcombine.low %v4154_v61, %v4162_v54  ;;  %3888 = vmatprep.subr.bf16.mxu1 %v5075_v1  ;;  %v5090_v50 = vcombine.high %v4062_v44, %v4070_v62  ;;  %v2882_v24 = vrot.slane %v2867_v51, 4  ;;  %v7591_v59 = vpop.permute.xlu1 %4037  ;;  %vm8227_vm12 = vmmov %vm8219_vm1 }
 0x339   : > { %v3975_v21 = vrot.slane %v5371_v49, 4  ;;  %v3974_v48 = vrot.slane %v5370_v11, 4  ;;  %5078 = vmatmul.mubr.msk.bf16.vlgmr.msra.gmra.mxu0 %vm1363_vm14, %v7478_v5  ;;  %3889 = vmatpush1.bf16.msra.mxu1 %v5074_v58  ;;  %v5066_v45 = vcombine.low %v7527_v25, %v2985_v29  ;;  %v4058_v53 = vrot.slane %v7464_v60, 4  ;;  %vm8229_vm11 = vmmov %vm8217_vm8 }
 0x33a   : > { %3890 = vmatprep.subr.bf16.mxu1 %v5067_v22  ;;  %4345 = vmatpush1.bf16.msra.mxu0 %v5097_v41  ;;  %v2903_v2 = vsel %vm8229_vm11, %v8228_v47, %v2902_v0  ;;  %vm8230_vm10 = vmmov %vm8219_vm1  ;;  %vm8232_vm8 = vcmask 793600   ;;  %v5089_v52 = vcombine.low %v4062_v44, %v4070_v62  ;;  %v531_v28 = vunpack.c.0.s8 %v530_v35 }
 0x33b   : > { %v3987_v30 = vsel %vm8227_vm12, %v3974_v48, %v3975_v21  ;;  %v4163_v14 = vsel %vm8230_vm10, %v7471_v4, %v7577_v19  ;;  %vm8231_vm3 = vmmov %vm8219_vm1  ;;  %4346 = vmatprep.subr.bf16.mxu0 %v5090_v50  ;;  %v3980_v36 = vsel %vm8232_vm8, %v7490_v20, %v3979_v38  ;;  %4366 = vmatprep.mubr.bf16.mxu0 %v7056_v55  ;;  %v4128_v37 = vpop.permute.xlu0 %4127  ;;  %v8236_v61 = vlaneseq  ;;  %v7641_v38 = vld [vmem:[%s7804_s7 + $0x8] sm:$0xf] }
 0x33c   : > { %v2894_v25 = vsel %vm8231_vm3, %v2881_v18, %v2882_v24  ;;  %vm8233_vm13 = vmmov %vm8232_vm8  ;;  %v4145_v42 = vrot.slane %v4128_v37, 4  ;;  %v7611_v39 = vpop.permute.xlu1 %4129  ;;  %v5361_v29 = vunpack.i.h.bf16 %v7303_v34  ;;  %v4164_v8 = vsel %vm8222_vm0, %v5356_v3, %v4163_v14 }
 0x33d   : > { %v3988_v54 = vsel %vm8233_vm13, %v5370_v11, %v3987_v30  ;;  %vm8234_vm1 = vmmov %vm8229_vm11  ;;  %3891 = vmatpush1.bf16.msra.mxu1 %v5066_v45  ;;  %v533_v32 = vshrl.u32 %v8236_v61, 7  ;;  %v4146_v44 = vrot.slane %v7611_v39, 4  ;;  %v3976_v58 = vrot.slane %v7552_v33, 4 }
 0x33e   : > { %v5082_v27 = vcombine.high %v3980_v36, %v3988_v54  ;;  %v2895_v4 = vsel %vm8234_vm1, %v7503_v43, %v2894_v25  ;;  %vm8235_vm6 = vmmov %vm8231_vm3  ;;  %4347 = vmatpush1.bf16.msra.mxu0 %v5089_v52  ;;  %v5081_v1 = vcombine.low %v3980_v36, %v3988_v54  ;;  %v4054_v3 = vrot.slane %v7591_v59, 4 }
 0x33f   : > { %v5058_v18 = vcombine.low %v2895_v4, %v2903_v2  ;;  %v5059_v46 = vcombine.high %v2895_v4, %v2903_v2  ;;  %v4071_v20 = vsel %vm8235_vm6, %v7513_v23, %v4058_v53  ;;  %vm8237_vm7 = vmmov %vm8231_vm3  ;;  %v5374_v62 = vpop.permute.xlu0 %5373  ;;  %v7651_v6 = vsub.s32 %v531_v28, %v533_v32  ;;  %v8252_v32 = vld [vmem:[#allocation11_spill] sm:$0xff] }
 0x340   : > { %v4155_v43 = vsel %vm8237_vm7, %v4144_v12, %v4145_v42  ;;  %4348 = vmatprep.subr.bf16.mxu0 %v5082_v27  ;;  %vm8238_vm4 = vmmov %vm8231_vm3  ;;  %v5376_v12 = vunpack.i.h.bf16 %v5374_v62  ;;  %v5375_v11 = vunpack.i.l.bf16 %v5374_v62  ;;  %v7632_v0 = vpop.permute.xlu1 %4049  ;;  %v4072_v15 = vsel %vm1985_vm9, %v5366_v63, %v4071_v20 }
 0x341   : > { %3892 = vmatprep.subr.bf16.mxu1 %v5059_v46  ;;  %v4063_v23 = vsel %vm8238_vm4, %v4052_v31, %v4053_v57  ;;  %vm8239_vm2 = vmmov %vm8222_vm0  ;;  %v4147_v63 = vrot.slane %v5361_v29, 4  ;;  %v4065_v47 = vsel %vm8231_vm3, %v4053_v57, %v4054_v3  ;;  %v4060_v54 = vrot.slane %v7632_v0, 4 }
 0x342   : > { %v4156_v56 = vsel %vm8239_vm2, %v7285_v26, %v4155_v43  ;;  %3893 = vmatpush1.bf16.msra.mxu1 %v5058_v18  ;;  %4349 = vmatpush1.bf16.msra.mxu0 %v5081_v1  ;;  %vm8240_vm5 = vmmov %vm8231_vm3  ;;  %v4152_v41 = vrot.slane %v5376_v12, 4  ;;  %v4151_v51 = vrot.slane %v5375_v11, 4  ;;  %v4064_v16 = vsel %vm1985_vm9, %v7333_v9, %v4063_v23 }
 0x343   : > { %v5099_v22 = vcombine.low %v4156_v56, %v4164_v8  ;;  %v5100_v31 = vcombine.high %v4156_v56, %v4164_v8  ;;  %v3989_v26 = vsel %vm8240_vm5, %v3975_v21, %v3976_v58  ;;  %vm8241_vm15 = vmmov %vm8231_vm3  ;;  %v3954_v50 = vpop.permute.xlu0 %3953  ;;  %v5091_v24 = vcombine.low %v4064_v16, %v4072_v15 }
 0x344   : > { %v4157_v48 = vsel %vm8241_vm15, %v4145_v42, %v4146_v44  ;;  %v5092_v45 = vcombine.high %v4064_v16, %v4072_v15  ;;  %vm8242_vm12 = vmmov %vm8231_vm3  ;;  %v3971_v21 = vrot.slane %v3954_v50, 4  ;;  %v7656_v30 = vpop.permute.xlu1 %5383  ;;  %v535_v29 = vrot.slane %v8252_v32, %v7651_v6 }
 0x345   : > { %5079 = vmatmul.mubr.msk.bf16.vlgmr.msra.gmra.mxu1 %vm1363_vm14, %v7478_v5  ;;  %4385 = vmatprep.subr.bf16.mxu1 %v5100_v31  ;;  %v4167_v35 = vsel %vm8242_vm12, %v4151_v51, %v4152_v41  ;;  %vm8243_vm11 = vmmov %vm8231_vm3  ;;  %v5386_v2 = vunpack.i.h.bf16 %v7656_v30  ;;  %v5385_v42 = vunpack.i.l.bf16 %v7656_v30  ;;  %v8260_v31 = vld [vmem:[#allocation12_spill] sm:$0xff] }
 0x346   : > { %5105 = vmatmul.mubr.msk.bf16.vlgmr.msra.gmra.mxu0 %vm1363_vm14, %v7641_v38  ;;  %4386 = vmatpush1.bf16.msra.mxu1 %v5099_v22  ;;  %v4165_v9 = vsel %vm8243_vm11, %v7577_v19, %v4151_v51  ;;  %vm8244_vm10 = vmmov %vm8232_vm8  ;;  %v4168_v57 = vsel %vm8222_vm0, %v5375_v11, %v4167_v35 }
 0x347   : > { %v3990_v5 = vsel %vm8244_vm10, %v5371_v49, %v3989_v26  ;;  %4387 = vmatprep.subr.bf16.mxu1 %v5092_v45  ;;  %vm8245_vm8 = vmmov %vm8222_vm0  ;;  %4407 = vmatprep.mubr.bf16.mxu1 %v7056_v55  ;;  %v3977_v52 = vrot.slane %v5386_v2, 4  ;;  %v5379_v34 = vpop.permute.xlu0 %5378  ;;  %v3973_v62 = vrot.slane %v5385_v42, 4  ;;  %v542_v26 = vrot.slane %v8260_v31, %v7651_v6 }
 0x348   : > { %v4158_v14 = vsel %vm8245_vm8, %v4128_v37, %v4157_v48  ;;  %vm8246_vm13 = vmmov %vm8222_vm0  ;;  %4448 = vmatprep.mubr.bf16.mxu0 %v7056_v55  ;;  %v5381_v37 = vunpack.i.h.bf16 %v5379_v34  ;;  %v5380_v27 = vunpack.i.l.bf16 %v5379_v34  ;;  %v8261_v48 = vld [vmem:[#allocation13_spill] sm:$0xff] }
 0x349   : > { %v4166_v25 = vsel %vm8246_vm13, %v5360_v7, %v4165_v9  ;;  %vm8247_vm1 = vmmov %vm8231_vm3  ;;  %v550_v41 = vrot.slane %v8261_v48, %v7651_v6  ;;  %v4522_v9 = vcombine.high %v542_v26, %v542_v26 }
 0x34a   : > { %v4159_v36 = vsel %vm8247_vm1, %v4146_v44, %v4147_v63  ;;  %vm8248_vm6 = vmmov %vm8247_vm1  ;;  %v5101_v49 = vcombine.low %v4158_v14, %v4166_v25  ;;  %v5102_v19 = vcombine.high %v4158_v14, %v4166_v25  ;;  %4388 = vmatpush1.bf16.msra.mxu1 %v5091_v24  ;;  %v4059_v18 = vrot.slane %v5381_v37, 4  ;;  %v5389_v63 = vld [vmem:[#allocation2 + $0x2c] sm:$0xff] }
 0x34b   : > { %v3981_v40 = vsel %vm8248_vm6, %v3970_v10, %v3971_v21  ;;  %vm8249_vm7 = vmmov %vm8244_vm10  ;;  %v4055_v46 = vrot.slane %v5380_v27, 4  ;;  %v3956_v20 = vpop.permute.xlu0 %3955  ;;  %vm4529_vm6 = vcmask 1041408   ;;  %v4523_v25 = vcombine.high %v550_v41, %v550_v41 }
 0x34c   : > { %v3982_v7 = vsel %vm8249_vm7, %v7532_v17, %v3981_v40  ;;  %4426 = vmatprep.subr.bf16.mxu0 %v5102_v19  ;;  %vm8250_vm4 = vmmov %vm8222_vm0  ;;  %v4066_v17 = vsel %vm1985_vm9, %v7407_v13, %v4065_v47  ;;  %v4531_v14 = vsel %vm4529_vm6, %v535_v29, 0  ;;  %v4537_v30 = vsel %vm4529_vm6, %v542_v26, 0 }
 0x34d   : > { %v5083_v10 = vcombine.low %v3982_v7, %v3990_v5  ;;  %v5084_v4 = vcombine.high %v3982_v7, %v3990_v5  ;;  %4427 = vmatpush1.bf16.msra.mxu0 %v5101_v49  ;;  %v4160_v55 = vsel %vm8250_vm4, %v7611_v39, %v4159_v36  ;;  %vm8251_vm2 = vmmov %vm8247_vm1  ;;  %v3972_v39 = vrot.slane %v3956_v20, 4  ;;  %v8265_v5 = vld [vmem:[#allocation14_spill] sm:$0xff] }
 0x34e   : > { %v5104_v28 = vcombine.high %v4160_v55, %v4168_v57  ;;  %v3991_v61 = vsel %vm8251_vm2, %v3976_v58, %v3977_v52  ;;  %vm8253_vm5 = vmmov %vm8247_vm1  ;;  %v5103_v23 = vcombine.low %v4160_v55, %v4168_v57  ;;  %v557_v47 = vrot.slane %v8265_v5, %v7651_v6  ;;  %v4520_v6 = vld [vmem:[%s7803_s6] sm:$0xf] }
 0x34f   : > { %4389 = vmatprep.subr.bf16.mxu1 %v5084_v4  ;;  %v4067_v43 = vsel %vm8253_vm5, %v4054_v3, %v4055_v46  ;;  %vm8254_vm15 = vmmov %vm8247_vm1  ;;  %v4543_v36 = vsel %vm4529_vm6, %v550_v41, 0 }
 0x350   : > { %4390 = vmatpush1.bf16.msra.mxu1 %v5083_v10  ;;  %v4073_v44 = vsel %vm8254_vm15, %v4058_v53, %v4059_v18  ;;  %vm8255_vm12 = vmmov %vm8247_vm1  ;;  %v4068_v58 = vsel %vm1985_vm9, %v7591_v59, %v4067_v43  ;;  %v3968_v53 = vpop.permute.xlu0 %3967 }
 0x351   : > { %v4075_v8 = vsel %vm8255_vm12, %v4059_v18, %v4060_v54  ;;  %4467 = vmatprep.subr.bf16.mxu1 %v5104_v28  ;;  %v4074_v13 = vsel %vm1985_vm9, %v7464_v60, %v4073_v44  ;;  %vm8256_vm11 = vmmov %vm8247_vm1  ;;  %v3978_v59 = vrot.slane %v3968_v53, 4 }
 0x352   : > { %v4076_v1 = vsel %vm1985_vm9, %v5381_v37, %v4075_v8  ;;  %v3983_v56 = vsel %vm8256_vm11, %v3971_v21, %v3972_v39  ;;  %v5093_v12 = vcombine.low %v4066_v17, %v4074_v13  ;;  %v5094_v11 = vcombine.high %v4066_v17, %v4074_v13  ;;  %vm8257_vm10 = vmmov %vm8249_vm7 }
 0x353   : > { %5106 = vmatmul.mubr.msk.bf16.vlgmr.msra.gmra.mxu1 %vm1363_vm14, %v7641_v38  ;;  %v5096_v0 = vcombine.high %v4068_v58, %v4076_v1  ;;  %v3984_v22 = vsel %vm8257_vm10, %v3954_v50, %v3983_v56  ;;  %vm8258_vm3 = vmmov %vm8249_vm7  ;;  %v5095_v16 = vcombine.low %v4068_v58, %v4076_v1  ;;  %vm4525_vm7 = vcmask 31744  }
 0x354   : > { %v3992_v60 = vsel %vm8258_vm3, %v7552_v33, %v3991_v61  ;;  %vm8259_vm8 = vmmov %vm8247_vm1  ;;  %4468 = vmatpush1.bf16.msra.mxu1 %v5103_v23  ;;  %4428 = vmatprep.subr.bf16.mxu0 %v5094_v11  ;;  %v4521_v33 = vcombine.high %v535_v29, %v535_v29 }
 0x355   : > { %v3985_v15 = vsel %vm8259_vm8, %v3972_v39, %v3973_v62  ;;  %v5086_v3 = vcombine.high %v3984_v22, %v3992_v60  ;;  %4469 = vmatprep.subr.bf16.mxu1 %v5096_v0  ;;  %4429 = vmatpush1.bf16.msra.mxu0 %v5093_v12  ;;  %vm8262_vm9 = vmmov %vm8247_vm1  ;;  %v5085_v24 = vcombine.low %v3984_v22, %v3992_v60 }
 0x356   : > { %v3993_v51 = vsel %vm8262_vm9, %v3977_v52, %v3978_v59  ;;  %4489 = vmatprep.mubr.bf16.mxu1 %v5389_v63  ;;  %vm8263_vm13 = vmmov %vm8258_vm3 }
 0x357   : > { %4430 = vmatprep.subr.bf16.mxu0 %v5086_v3  ;;  %v3986_v50 = vsel %vm8263_vm13, %v3956_v20, %v3985_v15  ;;  %vm8264_vm1 = vmmov %vm8258_vm3 }
 0x358   : > { %v3994_v45 = vsel %vm8264_vm1, %v5386_v2, %v3993_v51  ;;  %4470 = vmatpush1.bf16.msra.mxu1 %v5095_v16  ;;  %v4524_v2 = vcombine.high %v557_v47, %v557_v47 }
 0x359   : > { %v5087_v35 = vcombine.low %v3986_v50, %v3994_v45  ;;  %v5088_v21 = vcombine.high %v3986_v50, %v3994_v45  ;;  %4431 = vmatpush1.bf16.msra.mxu0 %v5085_v24 }
 0x35a   : > { %5109 = vmatprep.subr.msk.bf16.mxu0 %vm4529_vm6, %v4521_v33 }
 0x35b   : > { %4471 = vmatprep.subr.bf16.mxu1 %v5088_v21 }
 0x35c   : > { %4472 = vmatpush1.bf16.msra.mxu1 %v5087_v35  ;;  %5107 = vmatmul.mubr.msk.bf16.vlgmr.msra.gmra.mxu0 %vm1363_vm14, %v7641_v38 }
 0x35d   : > { %5111 = vmatprep.subr.msk.bf16.mxu1 %vm4529_vm6, %v4522_v9  ;;  %4569 = vmatpush1.bf16.msra.mxu0 %v4531_v14 }
 0x35e   : > { %4586 = vmatprep.mubr.bf16.mxu0 %v5389_v63  ;;  %5113 = vmatprep.subr.msk.bf16.mxu0 %vm4529_vm6, %v4523_v25 }
 0x35f   : > { %5108 = vmatmul.mubr.msk.bf16.vlgmr.msra.gmra.mxu1 %vm1363_vm14, %v7641_v38  ;;  %v4549_v38 = vsel %vm4529_vm6, %v557_v47, 0 }
 0x360   : > { %4610 = vmatpush1.bf16.msra.mxu1 %v4537_v30  ;;  %4627 = vmatprep.mubr.bf16.mxu1 %v5389_v63 }
 0x361   : > { %5115 = vmatprep.subr.msk.bf16.mxu1 %vm4529_vm6, %v4524_v2 }
 0x364   : > { %5110 = vmatmul.mubr.msk.bf16.vlgmr.msra.gmra.mxu0 %vm4525_vm7, %v4520_v6 }
 0x365   : > { %4651 = vmatpush1.bf16.msra.mxu0 %v4543_v36  ;;  %4668 = vmatprep.mubr.bf16.mxu0 %v5389_v63 }
 0x367   : > { %5112 = vmatmul.mubr.msk.bf16.vlgmr.msra.gmra.mxu1 %vm4525_vm7, %v4520_v6 }
 0x368   : > { %4692 = vmatpush1.bf16.msra.mxu1 %v4549_v38  ;;  %4709 = vmatprep.mubr.bf16.mxu1 %v5389_v63 }
 0x36c   : > { %5114 = vmatmul.mubr.msk.bf16.vlgmr.msra.gmra.mxu0 %vm4525_vm7, %v4520_v6 }
 0x36f   : > { %5116 = vmatmul.mubr.msk.bf16.vlgmr.msra.gmra.mxu1 %vm4525_vm7, %v4520_v6 }
 0x370   : > { %5407 = shalt.err (!%p5404_p3)
}
 0x371   : > { %s5408_s1 = scalar_lea.hbm %s4794_s27, 512  ;;  %s5412_s26 = scalar_lea.hbm %s7807_s10, 1024 }
 0x372   : > { %p5409_p4 = scmp.ne.s32.totalorder %s4794_s27, %s5408_s1  ;;  %p5413_p9 = scmp.lt.s32.totalorder %s4794_s27, %s7807_s10 }
 0x373   : > { %p5414_p10 = scmp.lt.s32.totalorder %s5412_s26, %s5408_s1 }
 0x374   : > { %p5410_p7 = pnand %p5409_p4, %p5591_p5 }
 0x375   : > { %p5415_p11 = por %p5414_p10, %p5413_p9 }
 0x376   : > { %p5411_p8 = pneg %p5410_p7 }
 0x378   : > { %p5416_p12 = pnand %p5415_p11, %p5411_p8 }
 0x37a   : > { %5419 = shalt.err (!%p5416_p12)
}
 0x37b   : > { %5142 = dma.vmem_to_hbm [thread:$0]  (%p5591_p5), %s4797_s25, 512, %s4794_s27, %s4768_s30   ;;  %v4510_v21 = vpop.permute.xlu1 %4509 }
 0x37c   : > { %s8266_s0 = sshll.u32 %s6950_s28, 5  ;;  %s8267_s29 = sshll.u32 %s5574_s17, 9 }
 0x37d   : > { %s371_s1 = scalar_lea.vmem [#allocation5], %s8266_s0  ;;  %s7761_s25 = scalar_lea.hbm %s7806_s9, %s8267_s29 }
 0x37e   : > { %s4782_s2 = sshll.u32 %s371_s1, 4  ;;  %s4763_s30 = scalar_lea.sflag [#allocation6], %s6950_s28  ;;  %s4783_s2 = int_to_ptr.vmem [resolvable:$true] %s4782_s2 }
 0x37f   : > { %s5420_s11 = scalar_lea.vmem %s4783_s2, 512  ;;  %s5497_s18 = smov [#allocation5]  }
 0x380   : > { %p5421_p13 = scmp.ne.s32.totalorder %s4783_s2, %s5420_s11  ;;  %s5424_s12 = sshll.u32 %s5497_s18, 4  ;;  %s5425_s12 = int_to_ptr.vmem [resolvable:$false] %s5424_s12 }
 0x381   : > { %s5426_s21 = scalar_lea.vmem %s5425_s12, 1024  ;;  %p5427_p2 = scmp.lt.s32.totalorder %s4783_s2, %s5425_s12 }
 0x382   : > { %p5422_p0 = pnand %p5421_p13, %p5591_p5  ;;  %p5428_p3 = scmp.lt.s32.totalorder %s5426_s21, %s5420_s11 }
 0x384   : > { %p5423_p1 = pneg %p5422_p0  ;;  %p5429_p4 = por %p5428_p3, %p5427_p2 }
 0x386   : > { %p5430_p7 = pnand %p5429_p4, %p5423_p1 }
 0x3c6   : > { %v3502_v40 = vpop.f32.mrf.mxu0 }
 0x3c8   : > { %v3504_v49 = vpop.f32.mrf.mxu0 }
 0x3ca   : > { %v3506_v19 = vpop.f32.mrf.mxu0 }
 0x3cc   : > { %v3507_v54 = vpop.f32.mrf.mxu0 }
 0x3da   : > { %v3543_v52 = vpop.f32.mrf.mxu1 }
 0x3dc   : > { %v3545_v34 = vpop.f32.mrf.mxu1 }
 0x3de   : > { %v3547_v7 = vpop.f32.mrf.mxu1 }
 0x3e0   : > { %v3548_v57 = vpop.f32.mrf.mxu1  ;;  %v3584_v37 = vpop.f32.mrf.mxu0 }
 0x3e2   : > { %v3586_v27 = vpop.f32.mrf.mxu0 }
 0x3e4   : > { %v3588_v10 = vpop.f32.mrf.mxu0 }
 0x3e6   : > { %v3589_v4 = vpop.f32.mrf.mxu0 }
 0x3ea   : > { %v3625_v55 = vpop.f32.mrf.mxu1 }
 0x3ec   : > { %v3789_v42 = vpop.f32.mrf.mxu0  ;;  %v3627_v18 = vpop.f32.mrf.mxu1 }
 0x3ed   : > { %v3790_v26 = vadd.f32 %v3789_v42, %v3502_v40 }
 0x3ee   : > { %v3791_v46 = vpop.f32.mrf.mxu0  ;;  %v3629_v20 = vpop.f32.mrf.mxu1 }
 0x3ef   : > { %v3792_v48 = vadd.f32 %v3791_v46, %v3504_v49 }
 0x3f0   : > { %v3630_v28 = vpop.f32.mrf.mxu1  ;;  %v3793_v17 = vpop.f32.mrf.mxu0 }
 0x3f2   : > { %v3794_v61 = vpop.f32.mrf.mxu0 }
 0x3f6   : > { %v3830_v32 = vpop.f32.mrf.mxu1 }
 0x3f7   : > { %v3831_v50 = vadd.f32 %v3830_v32, %v3543_v52 }
 0x3f8   : > { %v3832_v43 = vpop.f32.mrf.mxu1 }
 0x3f9   : > { %v3871_v29 = vpop.f32.mrf.mxu0  ;;  %v3833_v24 = vadd.f32 %v3832_v43, %v3545_v34 }
 0x3fa   : > { %v3834_v44 = vpop.f32.mrf.mxu1  ;;  %v3872_v6 = vadd.f32 %v3871_v29, %v3584_v37 }
 0x3fb   : > { %v3873_v39 = vpop.f32.mrf.mxu0 }
 0x3fc   : > { %v3835_v8 = vpop.f32.mrf.mxu1  ;;  %v3874_v36 = vadd.f32 %v3873_v39, %v3586_v27 }
 0x3fd   : > { %v3875_v23 = vpop.f32.mrf.mxu0 }
 0x3ff   : > { %v3876_v13 = vpop.f32.mrf.mxu0 }
 0x405   : > { %v3912_v58 = vpop.f32.mrf.mxu1 }
 0x406   : > { %v4368_v1 = vpop.f32.mrf.mxu0  ;;  %v3913_v4 = vadd.f32 %v3912_v58, %v3625_v55 }
 0x407   : > { %v3914_v62 = vpop.f32.mrf.mxu1  ;;  %v4498_v16 = vadd.f32 %v4368_v1, %v3790_v26 }
 0x408   : > { %v4370_v56 = vpop.f32.mrf.mxu0  ;;  %v3915_v42 = vadd.f32 %v3914_v62, %v3627_v18 }
 0x409   : > { %v3916_v12 = vpop.f32.mrf.mxu1  ;;  %v4499_v63 = vadd.f32 %v4370_v56, %v3792_v48  ;;  %v4512_v25 = vadd.f32 %v4510_v21, %v4498_v16 }
 0x40a   : > { %v4372_v11 = vpop.f32.mrf.mxu0 }
 0x40b   : > { %v3917_v53 = vpop.f32.mrf.mxu1  ;;  %v4513_v30 = vadd.f32 %v4510_v21, %v4499_v63 }
 0x40c   : > { %v4373_v0 = vpop.f32.mrf.mxu0 }
 0x413   : > { %v4409_v22 = vpop.f32.mrf.mxu1 }
 0x414   : > { %v4500_v9 = vadd.f32 %v4409_v22, %v3831_v50 }
 0x415   : > { %v4411_v60 = vpop.f32.mrf.mxu1 }
 0x416   : > { %v4501_v5 = vadd.f32 %v4411_v60, %v3833_v24  ;;  %v4514_v19 = vadd.f32 %v4510_v21, %v4500_v9 }
 0x417   : > { %v4413_v15 = vpop.f32.mrf.mxu1 }
 0x418   : > { %v4515_v52 = vadd.f32 %v4510_v21, %v4501_v5 }
 0x419   : > { %v4414_v59 = vpop.f32.mrf.mxu1 }
 0x41c   : > { %v4450_v3 = vpop.f32.mrf.mxu0 }
 0x41d   : > { %v4502_v34 = vadd.f32 %v4450_v3, %v3872_v6 }
 0x41e   : > { %v4452_v31 = vpop.f32.mrf.mxu0 }
 0x41f   : > { %v4491_v41 = vpop.f32.mrf.mxu1  ;;  %v4503_v7 = vadd.f32 %v4452_v31, %v3874_v36  ;;  %v4516_v43 = vadd.f32 %v4510_v21, %v4502_v34 }
 0x420   : > { %v4454_v51 = vpop.f32.mrf.mxu0  ;;  %v4504_v27 = vadd.f32 %v4491_v41, %v3913_v4 }
 0x421   : > { %v4493_v33 = vpop.f32.mrf.mxu1  ;;  %v4517_v39 = vadd.f32 %v4510_v21, %v4503_v7 }
 0x422   : > { %v4455_v45 = vpop.f32.mrf.mxu0  ;;  %v4505_v17 = vadd.f32 %v4493_v33, %v3915_v42  ;;  %v4518_v23 = vadd.f32 %v4510_v21, %v4504_v27 }
 0x423   : > { %v4495_v35 = vpop.f32.mrf.mxu1 }
 0x424   : > { %v4588_v47 = vpop.f32.mrf.mxu0  ;;  %v4519_v58 = vadd.f32 %v4510_v21, %v4505_v17 }
 0x425   : > { %v4496_v14 = vpop.f32.mrf.mxu1  ;;  %v4718_v38 = vadd.f32 %v4588_v47, %v4512_v25 }
 0x426   : > { %v4590_v2 = vpop.f32.mrf.mxu0 }
 0x427   : > { %v4719_v40 = vadd.f32 %v4590_v2, %v4513_v30  ;;  %v4629_v49 = vpop.f32.mrf.mxu1 }
 0x428   : > { %v4592_v54 = vpop.f32.mrf.mxu0  ;;  %v4720_v46 = vadd.f32 %v4629_v49, %v4514_v19 }
 0x429   : > { %v5135_v57 = vpack.c.bf16 %v4719_v40, %v4718_v38  ;;  %v4631_v10 = vpop.f32.mrf.mxu1 }
 0x42a   : > { %v4721_v20 = vadd.f32 %v4631_v10, %v4515_v52  ;;  %v4593_v28 = vpop.f32.mrf.mxu0 }
 0x42b   : > { %4758 = vst [vmem:[%s371_s1] sm:$0xff] %v5135_v57  ;;  %v4633_v37 = vpop.f32.mrf.mxu1 }
 0x42c   : > { %v5136_v61 = vpack.c.bf16 %v4721_v20, %v4720_v46  ;;  %v4670_v32 = vpop.f32.mrf.mxu0 }
 0x42d   : > { %v4634_v29 = vpop.f32.mrf.mxu1  ;;  %v4722_v8 = vadd.f32 %v4670_v32, %v4516_v43 }
 0x42e   : > { %4759 = vst [vmem:[%s371_s1 + $0x8] sm:$0xff] %v5136_v61  ;;  %v4672_v44 = vpop.f32.mrf.mxu0 }
 0x42f   : > { %v4723_v55 = vadd.f32 %v4672_v44, %v4517_v39  ;;  %v4711_v18 = vpop.f32.mrf.mxu1 }
 0x430   : > { %v4674_v13 = vpop.f32.mrf.mxu0  ;;  %v4724_v56 = vadd.f32 %v4711_v18, %v4518_v23 }
 0x431   : > { %v5137_v1 = vpack.c.bf16 %v4723_v55, %v4722_v8  ;;  %v4713_v62 = vpop.f32.mrf.mxu1 }
 0x432   : > { %v4725_v12 = vadd.f32 %v4713_v62, %v4519_v58  ;;  %v4675_v11 = vpop.f32.mrf.mxu0 }
 0x433   : > { %4760 = vst [vmem:[%s371_s1 + $0x10] sm:$0xff] %v5137_v1  ;;  %v4715_v53 = vpop.f32.mrf.mxu1 }
 0x434   : > { %v5138_v0 = vpack.c.bf16 %v4725_v12, %v4724_v56 }
 0x435   : > { %v4716_v22 = vpop.f32.mrf.mxu1 }
 0x436   : > { %4761 = vst [vmem:[%s371_s1 + $0x18] sm:$0xff] %v5138_v0 }
 0x437   : > { %5433 = shalt.err (!%p5430_p7)
}
 0x438   : > { %s5434_s17 = scalar_lea.hbm %s7761_s25, 512  ;;  %s5438_s0 = scalar_lea.hbm %s7806_s9, 1024 }
 0x439   : > { %p5435_p8 = scmp.ne.s32.totalorder %s7761_s25, %s5434_s17  ;;  %p5439_p11 = scmp.lt.s32.totalorder %s7761_s25, %s7806_s9 }
 0x43a   : > { %p5440_p12 = scmp.lt.s32.totalorder %s5438_s0, %s5434_s17 }
 0x43b   : > { %p5436_p9 = pnand %p5435_p8, %p5591_p5 }
 0x43c   : > { %p5441_p13 = por %p5440_p12, %p5439_p11 }
 0x43d   : > { %p5437_p10 = pneg %p5436_p9 }
 0x43f   : > { %p5442_p0 = pnand %p5441_p13, %p5437_p10 }
 0x441   : > { %5445 = shalt.err (!%p5442_p0)
}
 0x442   : > { %5141 = dma.vmem_to_hbm [thread:$0]  (%p5591_p5), %s4783_s2, 512, %s7761_s25, %s4763_s30  }
 0x443 PF: > { %p5152_p1 = scmp.ge.s32.totalorder %s5484_s16, 2  ;;  %s4808_s20 = sand.u32 1, %s5472_s13  }
 0x444   : > { %s4809_s27 = scalar_lea.sflag [#allocation6], %s4808_s20 }
 0x445   : > { %p5146_p2 = pnand %p5152_p1, %p5595_p6 }
 0x447   : > { %p5147_p3 = pneg %p5146_p2 }
 0x449   : > { %5463 = dma.done.wait (%p5147_p3), %s4809_s27, 512  }
 0x44a   : > { %5465 = vsyncadd (%p5147_p3), %s4809_s27, 4294966784  ;;  %s4818_s11 = scalar_lea.sflag [#allocation8], %s4808_s20 }
 0x44b   : > { %5467 = dma.done.wait (%p5147_p3), %s4818_s11, 512  }
 0x44c   : > { %5469 = vsyncadd (%p5147_p3), %s4818_s11, 4294966784  ;;  %p24_p5 = scmp.ge.s32.totalorder %s5578_s19, 4   ;;  %s8268_s13 = smov %s5476_s14 }
 0x44d   : > { %s8269_s14 = smov %s5480_s15  ;;  %s8270_s15 = smov %s5589_s22 }
 0x44e   : > { %s8271_s16 = smov %s5578_s19  ;;  %26 = sbr.rel (!%p24_p5) target bundleno = 9 (0x9), region = 115 }
 0x453   :  { %4823 = vsyncpa [#allocation6], 1 }
 0x454   :  { %4825 = vsyncpa [#allocation6 + $0x1], 1 }
 0x455   :  { %4826 = vsyncpa [#allocation8], 1 }
 0x456   :  { %4828 = vsyncpa [#allocation8 + $0x1], 1 }

</bundles_post_ra>
